<compile_context>
chip_gen: v7x
topology: tpu7x:2x2x1
jax: 0.10.0
libtpu: 0.0.40
codegen_flags: <defaults>
</compile_context>

<pallas_src>
import functools

import jax
import jax.numpy as jnp
from jax.experimental import pallas as pl
from jax.experimental.pallas import tpu as pltpu


# ----------------------------------------------------------------------------
# Fused bidirectional LSTM recurrence (both directions in one carried state)
# ----------------------------------------------------------------------------

def _bidir_lstm_steps(pre_dense, w_hh, seq_len, batch_p, hidden, collect_outputs):
    """pre_dense: (T*Bp, 8H) hoisted input projection (bias folded), gate columns
    interleaved [i_f,i_b,f_f,f_b,g_f,g_b,o_f,o_b].  Row block t holds the
    forward-direction projection of time t in the forward columns and the
    backward-direction projection of (its own) step t in the backward columns.
    w_hh: (2H, 8H) block-diagonal recurrent weights in the same layout.

    Returns the final hidden (Bp, 2H) = [h_f_final | h_b_final] and, if
    requested, the per-step hiddens stacked time-major (T*Bp, 2H)."""
    g2 = 2 * hidden
    g8 = 8 * hidden
    # True where the column belongs to the forward direction (first H of each slab).
    fwd_mask = (jax.lax.broadcasted_iota(jnp.int32, (1, g8), 1) % g2) < hidden

    h = jnp.zeros((batch_p, g2), jnp.float32)
    c = jnp.zeros((batch_p, g2), jnp.float32)
    outs = []
    for t in range(seq_len):                 # static unroll (T small & fixed)
        rt = seq_len - 1 - t
        p_fwd = pre_dense[t * batch_p:(t + 1) * batch_p, :]    # aligned (8, 8H) tile
        p_bwd = pre_dense[rt * batch_p:(rt + 1) * batch_p, :]  # reversed-time block
        gates = jnp.where(fwd_mask, p_fwd, p_bwd) + jnp.dot(
            h, w_hh, preferred_element_type=jnp.float32)       # one dot per step
        i_g = jax.nn.sigmoid(gates[:, 0 * g2:1 * g2])
        f_g = jax.nn.sigmoid(gates[:, 1 * g2:2 * g2])
        g_g = jnp.tanh(gates[:, 2 * g2:3 * g2])
        o_g = jax.nn.sigmoid(gates[:, 3 * g2:4 * g2])
        c = f_g * c + i_g * g_g
        h = o_g * jnp.tanh(c)
        if collect_outputs:
            outs.append(h)
    hs = jnp.concatenate(outs, axis=0) if collect_outputs else None
    return h, hs


# ----------------------------------------------------------------------------
# Single fused kernel: ELMo layer1 + layer2 + scalar mix + classifier + FC
# ----------------------------------------------------------------------------

def fused_forward_kernel(s_ref, emb_ref,
                         w1_ref, whh1_ref, b1_ref,
                         w2_ref, whh2_ref, b2_ref,
                         w3_ref, whh3_ref, b3_ref,
                         fcw_ref, fcb_ref,
                         logits_ref):
    batch_p = logits_ref.shape[0]
    tb = emb_ref.shape[0]
    seq_len = tb // batch_p
    h1 = whh1_ref.shape[0] // 2
    h2 = whh2_ref.shape[0] // 2
    h3 = whh3_ref.shape[0] // 2

    emb = emb_ref[...]                                          # (TB, E)

    # --- ELMo layer 1 (fwd + bwd fused; hoisted lane-dense projection) -------
    pre1 = jnp.dot(emb, w1_ref[...],
                   preferred_element_type=jnp.float32) + b1_ref[...]
    _, out1 = _bidir_lstm_steps(pre1, whh1_ref[...], seq_len, batch_p, h1, True)
    # out1[t] == cat(forward_output1[t], backward_output1[t])  (layer_output1)

    # --- ELMo layer 2 ---------------------------------------------------------
    # w2 is row-split: forward gates read cols [:H1] of out1, backward gates
    # read cols [H1:], so one matmul projects both directions.
    pre2 = jnp.dot(out1, w2_ref[...],
                   preferred_element_type=jnp.float32) + b2_ref[...]
    _, out2 = _bidir_lstm_steps(pre2, whh2_ref[...], seq_len, batch_p, h2, True)

    # --- ELMo scalar mix ------------------------------------------------------
    l1 = s_ref[0]
    l2 = s_ref[1]
    l3 = s_ref[2]
    gamma = s_ref[3]
    final = gamma * (l1 * emb + l2 * out1 + l3 * out2)          # (TB, E)

    # --- classifier BiLSTM (final hiddens only) + FC head --------------------
    pre3 = jnp.dot(final, w3_ref[...],
                   preferred_element_type=jnp.float32) + b3_ref[...]
    h_last, _ = _bidir_lstm_steps(pre3, whh3_ref[...], seq_len, batch_p, h3, False)
    # h_last == cat(lstm_output[:, -1, :H], lstm_output[:, 0, H:])
    logits_ref[...] = (jnp.dot(h_last, fcw_ref[...],
                               preferred_element_type=jnp.float32) + fcb_ref[...])


def fused_forward(scalars, emb, layer1, layer2, main, fc_w, fc_b, batch_p):
    vspec = pl.BlockSpec(memory_space=pltpu.MemorySpace.VMEM)
    sspec = pl.BlockSpec(memory_space=pltpu.MemorySpace.SMEM)
    out_dim = fc_w.shape[1]
    return pl.pallas_call(
        fused_forward_kernel,
        out_shape=jax.ShapeDtypeStruct((batch_p, out_dim), jnp.float32),
        in_specs=[sspec] + [vspec] * 12,
        out_specs=vspec,
        compiler_params=pltpu.CompilerParams(vmem_limit_bytes=32 * 1024 * 1024),
    )(scalars, emb, *layer1, *layer2, *main, fc_w, fc_b)


# ----------------------------------------------------------------------------
# Parameter construction + packing (done once at build time, not per forward)
# ----------------------------------------------------------------------------

def _lstm_params(key, in_dim, hidden):
    k1, k2, k3 = jax.random.split(key, 3)
    scale = 1.0 / jnp.sqrt(hidden)
    w_ih = jax.random.uniform(k1, (in_dim, 4 * hidden), jnp.float32, -scale, scale)
    w_hh = jax.random.uniform(k2, (hidden, 4 * hidden), jnp.float32, -scale, scale)
    # TODO(synk): single fused bias vs PyTorch nn.LSTM's separate b_ih + b_hh
    # (equivalent up to parameterization of the synthetic weights).
    b = jax.random.uniform(k3, (1, 4 * hidden), jnp.float32, -scale, scale)
    return (w_ih, w_hh, b)


def _interleave_gate_cols(m_f, m_b, hidden):
    """(R, 4H) x 2 -> (R, 8H) with columns [i_f,i_b,f_f,f_b,g_f,g_b,o_f,o_b]."""
    rows = m_f.shape[0]
    stacked = jnp.stack([m_f.reshape(rows, 4, hidden),
                         m_b.reshape(rows, 4, hidden)], axis=2)
    return stacked.reshape(rows, 8 * hidden)


def _pack_bidir(p_f, p_b, split_input):
    """Pack a fwd/bwd LSTM pair into direction-fused, gate-interleaved weights.

    split_input=False: both directions read the same input rows (layer 1,
    classifier).  split_input=True: forward reads input cols [:H_in], backward
    reads cols [H_in:] (ELMo layer 2, whose input is out1 = [fwd1 | bwd1])."""
    w_ih_f, w_hh_f, b_f = p_f
    w_ih_b, w_hh_b, b_b = p_b
    hidden = w_hh_f.shape[0]
    if split_input:
        zi = jnp.zeros_like(w_ih_f)
        w_in = _interleave_gate_cols(jnp.concatenate([w_ih_f, zi], axis=0),
                                     jnp.concatenate([zi, w_ih_b], axis=0), hidden)
    else:
        w_in = _interleave_gate_cols(w_ih_f, w_ih_b, hidden)
    zh = jnp.zeros_like(w_hh_f)
    w_hh = _interleave_gate_cols(jnp.concatenate([w_hh_f, zh], axis=0),
                                 jnp.concatenate([zh, w_hh_b], axis=0), hidden)
    b = _interleave_gate_cols(b_f, b_b, hidden)
    return (w_in, w_hh, b)


def make_params(key, vocab, embd_size, elmo_hidden, hidden_size, output_size):
    keys = jax.random.split(key, 10)
    f1 = _lstm_params(keys[1], embd_size, elmo_hidden)
    b1 = _lstm_params(keys[2], embd_size, elmo_hidden)
    f2 = _lstm_params(keys[3], elmo_hidden, elmo_hidden)
    b2 = _lstm_params(keys[4], elmo_hidden, elmo_hidden)
    mf = _lstm_params(keys[5], embd_size, hidden_size)
    mb = _lstm_params(keys[6], embd_size, hidden_size)
    fc_scale = 1.0 / jnp.sqrt(2 * hidden_size)
    params = {
        "emb": jax.random.normal(keys[0], (vocab, embd_size), jnp.float32),
        "layer1": _pack_bidir(f1, b1, split_input=False),   # (E, 8H1)/(2H1, 8H1)/(1, 8H1)
        "layer2": _pack_bidir(f2, b2, split_input=True),    # (2H1, 8H2)/...
        "main":   _pack_bidir(mf, mb, split_input=False),   # (E, 8H3)/...
        "fc_w": jax.random.uniform(keys[7], (2 * hidden_size, output_size),
                                   jnp.float32, -fc_scale, fc_scale),
        "fc_b": jax.random.uniform(keys[8], (1, output_size), jnp.float32,
                                   -fc_scale, fc_scale),
        # use_trainable_lambdas=False -> fixed lambdas; gamma initialized to 1.
        "lambdas": jnp.array([0.2, 0.4, 0.4], jnp.float32),
        "gamma": jnp.float32(1.0),
    }
    return params


# ----------------------------------------------------------------------------
# Model.forward
# ----------------------------------------------------------------------------

@jax.jit
def model_forward(params, tokens):
    B, T = tokens.shape
    # Pad batch to a full sublane group so every per-timestep slice inside the
    # kernel is an aligned (8, lanes) tile.
    Bp = ((B + 7) // 8) * 8
    tokens_p = jnp.pad(tokens, ((0, Bp - B), (0, 0)))
    # TODO(synk): embedding gather kept in plain JAX (data-dependent gather glue);
    # could be folded into the kernel via scalar-prefetched token ids.
    emb = params["emb"][tokens_p.T].reshape(T * Bp, -1)        # (T*Bp, E), time-major

    lam = params["lambdas"]
    s_sum = lam[0] + lam[1] + lam[2]
    scalars = jnp.stack([lam[0] / s_sum, lam[1] / s_sum, lam[2] / s_sum,
                         params["gamma"]]).astype(jnp.float32)  # (4,)

    logits_p = fused_forward(scalars, emb, params["layer1"], params["layer2"],
                             params["main"], params["fc_w"], params["fc_b"], Bp)
    return logits_p[:B]


def predict(logits):
    return jnp.argmax(logits, axis=1)


# ----------------------------------------------------------------------------

if __name__ == "__main__":
    # Small, self-consistent shapes: embd_size == input_size == 2 * elmo_hidden
    VOCAB = 50
    B, T = 2, 8
    EMBD = 32            # input_size
    ELMO_HIDDEN = 16     # so cat(fwd, bwd) has dim 32 == EMBD
    HIDDEN = 32          # hidden_size of classifier BiLSTM
    OUT = 4              # num classes

    key = jax.random.PRNGKey(0)
    pkey, dkey = jax.random.split(key)
    params = make_params(pkey, VOCAB, EMBD, ELMO_HIDDEN, HIDDEN, OUT)
    tokens = jax.random.randint(dkey, (B, T), 0, VOCAB, dtype=jnp.int32)

    logits = jax.block_until_ready(model_forward(params, tokens))
    preds = jax.block_until_ready(predict(logits))

    assert logits.shape == (B, OUT) and logits.dtype == jnp.float32
    assert preds.shape == (B,)
    print("KERNEL_OK")
</pallas_src>

<mosaic_0001>
module attributes {stable_mosaic.version = 11 : i64} {
  func.func @fused_forward_kernel(%arg0: memref<4xf32, #tpu.memory_space<smem>>, %arg1: memref<64x32xf32, #tpu.memory_space<vmem>>, %arg2: memref<32x128xf32, #tpu.memory_space<vmem>>, %arg3: memref<32x128xf32, #tpu.memory_space<vmem>>, %arg4: memref<1x128xf32, #tpu.memory_space<vmem>>, %arg5: memref<32x128xf32, #tpu.memory_space<vmem>>, %arg6: memref<32x128xf32, #tpu.memory_space<vmem>>, %arg7: memref<1x128xf32, #tpu.memory_space<vmem>>, %arg8: memref<32x256xf32, #tpu.memory_space<vmem>>, %arg9: memref<64x256xf32, #tpu.memory_space<vmem>>, %arg10: memref<1x256xf32, #tpu.memory_space<vmem>>, %arg11: memref<64x4xf32, #tpu.memory_space<vmem>>, %arg12: memref<1x4xf32, #tpu.memory_space<vmem>>, %arg13: memref<8x4xf32, #tpu.memory_space<vmem>>) attributes {dimension_semantics = [], scalar_prefetch = 0 : i64, scratch_operands = 0 : i64, tpu.core_type = #tpu.core_type<tc>} {
    %c0 = arith.constant 0 : index
    %c0_0 = arith.constant 0 : index
    %0 = vector.load %arg1[%c0, %c0_0] : memref<64x32xf32, #tpu.memory_space<vmem>>, vector<64x32xf32>
    %c0_1 = arith.constant 0 : index
    %c0_2 = arith.constant 0 : index
    %1 = vector.load %arg2[%c0_1, %c0_2] : memref<32x128xf32, #tpu.memory_space<vmem>>, vector<32x128xf32>
    %cst = arith.constant dense<0.000000e+00> : vector<64x128xf32>
    %2 = tpu.matmul %0, %1, %cst {dimension_numbers = #tpu.dot_dimension_numbers<[1], [0], [0], [1], [0, 0, 1, 1], [], []>} : vector<64x32xf32>, vector<32x128xf32>, vector<64x128xf32> -> vector<64x128xf32>
    %c0_3 = arith.constant 0 : index
    %c0_4 = arith.constant 0 : index
    %3 = vector.load %arg4[%c0_3, %c0_4] : memref<1x128xf32, #tpu.memory_space<vmem>>, vector<1x128xf32>
    %4 = vector.broadcast %3 : vector<1x128xf32> to vector<64x128xf32>
    %5 = arith.addf %2, %4 : vector<64x128xf32>
    %c0_5 = arith.constant 0 : index
    %c0_6 = arith.constant 0 : index
    %6 = vector.load %arg3[%c0_5, %c0_6] : memref<32x128xf32, #tpu.memory_space<vmem>>, vector<32x128xf32>
    %7 = tpu.iota {dimensions = array<i32: 1>} : vector<1x128xi32>
    %c32_i32 = arith.constant 32 : i32
    %c0_i32 = arith.constant 0 : i32
    %8 = arith.cmpi eq, %c32_i32, %c0_i32 : i32
    %c1_i32 = arith.constant 1 : i32
    %9 = arith.select %8, %c1_i32, %c32_i32 : i32
    %10 = vector.broadcast %9 : i32 to vector<1x128xi32>
    %11 = arith.remsi %7, %10 : vector<1x128xi32>
    %c0_i32_7 = arith.constant 0 : i32
    %12 = vector.broadcast %c0_i32_7 : i32 to vector<1x128xi32>
    %13 = arith.cmpi ne, %11, %12 : vector<1x128xi32>
    %c0_i32_8 = arith.constant 0 : i32
    %14 = vector.broadcast %c0_i32_8 : i32 to vector<1x128xi32>
    %15 = arith.cmpi slt, %11, %14 : vector<1x128xi32>
    %c0_i32_9 = arith.constant 0 : i32
    %16 = arith.cmpi slt, %9, %c0_i32_9 : i32
    %17 = vector.broadcast %16 : i1 to vector<1x128xi1>
    %18 = vector.broadcast %17 : vector<1x128xi1> to vector<1x128xi1>
    %19 = arith.xori %15, %18 : vector<1x128xi1>
    %20 = arith.andi %19, %13 : vector<1x128xi1>
    %21 = vector.broadcast %9 : i32 to vector<1x128xi32>
    %22 = arith.addi %11, %21 : vector<1x128xi32>
    %23 = arith.select %20, %22, %11 : vector<1x128xi1>, vector<1x128xi32>
    %c16_i32 = arith.constant 16 : i32
    %24 = vector.broadcast %c16_i32 : i32 to vector<1x128xi32>
    %25 = arith.cmpi slt, %23, %24 : vector<1x128xi32>
    %cst_10 = arith.constant 0.000000e+00 : f32
    %26 = vector.broadcast %cst_10 : f32 to vector<8x32xf32>
    %cst_11 = arith.constant 0.000000e+00 : f32
    %27 = vector.broadcast %cst_11 : f32 to vector<8x32xf32>
    %28 = vector.extract_strided_slice %5 {offsets = [0, 0], sizes = [8, 128], strides = [1, 1]} : vector<64x128xf32> to vector<8x128xf32>
    %29 = vector.extract_strided_slice %5 {offsets = [56, 0], sizes = [8, 128], strides = [1, 1]} : vector<64x128xf32> to vector<8x128xf32>
    %30 = vector.shape_cast %25 : vector<1x128xi1> to vector<1x128xi1>
    %31 = vector.broadcast %30 : vector<1x128xi1> to vector<8x128xi1>
    %32 = arith.select %31, %28, %29 : vector<8x128xi1>, vector<8x128xf32>
    %cst_12 = arith.constant dense<0.000000e+00> : vector<8x128xf32>
    %33 = tpu.matmul %26, %6, %cst_12 {dimension_numbers = #tpu.dot_dimension_numbers<[1], [0], [0], [1], [0, 0, 1, 1], [], []>} : vector<8x32xf32>, vector<32x128xf32>, vector<8x128xf32> -> vector<8x128xf32>
    %34 = arith.addf %32, %33 : vector<8x128xf32>
    %35 = vector.extract_strided_slice %34 {offsets = [0, 0], sizes = [8, 32], strides = [1, 1]} : vector<8x128xf32> to vector<8x32xf32>
    %36 = arith.negf %35 : vector<8x32xf32>
    %37 = math.exp %36 : vector<8x32xf32>
    %cst_13 = arith.constant 1.000000e+00 : f32
    %38 = vector.broadcast %cst_13 : f32 to vector<8x32xf32>
    %39 = arith.addf %38, %37 : vector<8x32xf32>
    %40 = arith.divf %38, %39 : vector<8x32xf32>
    %41 = vector.extract_strided_slice %34 {offsets = [0, 32], sizes = [8, 32], strides = [1, 1]} : vector<8x128xf32> to vector<8x32xf32>
    %42 = arith.negf %41 : vector<8x32xf32>
    %43 = math.exp %42 : vector<8x32xf32>
    %cst_14 = arith.constant 1.000000e+00 : f32
    %44 = vector.broadcast %cst_14 : f32 to vector<8x32xf32>
    %45 = arith.addf %44, %43 : vector<8x32xf32>
    %46 = arith.divf %44, %45 : vector<8x32xf32>
    %47 = vector.extract_strided_slice %34 {offsets = [0, 64], sizes = [8, 32], strides = [1, 1]} : vector<8x128xf32> to vector<8x32xf32>
    %48 = math.tanh %47 : vector<8x32xf32>
    %49 = vector.extract_strided_slice %34 {offsets = [0, 96], sizes = [8, 32], strides = [1, 1]} : vector<8x128xf32> to vector<8x32xf32>
    %50 = arith.negf %49 : vector<8x32xf32>
    %51 = math.exp %50 : vector<8x32xf32>
    %cst_15 = arith.constant 1.000000e+00 : f32
    %52 = vector.broadcast %cst_15 : f32 to vector<8x32xf32>
    %53 = arith.addf %52, %51 : vector<8x32xf32>
    %54 = arith.divf %52, %53 : vector<8x32xf32>
    %55 = arith.mulf %46, %27 : vector<8x32xf32>
    %56 = arith.mulf %40, %48 : vector<8x32xf32>
    %57 = arith.addf %55, %56 : vector<8x32xf32>
    %58 = math.tanh %57 : vector<8x32xf32>
    %59 = arith.mulf %54, %58 : vector<8x32xf32>
    %60 = vector.extract_strided_slice %5 {offsets = [8, 0], sizes = [8, 128], strides = [1, 1]} : vector<64x128xf32> to vector<8x128xf32>
    %61 = vector.extract_strided_slice %5 {offsets = [48, 0], sizes = [8, 128], strides = [1, 1]} : vector<64x128xf32> to vector<8x128xf32>
    %62 = vector.shape_cast %25 : vector<1x128xi1> to vector<1x128xi1>
    %63 = vector.broadcast %62 : vector<1x128xi1> to vector<8x128xi1>
    %64 = arith.select %63, %60, %61 : vector<8x128xi1>, vector<8x128xf32>
    %cst_16 = arith.constant dense<0.000000e+00> : vector<8x128xf32>
    %65 = tpu.matmul %59, %6, %cst_16 {dimension_numbers = #tpu.dot_dimension_numbers<[1], [0], [0], [1], [0, 0, 1, 1], [], []>} : vector<8x32xf32>, vector<32x128xf32>, vector<8x128xf32> -> vector<8x128xf32>
    %66 = arith.addf %64, %65 : vector<8x128xf32>
    %67 = vector.extract_strided_slice %66 {offsets = [0, 0], sizes = [8, 32], strides = [1, 1]} : vector<8x128xf32> to vector<8x32xf32>
    %68 = arith.negf %67 : vector<8x32xf32>
    %69 = math.exp %68 : vector<8x32xf32>
    %cst_17 = arith.constant 1.000000e+00 : f32
    %70 = vector.broadcast %cst_17 : f32 to vector<8x32xf32>
    %71 = arith.addf %70, %69 : vector<8x32xf32>
    %72 = arith.divf %70, %71 : vector<8x32xf32>
    %73 = vector.extract_strided_slice %66 {offsets = [0, 32], sizes = [8, 32], strides = [1, 1]} : vector<8x128xf32> to vector<8x32xf32>
    %74 = arith.negf %73 : vector<8x32xf32>
    %75 = math.exp %74 : vector<8x32xf32>
    %cst_18 = arith.constant 1.000000e+00 : f32
    %76 = vector.broadcast %cst_18 : f32 to vector<8x32xf32>
    %77 = arith.addf %76, %75 : vector<8x32xf32>
    %78 = arith.divf %76, %77 : vector<8x32xf32>
    %79 = vector.extract_strided_slice %66 {offsets = [0, 64], sizes = [8, 32], strides = [1, 1]} : vector<8x128xf32> to vector<8x32xf32>
    %80 = math.tanh %79 : vector<8x32xf32>
    %81 = vector.extract_strided_slice %66 {offsets = [0, 96], sizes = [8, 32], strides = [1, 1]} : vector<8x128xf32> to vector<8x32xf32>
    %82 = arith.negf %81 : vector<8x32xf32>
    %83 = math.exp %82 : vector<8x32xf32>
    %cst_19 = arith.constant 1.000000e+00 : f32
    %84 = vector.broadcast %cst_19 : f32 to vector<8x32xf32>
    %85 = arith.addf %84, %83 : vector<8x32xf32>
    %86 = arith.divf %84, %85 : vector<8x32xf32>
    %87 = arith.mulf %78, %57 : vector<8x32xf32>
    %88 = arith.mulf %72, %80 : vector<8x32xf32>
    %89 = arith.addf %87, %88 : vector<8x32xf32>
    %90 = math.tanh %89 : vector<8x32xf32>
    %91 = arith.mulf %86, %90 : vector<8x32xf32>
    %92 = vector.extract_strided_slice %5 {offsets = [16, 0], sizes = [8, 128], strides = [1, 1]} : vector<64x128xf32> to vector<8x128xf32>
    %93 = vector.extract_strided_slice %5 {offsets = [40, 0], sizes = [8, 128], strides = [1, 1]} : vector<64x128xf32> to vector<8x128xf32>
    %94 = vector.shape_cast %25 : vector<1x128xi1> to vector<1x128xi1>
    %95 = vector.broadcast %94 : vector<1x128xi1> to vector<8x128xi1>
    %96 = arith.select %95, %92, %93 : vector<8x128xi1>, vector<8x128xf32>
    %cst_20 = arith.constant dense<0.000000e+00> : vector<8x128xf32>
    %97 = tpu.matmul %91, %6, %cst_20 {dimension_numbers = #tpu.dot_dimension_numbers<[1], [0], [0], [1], [0, 0, 1, 1], [], []>} : vector<8x32xf32>, vector<32x128xf32>, vector<8x128xf32> -> vector<8x128xf32>
    %98 = arith.addf %96, %97 : vector<8x128xf32>
    %99 = vector.extract_strided_slice %98 {offsets = [0, 0], sizes = [8, 32], strides = [1, 1]} : vector<8x128xf32> to vector<8x32xf32>
    %100 = arith.negf %99 : vector<8x32xf32>
    %101 = math.exp %100 : vector<8x32xf32>
    %cst_21 = arith.constant 1.000000e+00 : f32
    %102 = vector.broadcast %cst_21 : f32 to vector<8x32xf32>
    %103 = arith.addf %102, %101 : vector<8x32xf32>
    %104 = arith.divf %102, %103 : vector<8x32xf32>
    %105 = vector.extract_strided_slice %98 {offsets = [0, 32], sizes = [8, 32], strides = [1, 1]} : vector<8x128xf32> to vector<8x32xf32>
    %106 = arith.negf %105 : vector<8x32xf32>
    %107 = math.exp %106 : vector<8x32xf32>
    %cst_22 = arith.constant 1.000000e+00 : f32
    %108 = vector.broadcast %cst_22 : f32 to vector<8x32xf32>
    %109 = arith.addf %108, %107 : vector<8x32xf32>
    %110 = arith.divf %108, %109 : vector<8x32xf32>
    %111 = vector.extract_strided_slice %98 {offsets = [0, 64], sizes = [8, 32], strides = [1, 1]} : vector<8x128xf32> to vector<8x32xf32>
    %112 = math.tanh %111 : vector<8x32xf32>
    %113 = vector.extract_strided_slice %98 {offsets = [0, 96], sizes = [8, 32], strides = [1, 1]} : vector<8x128xf32> to vector<8x32xf32>
    %114 = arith.negf %113 : vector<8x32xf32>
    %115 = math.exp %114 : vector<8x32xf32>
    %cst_23 = arith.constant 1.000000e+00 : f32
    %116 = vector.broadcast %cst_23 : f32 to vector<8x32xf32>
    %117 = arith.addf %116, %115 : vector<8x32xf32>
    %118 = arith.divf %116, %117 : vector<8x32xf32>
    %119 = arith.mulf %110, %89 : vector<8x32xf32>
    %120 = arith.mulf %104, %112 : vector<8x32xf32>
    %121 = arith.addf %119, %120 : vector<8x32xf32>
    %122 = math.tanh %121 : vector<8x32xf32>
    %123 = arith.mulf %118, %122 : vector<8x32xf32>
    %124 = vector.extract_strided_slice %5 {offsets = [24, 0], sizes = [8, 128], strides = [1, 1]} : vector<64x128xf32> to vector<8x128xf32>
    %125 = vector.extract_strided_slice %5 {offsets = [32, 0], sizes = [8, 128], strides = [1, 1]} : vector<64x128xf32> to vector<8x128xf32>
    %126 = vector.shape_cast %25 : vector<1x128xi1> to vector<1x128xi1>
    %127 = vector.broadcast %126 : vector<1x128xi1> to vector<8x128xi1>
    %128 = arith.select %127, %124, %125 : vector<8x128xi1>, vector<8x128xf32>
    %cst_24 = arith.constant dense<0.000000e+00> : vector<8x128xf32>
    %129 = tpu.matmul %123, %6, %cst_24 {dimension_numbers = #tpu.dot_dimension_numbers<[1], [0], [0], [1], [0, 0, 1, 1], [], []>} : vector<8x32xf32>, vector<32x128xf32>, vector<8x128xf32> -> vector<8x128xf32>
    %130 = arith.addf %128, %129 : vector<8x128xf32>
    %131 = vector.extract_strided_slice %130 {offsets = [0, 0], sizes = [8, 32], strides = [1, 1]} : vector<8x128xf32> to vector<8x32xf32>
    %132 = arith.negf %131 : vector<8x32xf32>
    %133 = math.exp %132 : vector<8x32xf32>
    %cst_25 = arith.constant 1.000000e+00 : f32
    %134 = vector.broadcast %cst_25 : f32 to vector<8x32xf32>
    %135 = arith.addf %134, %133 : vector<8x32xf32>
    %136 = arith.divf %134, %135 : vector<8x32xf32>
    %137 = vector.extract_strided_slice %130 {offsets = [0, 32], sizes = [8, 32], strides = [1, 1]} : vector<8x128xf32> to vector<8x32xf32>
    %138 = arith.negf %137 : vector<8x32xf32>
    %139 = math.exp %138 : vector<8x32xf32>
    %cst_26 = arith.constant 1.000000e+00 : f32
    %140 = vector.broadcast %cst_26 : f32 to vector<8x32xf32>
    %141 = arith.addf %140, %139 : vector<8x32xf32>
    %142 = arith.divf %140, %141 : vector<8x32xf32>
    %143 = vector.extract_strided_slice %130 {offsets = [0, 64], sizes = [8, 32], strides = [1, 1]} : vector<8x128xf32> to vector<8x32xf32>
    %144 = math.tanh %143 : vector<8x32xf32>
    %145 = vector.extract_strided_slice %130 {offsets = [0, 96], sizes = [8, 32], strides = [1, 1]} : vector<8x128xf32> to vector<8x32xf32>
    %146 = arith.negf %145 : vector<8x32xf32>
    %147 = math.exp %146 : vector<8x32xf32>
    %cst_27 = arith.constant 1.000000e+00 : f32
    %148 = vector.broadcast %cst_27 : f32 to vector<8x32xf32>
    %149 = arith.addf %148, %147 : vector<8x32xf32>
    %150 = arith.divf %148, %149 : vector<8x32xf32>
    %151 = arith.mulf %142, %121 : vector<8x32xf32>
    %152 = arith.mulf %136, %144 : vector<8x32xf32>
    %153 = arith.addf %151, %152 : vector<8x32xf32>
    %154 = math.tanh %153 : vector<8x32xf32>
    %155 = arith.mulf %150, %154 : vector<8x32xf32>
    %156 = vector.extract_strided_slice %5 {offsets = [32, 0], sizes = [8, 128], strides = [1, 1]} : vector<64x128xf32> to vector<8x128xf32>
    %157 = vector.extract_strided_slice %5 {offsets = [24, 0], sizes = [8, 128], strides = [1, 1]} : vector<64x128xf32> to vector<8x128xf32>
    %158 = vector.shape_cast %25 : vector<1x128xi1> to vector<1x128xi1>
    %159 = vector.broadcast %158 : vector<1x128xi1> to vector<8x128xi1>
    %160 = arith.select %159, %156, %157 : vector<8x128xi1>, vector<8x128xf32>
    %cst_28 = arith.constant dense<0.000000e+00> : vector<8x128xf32>
    %161 = tpu.matmul %155, %6, %cst_28 {dimension_numbers = #tpu.dot_dimension_numbers<[1], [0], [0], [1], [0, 0, 1, 1], [], []>} : vector<8x32xf32>, vector<32x128xf32>, vector<8x128xf32> -> vector<8x128xf32>
    %162 = arith.addf %160, %161 : vector<8x128xf32>
    %163 = vector.extract_strided_slice %162 {offsets = [0, 0], sizes = [8, 32], strides = [1, 1]} : vector<8x128xf32> to vector<8x32xf32>
    %164 = arith.negf %163 : vector<8x32xf32>
    %165 = math.exp %164 : vector<8x32xf32>
    %cst_29 = arith.constant 1.000000e+00 : f32
    %166 = vector.broadcast %cst_29 : f32 to vector<8x32xf32>
    %167 = arith.addf %166, %165 : vector<8x32xf32>
    %168 = arith.divf %166, %167 : vector<8x32xf32>
    %169 = vector.extract_strided_slice %162 {offsets = [0, 32], sizes = [8, 32], strides = [1, 1]} : vector<8x128xf32> to vector<8x32xf32>
    %170 = arith.negf %169 : vector<8x32xf32>
    %171 = math.exp %170 : vector<8x32xf32>
    %cst_30 = arith.constant 1.000000e+00 : f32
    %172 = vector.broadcast %cst_30 : f32 to vector<8x32xf32>
    %173 = arith.addf %172, %171 : vector<8x32xf32>
    %174 = arith.divf %172, %173 : vector<8x32xf32>
    %175 = vector.extract_strided_slice %162 {offsets = [0, 64], sizes = [8, 32], strides = [1, 1]} : vector<8x128xf32> to vector<8x32xf32>
    %176 = math.tanh %175 : vector<8x32xf32>
    %177 = vector.extract_strided_slice %162 {offsets = [0, 96], sizes = [8, 32], strides = [1, 1]} : vector<8x128xf32> to vector<8x32xf32>
    %178 = arith.negf %177 : vector<8x32xf32>
    %179 = math.exp %178 : vector<8x32xf32>
    %cst_31 = arith.constant 1.000000e+00 : f32
    %180 = vector.broadcast %cst_31 : f32 to vector<8x32xf32>
    %181 = arith.addf %180, %179 : vector<8x32xf32>
    %182 = arith.divf %180, %181 : vector<8x32xf32>
    %183 = arith.mulf %174, %153 : vector<8x32xf32>
    %184 = arith.mulf %168, %176 : vector<8x32xf32>
    %185 = arith.addf %183, %184 : vector<8x32xf32>
    %186 = math.tanh %185 : vector<8x32xf32>
    %187 = arith.mulf %182, %186 : vector<8x32xf32>
    %188 = vector.extract_strided_slice %5 {offsets = [40, 0], sizes = [8, 128], strides = [1, 1]} : vector<64x128xf32> to vector<8x128xf32>
    %189 = vector.extract_strided_slice %5 {offsets = [16, 0], sizes = [8, 128], strides = [1, 1]} : vector<64x128xf32> to vector<8x128xf32>
    %190 = vector.shape_cast %25 : vector<1x128xi1> to vector<1x128xi1>
    %191 = vector.broadcast %190 : vector<1x128xi1> to vector<8x128xi1>
    %192 = arith.select %191, %188, %189 : vector<8x128xi1>, vector<8x128xf32>
    %cst_32 = arith.constant dense<0.000000e+00> : vector<8x128xf32>
    %193 = tpu.matmul %187, %6, %cst_32 {dimension_numbers = #tpu.dot_dimension_numbers<[1], [0], [0], [1], [0, 0, 1, 1], [], []>} : vector<8x32xf32>, vector<32x128xf32>, vector<8x128xf32> -> vector<8x128xf32>
    %194 = arith.addf %192, %193 : vector<8x128xf32>
    %195 = vector.extract_strided_slice %194 {offsets = [0, 0], sizes = [8, 32], strides = [1, 1]} : vector<8x128xf32> to vector<8x32xf32>
    %196 = arith.negf %195 : vector<8x32xf32>
    %197 = math.exp %196 : vector<8x32xf32>
    %cst_33 = arith.constant 1.000000e+00 : f32
    %198 = vector.broadcast %cst_33 : f32 to vector<8x32xf32>
    %199 = arith.addf %198, %197 : vector<8x32xf32>
    %200 = arith.divf %198, %199 : vector<8x32xf32>
    %201 = vector.extract_strided_slice %194 {offsets = [0, 32], sizes = [8, 32], strides = [1, 1]} : vector<8x128xf32> to vector<8x32xf32>
    %202 = arith.negf %201 : vector<8x32xf32>
    %203 = math.exp %202 : vector<8x32xf32>
    %cst_34 = arith.constant 1.000000e+00 : f32
    %204 = vector.broadcast %cst_34 : f32 to vector<8x32xf32>
    %205 = arith.addf %204, %203 : vector<8x32xf32>
    %206 = arith.divf %204, %205 : vector<8x32xf32>
    %207 = vector.extract_strided_slice %194 {offsets = [0, 64], sizes = [8, 32], strides = [1, 1]} : vector<8x128xf32> to vector<8x32xf32>
    %208 = math.tanh %207 : vector<8x32xf32>
    %209 = vector.extract_strided_slice %194 {offsets = [0, 96], sizes = [8, 32], strides = [1, 1]} : vector<8x128xf32> to vector<8x32xf32>
    %210 = arith.negf %209 : vector<8x32xf32>
    %211 = math.exp %210 : vector<8x32xf32>
    %cst_35 = arith.constant 1.000000e+00 : f32
    %212 = vector.broadcast %cst_35 : f32 to vector<8x32xf32>
    %213 = arith.addf %212, %211 : vector<8x32xf32>
    %214 = arith.divf %212, %213 : vector<8x32xf32>
    %215 = arith.mulf %206, %185 : vector<8x32xf32>
    %216 = arith.mulf %200, %208 : vector<8x32xf32>
    %217 = arith.addf %215, %216 : vector<8x32xf32>
    %218 = math.tanh %217 : vector<8x32xf32>
    %219 = arith.mulf %214, %218 : vector<8x32xf32>
    %220 = vector.extract_strided_slice %5 {offsets = [48, 0], sizes = [8, 128], strides = [1, 1]} : vector<64x128xf32> to vector<8x128xf32>
    %221 = vector.extract_strided_slice %5 {offsets = [8, 0], sizes = [8, 128], strides = [1, 1]} : vector<64x128xf32> to vector<8x128xf32>
    %222 = vector.shape_cast %25 : vector<1x128xi1> to vector<1x128xi1>
    %223 = vector.broadcast %222 : vector<1x128xi1> to vector<8x128xi1>
    %224 = arith.select %223, %220, %221 : vector<8x128xi1>, vector<8x128xf32>
    %cst_36 = arith.constant dense<0.000000e+00> : vector<8x128xf32>
    %225 = tpu.matmul %219, %6, %cst_36 {dimension_numbers = #tpu.dot_dimension_numbers<[1], [0], [0], [1], [0, 0, 1, 1], [], []>} : vector<8x32xf32>, vector<32x128xf32>, vector<8x128xf32> -> vector<8x128xf32>
    %226 = arith.addf %224, %225 : vector<8x128xf32>
    %227 = vector.extract_strided_slice %226 {offsets = [0, 0], sizes = [8, 32], strides = [1, 1]} : vector<8x128xf32> to vector<8x32xf32>
    %228 = arith.negf %227 : vector<8x32xf32>
    %229 = math.exp %228 : vector<8x32xf32>
    %cst_37 = arith.constant 1.000000e+00 : f32
    %230 = vector.broadcast %cst_37 : f32 to vector<8x32xf32>
    %231 = arith.addf %230, %229 : vector<8x32xf32>
    %232 = arith.divf %230, %231 : vector<8x32xf32>
    %233 = vector.extract_strided_slice %226 {offsets = [0, 32], sizes = [8, 32], strides = [1, 1]} : vector<8x128xf32> to vector<8x32xf32>
    %234 = arith.negf %233 : vector<8x32xf32>
    %235 = math.exp %234 : vector<8x32xf32>
    %cst_38 = arith.constant 1.000000e+00 : f32
    %236 = vector.broadcast %cst_38 : f32 to vector<8x32xf32>
    %237 = arith.addf %236, %235 : vector<8x32xf32>
    %238 = arith.divf %236, %237 : vector<8x32xf32>
    %239 = vector.extract_strided_slice %226 {offsets = [0, 64], sizes = [8, 32], strides = [1, 1]} : vector<8x128xf32> to vector<8x32xf32>
    %240 = math.tanh %239 : vector<8x32xf32>
    %241 = vector.extract_strided_slice %226 {offsets = [0, 96], sizes = [8, 32], strides = [1, 1]} : vector<8x128xf32> to vector<8x32xf32>
    %242 = arith.negf %241 : vector<8x32xf32>
    %243 = math.exp %242 : vector<8x32xf32>
    %cst_39 = arith.constant 1.000000e+00 : f32
    %244 = vector.broadcast %cst_39 : f32 to vector<8x32xf32>
    %245 = arith.addf %244, %243 : vector<8x32xf32>
    %246 = arith.divf %244, %245 : vector<8x32xf32>
    %247 = arith.mulf %238, %217 : vector<8x32xf32>
    %248 = arith.mulf %232, %240 : vector<8x32xf32>
    %249 = arith.addf %247, %248 : vector<8x32xf32>
    %250 = math.tanh %249 : vector<8x32xf32>
    %251 = arith.mulf %246, %250 : vector<8x32xf32>
    %252 = vector.extract_strided_slice %5 {offsets = [56, 0], sizes = [8, 128], strides = [1, 1]} : vector<64x128xf32> to vector<8x128xf32>
    %253 = vector.extract_strided_slice %5 {offsets = [0, 0], sizes = [8, 128], strides = [1, 1]} : vector<64x128xf32> to vector<8x128xf32>
    %254 = vector.shape_cast %25 : vector<1x128xi1> to vector<1x128xi1>
    %255 = vector.broadcast %254 : vector<1x128xi1> to vector<8x128xi1>
    %256 = arith.select %255, %252, %253 : vector<8x128xi1>, vector<8x128xf32>
    %cst_40 = arith.constant dense<0.000000e+00> : vector<8x128xf32>
    %257 = tpu.matmul %251, %6, %cst_40 {dimension_numbers = #tpu.dot_dimension_numbers<[1], [0], [0], [1], [0, 0, 1, 1], [], []>} : vector<8x32xf32>, vector<32x128xf32>, vector<8x128xf32> -> vector<8x128xf32>
    %258 = arith.addf %256, %257 : vector<8x128xf32>
    %259 = vector.extract_strided_slice %258 {offsets = [0, 0], sizes = [8, 32], strides = [1, 1]} : vector<8x128xf32> to vector<8x32xf32>
    %260 = arith.negf %259 : vector<8x32xf32>
    %261 = math.exp %260 : vector<8x32xf32>
    %cst_41 = arith.constant 1.000000e+00 : f32
    %262 = vector.broadcast %cst_41 : f32 to vector<8x32xf32>
    %263 = arith.addf %262, %261 : vector<8x32xf32>
    %264 = arith.divf %262, %263 : vector<8x32xf32>
    %265 = vector.extract_strided_slice %258 {offsets = [0, 32], sizes = [8, 32], strides = [1, 1]} : vector<8x128xf32> to vector<8x32xf32>
    %266 = arith.negf %265 : vector<8x32xf32>
    %267 = math.exp %266 : vector<8x32xf32>
    %cst_42 = arith.constant 1.000000e+00 : f32
    %268 = vector.broadcast %cst_42 : f32 to vector<8x32xf32>
    %269 = arith.addf %268, %267 : vector<8x32xf32>
    %270 = arith.divf %268, %269 : vector<8x32xf32>
    %271 = vector.extract_strided_slice %258 {offsets = [0, 64], sizes = [8, 32], strides = [1, 1]} : vector<8x128xf32> to vector<8x32xf32>
    %272 = math.tanh %271 : vector<8x32xf32>
    %273 = vector.extract_strided_slice %258 {offsets = [0, 96], sizes = [8, 32], strides = [1, 1]} : vector<8x128xf32> to vector<8x32xf32>
    %274 = arith.negf %273 : vector<8x32xf32>
    %275 = math.exp %274 : vector<8x32xf32>
    %cst_43 = arith.constant 1.000000e+00 : f32
    %276 = vector.broadcast %cst_43 : f32 to vector<8x32xf32>
    %277 = arith.addf %276, %275 : vector<8x32xf32>
    %278 = arith.divf %276, %277 : vector<8x32xf32>
    %279 = arith.mulf %270, %249 : vector<8x32xf32>
    %280 = arith.mulf %264, %272 : vector<8x32xf32>
    %281 = arith.addf %279, %280 : vector<8x32xf32>
    %282 = math.tanh %281 : vector<8x32xf32>
    %283 = arith.mulf %278, %282 : vector<8x32xf32>
    %284 = tpu.concatenate %59, %91, %123, %155, %187, %219, %251, %283 in 0 : vector<8x32xf32>, vector<8x32xf32>, vector<8x32xf32>, vector<8x32xf32>, vector<8x32xf32>, vector<8x32xf32>, vector<8x32xf32>, vector<8x32xf32> -> vector<64x32xf32>
    %c0_44 = arith.constant 0 : index
    %c0_45 = arith.constant 0 : index
    %285 = vector.load %arg5[%c0_44, %c0_45] : memref<32x128xf32, #tpu.memory_space<vmem>>, vector<32x128xf32>
    %cst_46 = arith.constant dense<0.000000e+00> : vector<64x128xf32>
    %286 = tpu.matmul %284, %285, %cst_46 {dimension_numbers = #tpu.dot_dimension_numbers<[1], [0], [0], [1], [0, 0, 1, 1], [], []>} : vector<64x32xf32>, vector<32x128xf32>, vector<64x128xf32> -> vector<64x128xf32>
    %c0_47 = arith.constant 0 : index
    %c0_48 = arith.constant 0 : index
    %287 = vector.load %arg7[%c0_47, %c0_48] : memref<1x128xf32, #tpu.memory_space<vmem>>, vector<1x128xf32>
    %288 = vector.broadcast %287 : vector<1x128xf32> to vector<64x128xf32>
    %289 = arith.addf %286, %288 : vector<64x128xf32>
    %c0_49 = arith.constant 0 : index
    %c0_50 = arith.constant 0 : index
    %290 = vector.load %arg6[%c0_49, %c0_50] : memref<32x128xf32, #tpu.memory_space<vmem>>, vector<32x128xf32>
    %291 = tpu.iota {dimensions = array<i32: 1>} : vector<1x128xi32>
    %c32_i32_51 = arith.constant 32 : i32
    %c0_i32_52 = arith.constant 0 : i32
    %292 = arith.cmpi eq, %c32_i32_51, %c0_i32_52 : i32
    %c1_i32_53 = arith.constant 1 : i32
    %293 = arith.select %292, %c1_i32_53, %c32_i32_51 : i32
    %294 = vector.broadcast %293 : i32 to vector<1x128xi32>
    %295 = arith.remsi %291, %294 : vector<1x128xi32>
    %c0_i32_54 = arith.constant 0 : i32
    %296 = vector.broadcast %c0_i32_54 : i32 to vector<1x128xi32>
    %297 = arith.cmpi ne, %295, %296 : vector<1x128xi32>
    %c0_i32_55 = arith.constant 0 : i32
    %298 = vector.broadcast %c0_i32_55 : i32 to vector<1x128xi32>
    %299 = arith.cmpi slt, %295, %298 : vector<1x128xi32>
    %c0_i32_56 = arith.constant 0 : i32
    %300 = arith.cmpi slt, %293, %c0_i32_56 : i32
    %301 = vector.broadcast %300 : i1 to vector<1x128xi1>
    %302 = vector.broadcast %301 : vector<1x128xi1> to vector<1x128xi1>
    %303 = arith.xori %299, %302 : vector<1x128xi1>
    %304 = arith.andi %303, %297 : vector<1x128xi1>
    %305 = vector.broadcast %293 : i32 to vector<1x128xi32>
    %306 = arith.addi %295, %305 : vector<1x128xi32>
    %307 = arith.select %304, %306, %295 : vector<1x128xi1>, vector<1x128xi32>
    %c16_i32_57 = arith.constant 16 : i32
    %308 = vector.broadcast %c16_i32_57 : i32 to vector<1x128xi32>
    %309 = arith.cmpi slt, %307, %308 : vector<1x128xi32>
    %cst_58 = arith.constant 0.000000e+00 : f32
    %310 = vector.broadcast %cst_58 : f32 to vector<8x32xf32>
    %cst_59 = arith.constant 0.000000e+00 : f32
    %311 = vector.broadcast %cst_59 : f32 to vector<8x32xf32>
    %312 = vector.extract_strided_slice %289 {offsets = [0, 0], sizes = [8, 128], strides = [1, 1]} : vector<64x128xf32> to vector<8x128xf32>
    %313 = vector.extract_strided_slice %289 {offsets = [56, 0], sizes = [8, 128], strides = [1, 1]} : vector<64x128xf32> to vector<8x128xf32>
    %314 = vector.shape_cast %309 : vector<1x128xi1> to vector<1x128xi1>
    %315 = vector.broadcast %314 : vector<1x128xi1> to vector<8x128xi1>
    %316 = arith.select %315, %312, %313 : vector<8x128xi1>, vector<8x128xf32>
    %cst_60 = arith.constant dense<0.000000e+00> : vector<8x128xf32>
    %317 = tpu.matmul %310, %290, %cst_60 {dimension_numbers = #tpu.dot_dimension_numbers<[1], [0], [0], [1], [0, 0, 1, 1], [], []>} : vector<8x32xf32>, vector<32x128xf32>, vector<8x128xf32> -> vector<8x128xf32>
    %318 = arith.addf %316, %317 : vector<8x128xf32>
    %319 = vector.extract_strided_slice %318 {offsets = [0, 0], sizes = [8, 32], strides = [1, 1]} : vector<8x128xf32> to vector<8x32xf32>
    %320 = arith.negf %319 : vector<8x32xf32>
    %321 = math.exp %320 : vector<8x32xf32>
    %cst_61 = arith.constant 1.000000e+00 : f32
    %322 = vector.broadcast %cst_61 : f32 to vector<8x32xf32>
    %323 = arith.addf %322, %321 : vector<8x32xf32>
    %324 = arith.divf %322, %323 : vector<8x32xf32>
    %325 = vector.extract_strided_slice %318 {offsets = [0, 32], sizes = [8, 32], strides = [1, 1]} : vector<8x128xf32> to vector<8x32xf32>
    %326 = arith.negf %325 : vector<8x32xf32>
    %327 = math.exp %326 : vector<8x32xf32>
    %cst_62 = arith.constant 1.000000e+00 : f32
    %328 = vector.broadcast %cst_62 : f32 to vector<8x32xf32>
    %329 = arith.addf %328, %327 : vector<8x32xf32>
    %330 = arith.divf %328, %329 : vector<8x32xf32>
    %331 = vector.extract_strided_slice %318 {offsets = [0, 64], sizes = [8, 32], strides = [1, 1]} : vector<8x128xf32> to vector<8x32xf32>
    %332 = math.tanh %331 : vector<8x32xf32>
    %333 = vector.extract_strided_slice %318 {offsets = [0, 96], sizes = [8, 32], strides = [1, 1]} : vector<8x128xf32> to vector<8x32xf32>
    %334 = arith.negf %333 : vector<8x32xf32>
    %335 = math.exp %334 : vector<8x32xf32>
    %cst_63 = arith.constant 1.000000e+00 : f32
    %336 = vector.broadcast %cst_63 : f32 to vector<8x32xf32>
    %337 = arith.addf %336, %335 : vector<8x32xf32>
    %338 = arith.divf %336, %337 : vector<8x32xf32>
    %339 = arith.mulf %330, %311 : vector<8x32xf32>
    %340 = arith.mulf %324, %332 : vector<8x32xf32>
    %341 = arith.addf %339, %340 : vector<8x32xf32>
    %342 = math.tanh %341 : vector<8x32xf32>
    %343 = arith.mulf %338, %342 : vector<8x32xf32>
    %344 = vector.extract_strided_slice %289 {offsets = [8, 0], sizes = [8, 128], strides = [1, 1]} : vector<64x128xf32> to vector<8x128xf32>
    %345 = vector.extract_strided_slice %289 {offsets = [48, 0], sizes = [8, 128], strides = [1, 1]} : vector<64x128xf32> to vector<8x128xf32>
    %346 = vector.shape_cast %309 : vector<1x128xi1> to vector<1x128xi1>
    %347 = vector.broadcast %346 : vector<1x128xi1> to vector<8x128xi1>
    %348 = arith.select %347, %344, %345 : vector<8x128xi1>, vector<8x128xf32>
    %cst_64 = arith.constant dense<0.000000e+00> : vector<8x128xf32>
    %349 = tpu.matmul %343, %290, %cst_64 {dimension_numbers = #tpu.dot_dimension_numbers<[1], [0], [0], [1], [0, 0, 1, 1], [], []>} : vector<8x32xf32>, vector<32x128xf32>, vector<8x128xf32> -> vector<8x128xf32>
    %350 = arith.addf %348, %349 : vector<8x128xf32>
    %351 = vector.extract_strided_slice %350 {offsets = [0, 0], sizes = [8, 32], strides = [1, 1]} : vector<8x128xf32> to vector<8x32xf32>
    %352 = arith.negf %351 : vector<8x32xf32>
    %353 = math.exp %352 : vector<8x32xf32>
    %cst_65 = arith.constant 1.000000e+00 : f32
    %354 = vector.broadcast %cst_65 : f32 to vector<8x32xf32>
    %355 = arith.addf %354, %353 : vector<8x32xf32>
    %356 = arith.divf %354, %355 : vector<8x32xf32>
    %357 = vector.extract_strided_slice %350 {offsets = [0, 32], sizes = [8, 32], strides = [1, 1]} : vector<8x128xf32> to vector<8x32xf32>
    %358 = arith.negf %357 : vector<8x32xf32>
    %359 = math.exp %358 : vector<8x32xf32>
    %cst_66 = arith.constant 1.000000e+00 : f32
    %360 = vector.broadcast %cst_66 : f32 to vector<8x32xf32>
    %361 = arith.addf %360, %359 : vector<8x32xf32>
    %362 = arith.divf %360, %361 : vector<8x32xf32>
    %363 = vector.extract_strided_slice %350 {offsets = [0, 64], sizes = [8, 32], strides = [1, 1]} : vector<8x128xf32> to vector<8x32xf32>
    %364 = math.tanh %363 : vector<8x32xf32>
    %365 = vector.extract_strided_slice %350 {offsets = [0, 96], sizes = [8, 32], strides = [1, 1]} : vector<8x128xf32> to vector<8x32xf32>
    %366 = arith.negf %365 : vector<8x32xf32>
    %367 = math.exp %366 : vector<8x32xf32>
    %cst_67 = arith.constant 1.000000e+00 : f32
    %368 = vector.broadcast %cst_67 : f32 to vector<8x32xf32>
    %369 = arith.addf %368, %367 : vector<8x32xf32>
    %370 = arith.divf %368, %369 : vector<8x32xf32>
    %371 = arith.mulf %362, %341 : vector<8x32xf32>
    %372 = arith.mulf %356, %364 : vector<8x32xf32>
    %373 = arith.addf %371, %372 : vector<8x32xf32>
    %374 = math.tanh %373 : vector<8x32xf32>
    %375 = arith.mulf %370, %374 : vector<8x32xf32>
    %376 = vector.extract_strided_slice %289 {offsets = [16, 0], sizes = [8, 128], strides = [1, 1]} : vector<64x128xf32> to vector<8x128xf32>
    %377 = vector.extract_strided_slice %289 {offsets = [40, 0], sizes = [8, 128], strides = [1, 1]} : vector<64x128xf32> to vector<8x128xf32>
    %378 = vector.shape_cast %309 : vector<1x128xi1> to vector<1x128xi1>
    %379 = vector.broadcast %378 : vector<1x128xi1> to vector<8x128xi1>
    %380 = arith.select %379, %376, %377 : vector<8x128xi1>, vector<8x128xf32>
    %cst_68 = arith.constant dense<0.000000e+00> : vector<8x128xf32>
    %381 = tpu.matmul %375, %290, %cst_68 {dimension_numbers = #tpu.dot_dimension_numbers<[1], [0], [0], [1], [0, 0, 1, 1], [], []>} : vector<8x32xf32>, vector<32x128xf32>, vector<8x128xf32> -> vector<8x128xf32>
    %382 = arith.addf %380, %381 : vector<8x128xf32>
    %383 = vector.extract_strided_slice %382 {offsets = [0, 0], sizes = [8, 32], strides = [1, 1]} : vector<8x128xf32> to vector<8x32xf32>
    %384 = arith.negf %383 : vector<8x32xf32>
    %385 = math.exp %384 : vector<8x32xf32>
    %cst_69 = arith.constant 1.000000e+00 : f32
    %386 = vector.broadcast %cst_69 : f32 to vector<8x32xf32>
    %387 = arith.addf %386, %385 : vector<8x32xf32>
    %388 = arith.divf %386, %387 : vector<8x32xf32>
    %389 = vector.extract_strided_slice %382 {offsets = [0, 32], sizes = [8, 32], strides = [1, 1]} : vector<8x128xf32> to vector<8x32xf32>
    %390 = arith.negf %389 : vector<8x32xf32>
    %391 = math.exp %390 : vector<8x32xf32>
    %cst_70 = arith.constant 1.000000e+00 : f32
    %392 = vector.broadcast %cst_70 : f32 to vector<8x32xf32>
    %393 = arith.addf %392, %391 : vector<8x32xf32>
    %394 = arith.divf %392, %393 : vector<8x32xf32>
    %395 = vector.extract_strided_slice %382 {offsets = [0, 64], sizes = [8, 32], strides = [1, 1]} : vector<8x128xf32> to vector<8x32xf32>
    %396 = math.tanh %395 : vector<8x32xf32>
    %397 = vector.extract_strided_slice %382 {offsets = [0, 96], sizes = [8, 32], strides = [1, 1]} : vector<8x128xf32> to vector<8x32xf32>
    %398 = arith.negf %397 : vector<8x32xf32>
    %399 = math.exp %398 : vector<8x32xf32>
    %cst_71 = arith.constant 1.000000e+00 : f32
    %400 = vector.broadcast %cst_71 : f32 to vector<8x32xf32>
    %401 = arith.addf %400, %399 : vector<8x32xf32>
    %402 = arith.divf %400, %401 : vector<8x32xf32>
    %403 = arith.mulf %394, %373 : vector<8x32xf32>
    %404 = arith.mulf %388, %396 : vector<8x32xf32>
    %405 = arith.addf %403, %404 : vector<8x32xf32>
    %406 = math.tanh %405 : vector<8x32xf32>
    %407 = arith.mulf %402, %406 : vector<8x32xf32>
    %408 = vector.extract_strided_slice %289 {offsets = [24, 0], sizes = [8, 128], strides = [1, 1]} : vector<64x128xf32> to vector<8x128xf32>
    %409 = vector.extract_strided_slice %289 {offsets = [32, 0], sizes = [8, 128], strides = [1, 1]} : vector<64x128xf32> to vector<8x128xf32>
    %410 = vector.shape_cast %309 : vector<1x128xi1> to vector<1x128xi1>
    %411 = vector.broadcast %410 : vector<1x128xi1> to vector<8x128xi1>
    %412 = arith.select %411, %408, %409 : vector<8x128xi1>, vector<8x128xf32>
    %cst_72 = arith.constant dense<0.000000e+00> : vector<8x128xf32>
    %413 = tpu.matmul %407, %290, %cst_72 {dimension_numbers = #tpu.dot_dimension_numbers<[1], [0], [0], [1], [0, 0, 1, 1], [], []>} : vector<8x32xf32>, vector<32x128xf32>, vector<8x128xf32> -> vector<8x128xf32>
    %414 = arith.addf %412, %413 : vector<8x128xf32>
    %415 = vector.extract_strided_slice %414 {offsets = [0, 0], sizes = [8, 32], strides = [1, 1]} : vector<8x128xf32> to vector<8x32xf32>
    %416 = arith.negf %415 : vector<8x32xf32>
    %417 = math.exp %416 : vector<8x32xf32>
    %cst_73 = arith.constant 1.000000e+00 : f32
    %418 = vector.broadcast %cst_73 : f32 to vector<8x32xf32>
    %419 = arith.addf %418, %417 : vector<8x32xf32>
    %420 = arith.divf %418, %419 : vector<8x32xf32>
    %421 = vector.extract_strided_slice %414 {offsets = [0, 32], sizes = [8, 32], strides = [1, 1]} : vector<8x128xf32> to vector<8x32xf32>
    %422 = arith.negf %421 : vector<8x32xf32>
    %423 = math.exp %422 : vector<8x32xf32>
    %cst_74 = arith.constant 1.000000e+00 : f32
    %424 = vector.broadcast %cst_74 : f32 to vector<8x32xf32>
    %425 = arith.addf %424, %423 : vector<8x32xf32>
    %426 = arith.divf %424, %425 : vector<8x32xf32>
    %427 = vector.extract_strided_slice %414 {offsets = [0, 64], sizes = [8, 32], strides = [1, 1]} : vector<8x128xf32> to vector<8x32xf32>
    %428 = math.tanh %427 : vector<8x32xf32>
    %429 = vector.extract_strided_slice %414 {offsets = [0, 96], sizes = [8, 32], strides = [1, 1]} : vector<8x128xf32> to vector<8x32xf32>
    %430 = arith.negf %429 : vector<8x32xf32>
    %431 = math.exp %430 : vector<8x32xf32>
    %cst_75 = arith.constant 1.000000e+00 : f32
    %432 = vector.broadcast %cst_75 : f32 to vector<8x32xf32>
    %433 = arith.addf %432, %431 : vector<8x32xf32>
    %434 = arith.divf %432, %433 : vector<8x32xf32>
    %435 = arith.mulf %426, %405 : vector<8x32xf32>
    %436 = arith.mulf %420, %428 : vector<8x32xf32>
    %437 = arith.addf %435, %436 : vector<8x32xf32>
    %438 = math.tanh %437 : vector<8x32xf32>
    %439 = arith.mulf %434, %438 : vector<8x32xf32>
    %440 = vector.extract_strided_slice %289 {offsets = [32, 0], sizes = [8, 128], strides = [1, 1]} : vector<64x128xf32> to vector<8x128xf32>
    %441 = vector.extract_strided_slice %289 {offsets = [24, 0], sizes = [8, 128], strides = [1, 1]} : vector<64x128xf32> to vector<8x128xf32>
    %442 = vector.shape_cast %309 : vector<1x128xi1> to vector<1x128xi1>
    %443 = vector.broadcast %442 : vector<1x128xi1> to vector<8x128xi1>
    %444 = arith.select %443, %440, %441 : vector<8x128xi1>, vector<8x128xf32>
    %cst_76 = arith.constant dense<0.000000e+00> : vector<8x128xf32>
    %445 = tpu.matmul %439, %290, %cst_76 {dimension_numbers = #tpu.dot_dimension_numbers<[1], [0], [0], [1], [0, 0, 1, 1], [], []>} : vector<8x32xf32>, vector<32x128xf32>, vector<8x128xf32> -> vector<8x128xf32>
    %446 = arith.addf %444, %445 : vector<8x128xf32>
    %447 = vector.extract_strided_slice %446 {offsets = [0, 0], sizes = [8, 32], strides = [1, 1]} : vector<8x128xf32> to vector<8x32xf32>
    %448 = arith.negf %447 : vector<8x32xf32>
    %449 = math.exp %448 : vector<8x32xf32>
    %cst_77 = arith.constant 1.000000e+00 : f32
    %450 = vector.broadcast %cst_77 : f32 to vector<8x32xf32>
    %451 = arith.addf %450, %449 : vector<8x32xf32>
    %452 = arith.divf %450, %451 : vector<8x32xf32>
    %453 = vector.extract_strided_slice %446 {offsets = [0, 32], sizes = [8, 32], strides = [1, 1]} : vector<8x128xf32> to vector<8x32xf32>
    %454 = arith.negf %453 : vector<8x32xf32>
    %455 = math.exp %454 : vector<8x32xf32>
    %cst_78 = arith.constant 1.000000e+00 : f32
    %456 = vector.broadcast %cst_78 : f32 to vector<8x32xf32>
    %457 = arith.addf %456, %455 : vector<8x32xf32>
    %458 = arith.divf %456, %457 : vector<8x32xf32>
    %459 = vector.extract_strided_slice %446 {offsets = [0, 64], sizes = [8, 32], strides = [1, 1]} : vector<8x128xf32> to vector<8x32xf32>
    %460 = math.tanh %459 : vector<8x32xf32>
    %461 = vector.extract_strided_slice %446 {offsets = [0, 96], sizes = [8, 32], strides = [1, 1]} : vector<8x128xf32> to vector<8x32xf32>
    %462 = arith.negf %461 : vector<8x32xf32>
    %463 = math.exp %462 : vector<8x32xf32>
    %cst_79 = arith.constant 1.000000e+00 : f32
    %464 = vector.broadcast %cst_79 : f32 to vector<8x32xf32>
    %465 = arith.addf %464, %463 : vector<8x32xf32>
    %466 = arith.divf %464, %465 : vector<8x32xf32>
    %467 = arith.mulf %458, %437 : vector<8x32xf32>
    %468 = arith.mulf %452, %460 : vector<8x32xf32>
    %469 = arith.addf %467, %468 : vector<8x32xf32>
    %470 = math.tanh %469 : vector<8x32xf32>
    %471 = arith.mulf %466, %470 : vector<8x32xf32>
    %472 = vector.extract_strided_slice %289 {offsets = [40, 0], sizes = [8, 128], strides = [1, 1]} : vector<64x128xf32> to vector<8x128xf32>
    %473 = vector.extract_strided_slice %289 {offsets = [16, 0], sizes = [8, 128], strides = [1, 1]} : vector<64x128xf32> to vector<8x128xf32>
    %474 = vector.shape_cast %309 : vector<1x128xi1> to vector<1x128xi1>
    %475 = vector.broadcast %474 : vector<1x128xi1> to vector<8x128xi1>
    %476 = arith.select %475, %472, %473 : vector<8x128xi1>, vector<8x128xf32>
    %cst_80 = arith.constant dense<0.000000e+00> : vector<8x128xf32>
    %477 = tpu.matmul %471, %290, %cst_80 {dimension_numbers = #tpu.dot_dimension_numbers<[1], [0], [0], [1], [0, 0, 1, 1], [], []>} : vector<8x32xf32>, vector<32x128xf32>, vector<8x128xf32> -> vector<8x128xf32>
    %478 = arith.addf %476, %477 : vector<8x128xf32>
    %479 = vector.extract_strided_slice %478 {offsets = [0, 0], sizes = [8, 32], strides = [1, 1]} : vector<8x128xf32> to vector<8x32xf32>
    %480 = arith.negf %479 : vector<8x32xf32>
    %481 = math.exp %480 : vector<8x32xf32>
    %cst_81 = arith.constant 1.000000e+00 : f32
    %482 = vector.broadcast %cst_81 : f32 to vector<8x32xf32>
    %483 = arith.addf %482, %481 : vector<8x32xf32>
    %484 = arith.divf %482, %483 : vector<8x32xf32>
    %485 = vector.extract_strided_slice %478 {offsets = [0, 32], sizes = [8, 32], strides = [1, 1]} : vector<8x128xf32> to vector<8x32xf32>
    %486 = arith.negf %485 : vector<8x32xf32>
    %487 = math.exp %486 : vector<8x32xf32>
    %cst_82 = arith.constant 1.000000e+00 : f32
    %488 = vector.broadcast %cst_82 : f32 to vector<8x32xf32>
    %489 = arith.addf %488, %487 : vector<8x32xf32>
    %490 = arith.divf %488, %489 : vector<8x32xf32>
    %491 = vector.extract_strided_slice %478 {offsets = [0, 64], sizes = [8, 32], strides = [1, 1]} : vector<8x128xf32> to vector<8x32xf32>
    %492 = math.tanh %491 : vector<8x32xf32>
    %493 = vector.extract_strided_slice %478 {offsets = [0, 96], sizes = [8, 32], strides = [1, 1]} : vector<8x128xf32> to vector<8x32xf32>
    %494 = arith.negf %493 : vector<8x32xf32>
    %495 = math.exp %494 : vector<8x32xf32>
    %cst_83 = arith.constant 1.000000e+00 : f32
    %496 = vector.broadcast %cst_83 : f32 to vector<8x32xf32>
    %497 = arith.addf %496, %495 : vector<8x32xf32>
    %498 = arith.divf %496, %497 : vector<8x32xf32>
    %499 = arith.mulf %490, %469 : vector<8x32xf32>
    %500 = arith.mulf %484, %492 : vector<8x32xf32>
    %501 = arith.addf %499, %500 : vector<8x32xf32>
    %502 = math.tanh %501 : vector<8x32xf32>
    %503 = arith.mulf %498, %502 : vector<8x32xf32>
    %504 = vector.extract_strided_slice %289 {offsets = [48, 0], sizes = [8, 128], strides = [1, 1]} : vector<64x128xf32> to vector<8x128xf32>
    %505 = vector.extract_strided_slice %289 {offsets = [8, 0], sizes = [8, 128], strides = [1, 1]} : vector<64x128xf32> to vector<8x128xf32>
    %506 = vector.shape_cast %309 : vector<1x128xi1> to vector<1x128xi1>
    %507 = vector.broadcast %506 : vector<1x128xi1> to vector<8x128xi1>
    %508 = arith.select %507, %504, %505 : vector<8x128xi1>, vector<8x128xf32>
    %cst_84 = arith.constant dense<0.000000e+00> : vector<8x128xf32>
    %509 = tpu.matmul %503, %290, %cst_84 {dimension_numbers = #tpu.dot_dimension_numbers<[1], [0], [0], [1], [0, 0, 1, 1], [], []>} : vector<8x32xf32>, vector<32x128xf32>, vector<8x128xf32> -> vector<8x128xf32>
    %510 = arith.addf %508, %509 : vector<8x128xf32>
    %511 = vector.extract_strided_slice %510 {offsets = [0, 0], sizes = [8, 32], strides = [1, 1]} : vector<8x128xf32> to vector<8x32xf32>
    %512 = arith.negf %511 : vector<8x32xf32>
    %513 = math.exp %512 : vector<8x32xf32>
    %cst_85 = arith.constant 1.000000e+00 : f32
    %514 = vector.broadcast %cst_85 : f32 to vector<8x32xf32>
    %515 = arith.addf %514, %513 : vector<8x32xf32>
    %516 = arith.divf %514, %515 : vector<8x32xf32>
    %517 = vector.extract_strided_slice %510 {offsets = [0, 32], sizes = [8, 32], strides = [1, 1]} : vector<8x128xf32> to vector<8x32xf32>
    %518 = arith.negf %517 : vector<8x32xf32>
    %519 = math.exp %518 : vector<8x32xf32>
    %cst_86 = arith.constant 1.000000e+00 : f32
    %520 = vector.broadcast %cst_86 : f32 to vector<8x32xf32>
    %521 = arith.addf %520, %519 : vector<8x32xf32>
    %522 = arith.divf %520, %521 : vector<8x32xf32>
    %523 = vector.extract_strided_slice %510 {offsets = [0, 64], sizes = [8, 32], strides = [1, 1]} : vector<8x128xf32> to vector<8x32xf32>
    %524 = math.tanh %523 : vector<8x32xf32>
    %525 = vector.extract_strided_slice %510 {offsets = [0, 96], sizes = [8, 32], strides = [1, 1]} : vector<8x128xf32> to vector<8x32xf32>
    %526 = arith.negf %525 : vector<8x32xf32>
    %527 = math.exp %526 : vector<8x32xf32>
    %cst_87 = arith.constant 1.000000e+00 : f32
    %528 = vector.broadcast %cst_87 : f32 to vector<8x32xf32>
    %529 = arith.addf %528, %527 : vector<8x32xf32>
    %530 = arith.divf %528, %529 : vector<8x32xf32>
    %531 = arith.mulf %522, %501 : vector<8x32xf32>
    %532 = arith.mulf %516, %524 : vector<8x32xf32>
    %533 = arith.addf %531, %532 : vector<8x32xf32>
    %534 = math.tanh %533 : vector<8x32xf32>
    %535 = arith.mulf %530, %534 : vector<8x32xf32>
    %536 = vector.extract_strided_slice %289 {offsets = [56, 0], sizes = [8, 128], strides = [1, 1]} : vector<64x128xf32> to vector<8x128xf32>
    %537 = vector.extract_strided_slice %289 {offsets = [0, 0], sizes = [8, 128], strides = [1, 1]} : vector<64x128xf32> to vector<8x128xf32>
    %538 = vector.shape_cast %309 : vector<1x128xi1> to vector<1x128xi1>
    %539 = vector.broadcast %538 : vector<1x128xi1> to vector<8x128xi1>
    %540 = arith.select %539, %536, %537 : vector<8x128xi1>, vector<8x128xf32>
    %cst_88 = arith.constant dense<0.000000e+00> : vector<8x128xf32>
    %541 = tpu.matmul %535, %290, %cst_88 {dimension_numbers = #tpu.dot_dimension_numbers<[1], [0], [0], [1], [0, 0, 1, 1], [], []>} : vector<8x32xf32>, vector<32x128xf32>, vector<8x128xf32> -> vector<8x128xf32>
    %542 = arith.addf %540, %541 : vector<8x128xf32>
    %543 = vector.extract_strided_slice %542 {offsets = [0, 0], sizes = [8, 32], strides = [1, 1]} : vector<8x128xf32> to vector<8x32xf32>
    %544 = arith.negf %543 : vector<8x32xf32>
    %545 = math.exp %544 : vector<8x32xf32>
    %cst_89 = arith.constant 1.000000e+00 : f32
    %546 = vector.broadcast %cst_89 : f32 to vector<8x32xf32>
    %547 = arith.addf %546, %545 : vector<8x32xf32>
    %548 = arith.divf %546, %547 : vector<8x32xf32>
    %549 = vector.extract_strided_slice %542 {offsets = [0, 32], sizes = [8, 32], strides = [1, 1]} : vector<8x128xf32> to vector<8x32xf32>
    %550 = arith.negf %549 : vector<8x32xf32>
    %551 = math.exp %550 : vector<8x32xf32>
    %cst_90 = arith.constant 1.000000e+00 : f32
    %552 = vector.broadcast %cst_90 : f32 to vector<8x32xf32>
    %553 = arith.addf %552, %551 : vector<8x32xf32>
    %554 = arith.divf %552, %553 : vector<8x32xf32>
    %555 = vector.extract_strided_slice %542 {offsets = [0, 64], sizes = [8, 32], strides = [1, 1]} : vector<8x128xf32> to vector<8x32xf32>
    %556 = math.tanh %555 : vector<8x32xf32>
    %557 = vector.extract_strided_slice %542 {offsets = [0, 96], sizes = [8, 32], strides = [1, 1]} : vector<8x128xf32> to vector<8x32xf32>
    %558 = arith.negf %557 : vector<8x32xf32>
    %559 = math.exp %558 : vector<8x32xf32>
    %cst_91 = arith.constant 1.000000e+00 : f32
    %560 = vector.broadcast %cst_91 : f32 to vector<8x32xf32>
    %561 = arith.addf %560, %559 : vector<8x32xf32>
    %562 = arith.divf %560, %561 : vector<8x32xf32>
    %563 = arith.mulf %554, %533 : vector<8x32xf32>
    %564 = arith.mulf %548, %556 : vector<8x32xf32>
    %565 = arith.addf %563, %564 : vector<8x32xf32>
    %566 = math.tanh %565 : vector<8x32xf32>
    %567 = arith.mulf %562, %566 : vector<8x32xf32>
    %568 = tpu.concatenate %343, %375, %407, %439, %471, %503, %535, %567 in 0 : vector<8x32xf32>, vector<8x32xf32>, vector<8x32xf32>, vector<8x32xf32>, vector<8x32xf32>, vector<8x32xf32>, vector<8x32xf32>, vector<8x32xf32> -> vector<64x32xf32>
    %c0_92 = arith.constant 0 : index
    %569 = memref.load %arg0[%c0_92] : memref<4xf32, #tpu.memory_space<smem>>
    %c1 = arith.constant 1 : index
    %570 = memref.load %arg0[%c1] : memref<4xf32, #tpu.memory_space<smem>>
    %c2 = arith.constant 2 : index
    %571 = memref.load %arg0[%c2] : memref<4xf32, #tpu.memory_space<smem>>
    %c3 = arith.constant 3 : index
    %572 = memref.load %arg0[%c3] : memref<4xf32, #tpu.memory_space<smem>>
    %573 = vector.broadcast %569 : f32 to vector<64x32xf32>
    %574 = arith.mulf %573, %0 : vector<64x32xf32>
    %575 = vector.broadcast %570 : f32 to vector<64x32xf32>
    %576 = arith.mulf %575, %284 : vector<64x32xf32>
    %577 = arith.addf %574, %576 : vector<64x32xf32>
    %578 = vector.broadcast %571 : f32 to vector<64x32xf32>
    %579 = arith.mulf %578, %568 : vector<64x32xf32>
    %580 = arith.addf %577, %579 : vector<64x32xf32>
    %581 = vector.broadcast %572 : f32 to vector<64x32xf32>
    %582 = arith.mulf %581, %580 : vector<64x32xf32>
    %c0_93 = arith.constant 0 : index
    %c0_94 = arith.constant 0 : index
    %583 = vector.load %arg8[%c0_93, %c0_94] : memref<32x256xf32, #tpu.memory_space<vmem>>, vector<32x256xf32>
    %cst_95 = arith.constant dense<0.000000e+00> : vector<64x256xf32>
    %584 = tpu.matmul %582, %583, %cst_95 {dimension_numbers = #tpu.dot_dimension_numbers<[1], [0], [0], [1], [0, 0, 1, 1], [], []>} : vector<64x32xf32>, vector<32x256xf32>, vector<64x256xf32> -> vector<64x256xf32>
    %c0_96 = arith.constant 0 : index
    %c0_97 = arith.constant 0 : index
    %585 = vector.load %arg10[%c0_96, %c0_97] : memref<1x256xf32, #tpu.memory_space<vmem>>, vector<1x256xf32>
    %586 = vector.broadcast %585 : vector<1x256xf32> to vector<64x256xf32>
    %587 = arith.addf %584, %586 : vector<64x256xf32>
    %c0_98 = arith.constant 0 : index
    %c0_99 = arith.constant 0 : index
    %588 = vector.load %arg9[%c0_98, %c0_99] : memref<64x256xf32, #tpu.memory_space<vmem>>, vector<64x256xf32>
    %589 = tpu.iota {dimensions = array<i32: 1>} : vector<1x256xi32>
    %c64_i32 = arith.constant 64 : i32
    %c0_i32_100 = arith.constant 0 : i32
    %590 = arith.cmpi eq, %c64_i32, %c0_i32_100 : i32
    %c1_i32_101 = arith.constant 1 : i32
    %591 = arith.select %590, %c1_i32_101, %c64_i32 : i32
    %592 = vector.broadcast %591 : i32 to vector<1x256xi32>
    %593 = arith.remsi %589, %592 : vector<1x256xi32>
    %c0_i32_102 = arith.constant 0 : i32
    %594 = vector.broadcast %c0_i32_102 : i32 to vector<1x256xi32>
    %595 = arith.cmpi ne, %593, %594 : vector<1x256xi32>
    %c0_i32_103 = arith.constant 0 : i32
    %596 = vector.broadcast %c0_i32_103 : i32 to vector<1x256xi32>
    %597 = arith.cmpi slt, %593, %596 : vector<1x256xi32>
    %c0_i32_104 = arith.constant 0 : i32
    %598 = arith.cmpi slt, %591, %c0_i32_104 : i32
    %599 = vector.broadcast %598 : i1 to vector<1x256xi1>
    %600 = vector.broadcast %599 : vector<1x256xi1> to vector<1x256xi1>
    %601 = arith.xori %597, %600 : vector<1x256xi1>
    %602 = arith.andi %601, %595 : vector<1x256xi1>
    %603 = vector.broadcast %591 : i32 to vector<1x256xi32>
    %604 = arith.addi %593, %603 : vector<1x256xi32>
    %605 = arith.select %602, %604, %593 : vector<1x256xi1>, vector<1x256xi32>
    %c32_i32_105 = arith.constant 32 : i32
    %606 = vector.broadcast %c32_i32_105 : i32 to vector<1x256xi32>
    %607 = arith.cmpi slt, %605, %606 : vector<1x256xi32>
    %cst_106 = arith.constant 0.000000e+00 : f32
    %608 = vector.broadcast %cst_106 : f32 to vector<8x64xf32>
    %cst_107 = arith.constant 0.000000e+00 : f32
    %609 = vector.broadcast %cst_107 : f32 to vector<8x64xf32>
    %610 = vector.extract_strided_slice %587 {offsets = [0, 0], sizes = [8, 256], strides = [1, 1]} : vector<64x256xf32> to vector<8x256xf32>
    %611 = vector.extract_strided_slice %587 {offsets = [56, 0], sizes = [8, 256], strides = [1, 1]} : vector<64x256xf32> to vector<8x256xf32>
    %612 = vector.shape_cast %607 : vector<1x256xi1> to vector<1x256xi1>
    %613 = vector.broadcast %612 : vector<1x256xi1> to vector<8x256xi1>
    %614 = arith.select %613, %610, %611 : vector<8x256xi1>, vector<8x256xf32>
    %cst_108 = arith.constant dense<0.000000e+00> : vector<8x256xf32>
    %615 = tpu.matmul %608, %588, %cst_108 {dimension_numbers = #tpu.dot_dimension_numbers<[1], [0], [0], [1], [0, 0, 1, 1], [], []>} : vector<8x64xf32>, vector<64x256xf32>, vector<8x256xf32> -> vector<8x256xf32>
    %616 = arith.addf %614, %615 : vector<8x256xf32>
    %617 = vector.extract_strided_slice %616 {offsets = [0, 0], sizes = [8, 64], strides = [1, 1]} : vector<8x256xf32> to vector<8x64xf32>
    %618 = arith.negf %617 : vector<8x64xf32>
    %619 = math.exp %618 : vector<8x64xf32>
    %cst_109 = arith.constant 1.000000e+00 : f32
    %620 = vector.broadcast %cst_109 : f32 to vector<8x64xf32>
    %621 = arith.addf %620, %619 : vector<8x64xf32>
    %622 = arith.divf %620, %621 : vector<8x64xf32>
    %623 = vector.extract_strided_slice %616 {offsets = [0, 64], sizes = [8, 64], strides = [1, 1]} : vector<8x256xf32> to vector<8x64xf32>
    %624 = arith.negf %623 : vector<8x64xf32>
    %625 = math.exp %624 : vector<8x64xf32>
    %cst_110 = arith.constant 1.000000e+00 : f32
    %626 = vector.broadcast %cst_110 : f32 to vector<8x64xf32>
    %627 = arith.addf %626, %625 : vector<8x64xf32>
    %628 = arith.divf %626, %627 : vector<8x64xf32>
    %629 = vector.extract_strided_slice %616 {offsets = [0, 128], sizes = [8, 64], strides = [1, 1]} : vector<8x256xf32> to vector<8x64xf32>
    %630 = math.tanh %629 : vector<8x64xf32>
    %631 = vector.extract_strided_slice %616 {offsets = [0, 192], sizes = [8, 64], strides = [1, 1]} : vector<8x256xf32> to vector<8x64xf32>
    %632 = arith.negf %631 : vector<8x64xf32>
    %633 = math.exp %632 : vector<8x64xf32>
    %cst_111 = arith.constant 1.000000e+00 : f32
    %634 = vector.broadcast %cst_111 : f32 to vector<8x64xf32>
    %635 = arith.addf %634, %633 : vector<8x64xf32>
    %636 = arith.divf %634, %635 : vector<8x64xf32>
    %637 = arith.mulf %628, %609 : vector<8x64xf32>
    %638 = arith.mulf %622, %630 : vector<8x64xf32>
    %639 = arith.addf %637, %638 : vector<8x64xf32>
    %640 = math.tanh %639 : vector<8x64xf32>
    %641 = arith.mulf %636, %640 : vector<8x64xf32>
    %642 = vector.extract_strided_slice %587 {offsets = [8, 0], sizes = [8, 256], strides = [1, 1]} : vector<64x256xf32> to vector<8x256xf32>
    %643 = vector.extract_strided_slice %587 {offsets = [48, 0], sizes = [8, 256], strides = [1, 1]} : vector<64x256xf32> to vector<8x256xf32>
    %644 = vector.shape_cast %607 : vector<1x256xi1> to vector<1x256xi1>
    %645 = vector.broadcast %644 : vector<1x256xi1> to vector<8x256xi1>
    %646 = arith.select %645, %642, %643 : vector<8x256xi1>, vector<8x256xf32>
    %cst_112 = arith.constant dense<0.000000e+00> : vector<8x256xf32>
    %647 = tpu.matmul %641, %588, %cst_112 {dimension_numbers = #tpu.dot_dimension_numbers<[1], [0], [0], [1], [0, 0, 1, 1], [], []>} : vector<8x64xf32>, vector<64x256xf32>, vector<8x256xf32> -> vector<8x256xf32>
    %648 = arith.addf %646, %647 : vector<8x256xf32>
    %649 = vector.extract_strided_slice %648 {offsets = [0, 0], sizes = [8, 64], strides = [1, 1]} : vector<8x256xf32> to vector<8x64xf32>
    %650 = arith.negf %649 : vector<8x64xf32>
    %651 = math.exp %650 : vector<8x64xf32>
    %cst_113 = arith.constant 1.000000e+00 : f32
    %652 = vector.broadcast %cst_113 : f32 to vector<8x64xf32>
    %653 = arith.addf %652, %651 : vector<8x64xf32>
    %654 = arith.divf %652, %653 : vector<8x64xf32>
    %655 = vector.extract_strided_slice %648 {offsets = [0, 64], sizes = [8, 64], strides = [1, 1]} : vector<8x256xf32> to vector<8x64xf32>
    %656 = arith.negf %655 : vector<8x64xf32>
    %657 = math.exp %656 : vector<8x64xf32>
    %cst_114 = arith.constant 1.000000e+00 : f32
    %658 = vector.broadcast %cst_114 : f32 to vector<8x64xf32>
    %659 = arith.addf %658, %657 : vector<8x64xf32>
    %660 = arith.divf %658, %659 : vector<8x64xf32>
    %661 = vector.extract_strided_slice %648 {offsets = [0, 128], sizes = [8, 64], strides = [1, 1]} : vector<8x256xf32> to vector<8x64xf32>
    %662 = math.tanh %661 : vector<8x64xf32>
    %663 = vector.extract_strided_slice %648 {offsets = [0, 192], sizes = [8, 64], strides = [1, 1]} : vector<8x256xf32> to vector<8x64xf32>
    %664 = arith.negf %663 : vector<8x64xf32>
    %665 = math.exp %664 : vector<8x64xf32>
    %cst_115 = arith.constant 1.000000e+00 : f32
    %666 = vector.broadcast %cst_115 : f32 to vector<8x64xf32>
    %667 = arith.addf %666, %665 : vector<8x64xf32>
    %668 = arith.divf %666, %667 : vector<8x64xf32>
    %669 = arith.mulf %660, %639 : vector<8x64xf32>
    %670 = arith.mulf %654, %662 : vector<8x64xf32>
    %671 = arith.addf %669, %670 : vector<8x64xf32>
    %672 = math.tanh %671 : vector<8x64xf32>
    %673 = arith.mulf %668, %672 : vector<8x64xf32>
    %674 = vector.extract_strided_slice %587 {offsets = [16, 0], sizes = [8, 256], strides = [1, 1]} : vector<64x256xf32> to vector<8x256xf32>
    %675 = vector.extract_strided_slice %587 {offsets = [40, 0], sizes = [8, 256], strides = [1, 1]} : vector<64x256xf32> to vector<8x256xf32>
    %676 = vector.shape_cast %607 : vector<1x256xi1> to vector<1x256xi1>
    %677 = vector.broadcast %676 : vector<1x256xi1> to vector<8x256xi1>
    %678 = arith.select %677, %674, %675 : vector<8x256xi1>, vector<8x256xf32>
    %cst_116 = arith.constant dense<0.000000e+00> : vector<8x256xf32>
    %679 = tpu.matmul %673, %588, %cst_116 {dimension_numbers = #tpu.dot_dimension_numbers<[1], [0], [0], [1], [0, 0, 1, 1], [], []>} : vector<8x64xf32>, vector<64x256xf32>, vector<8x256xf32> -> vector<8x256xf32>
    %680 = arith.addf %678, %679 : vector<8x256xf32>
    %681 = vector.extract_strided_slice %680 {offsets = [0, 0], sizes = [8, 64], strides = [1, 1]} : vector<8x256xf32> to vector<8x64xf32>
    %682 = arith.negf %681 : vector<8x64xf32>
    %683 = math.exp %682 : vector<8x64xf32>
    %cst_117 = arith.constant 1.000000e+00 : f32
    %684 = vector.broadcast %cst_117 : f32 to vector<8x64xf32>
    %685 = arith.addf %684, %683 : vector<8x64xf32>
    %686 = arith.divf %684, %685 : vector<8x64xf32>
    %687 = vector.extract_strided_slice %680 {offsets = [0, 64], sizes = [8, 64], strides = [1, 1]} : vector<8x256xf32> to vector<8x64xf32>
    %688 = arith.negf %687 : vector<8x64xf32>
    %689 = math.exp %688 : vector<8x64xf32>
    %cst_118 = arith.constant 1.000000e+00 : f32
    %690 = vector.broadcast %cst_118 : f32 to vector<8x64xf32>
    %691 = arith.addf %690, %689 : vector<8x64xf32>
    %692 = arith.divf %690, %691 : vector<8x64xf32>
    %693 = vector.extract_strided_slice %680 {offsets = [0, 128], sizes = [8, 64], strides = [1, 1]} : vector<8x256xf32> to vector<8x64xf32>
    %694 = math.tanh %693 : vector<8x64xf32>
    %695 = vector.extract_strided_slice %680 {offsets = [0, 192], sizes = [8, 64], strides = [1, 1]} : vector<8x256xf32> to vector<8x64xf32>
    %696 = arith.negf %695 : vector<8x64xf32>
    %697 = math.exp %696 : vector<8x64xf32>
    %cst_119 = arith.constant 1.000000e+00 : f32
    %698 = vector.broadcast %cst_119 : f32 to vector<8x64xf32>
    %699 = arith.addf %698, %697 : vector<8x64xf32>
    %700 = arith.divf %698, %699 : vector<8x64xf32>
    %701 = arith.mulf %692, %671 : vector<8x64xf32>
    %702 = arith.mulf %686, %694 : vector<8x64xf32>
    %703 = arith.addf %701, %702 : vector<8x64xf32>
    %704 = math.tanh %703 : vector<8x64xf32>
    %705 = arith.mulf %700, %704 : vector<8x64xf32>
    %706 = vector.extract_strided_slice %587 {offsets = [24, 0], sizes = [8, 256], strides = [1, 1]} : vector<64x256xf32> to vector<8x256xf32>
    %707 = vector.extract_strided_slice %587 {offsets = [32, 0], sizes = [8, 256], strides = [1, 1]} : vector<64x256xf32> to vector<8x256xf32>
    %708 = vector.shape_cast %607 : vector<1x256xi1> to vector<1x256xi1>
    %709 = vector.broadcast %708 : vector<1x256xi1> to vector<8x256xi1>
    %710 = arith.select %709, %706, %707 : vector<8x256xi1>, vector<8x256xf32>
    %cst_120 = arith.constant dense<0.000000e+00> : vector<8x256xf32>
    %711 = tpu.matmul %705, %588, %cst_120 {dimension_numbers = #tpu.dot_dimension_numbers<[1], [0], [0], [1], [0, 0, 1, 1], [], []>} : vector<8x64xf32>, vector<64x256xf32>, vector<8x256xf32> -> vector<8x256xf32>
    %712 = arith.addf %710, %711 : vector<8x256xf32>
    %713 = vector.extract_strided_slice %712 {offsets = [0, 0], sizes = [8, 64], strides = [1, 1]} : vector<8x256xf32> to vector<8x64xf32>
    %714 = arith.negf %713 : vector<8x64xf32>
    %715 = math.exp %714 : vector<8x64xf32>
    %cst_121 = arith.constant 1.000000e+00 : f32
    %716 = vector.broadcast %cst_121 : f32 to vector<8x64xf32>
    %717 = arith.addf %716, %715 : vector<8x64xf32>
    %718 = arith.divf %716, %717 : vector<8x64xf32>
    %719 = vector.extract_strided_slice %712 {offsets = [0, 64], sizes = [8, 64], strides = [1, 1]} : vector<8x256xf32> to vector<8x64xf32>
    %720 = arith.negf %719 : vector<8x64xf32>
    %721 = math.exp %720 : vector<8x64xf32>
    %cst_122 = arith.constant 1.000000e+00 : f32
    %722 = vector.broadcast %cst_122 : f32 to vector<8x64xf32>
    %723 = arith.addf %722, %721 : vector<8x64xf32>
    %724 = arith.divf %722, %723 : vector<8x64xf32>
    %725 = vector.extract_strided_slice %712 {offsets = [0, 128], sizes = [8, 64], strides = [1, 1]} : vector<8x256xf32> to vector<8x64xf32>
    %726 = math.tanh %725 : vector<8x64xf32>
    %727 = vector.extract_strided_slice %712 {offsets = [0, 192], sizes = [8, 64], strides = [1, 1]} : vector<8x256xf32> to vector<8x64xf32>
    %728 = arith.negf %727 : vector<8x64xf32>
    %729 = math.exp %728 : vector<8x64xf32>
    %cst_123 = arith.constant 1.000000e+00 : f32
    %730 = vector.broadcast %cst_123 : f32 to vector<8x64xf32>
    %731 = arith.addf %730, %729 : vector<8x64xf32>
    %732 = arith.divf %730, %731 : vector<8x64xf32>
    %733 = arith.mulf %724, %703 : vector<8x64xf32>
    %734 = arith.mulf %718, %726 : vector<8x64xf32>
    %735 = arith.addf %733, %734 : vector<8x64xf32>
    %736 = math.tanh %735 : vector<8x64xf32>
    %737 = arith.mulf %732, %736 : vector<8x64xf32>
    %738 = vector.extract_strided_slice %587 {offsets = [32, 0], sizes = [8, 256], strides = [1, 1]} : vector<64x256xf32> to vector<8x256xf32>
    %739 = vector.extract_strided_slice %587 {offsets = [24, 0], sizes = [8, 256], strides = [1, 1]} : vector<64x256xf32> to vector<8x256xf32>
    %740 = vector.shape_cast %607 : vector<1x256xi1> to vector<1x256xi1>
    %741 = vector.broadcast %740 : vector<1x256xi1> to vector<8x256xi1>
    %742 = arith.select %741, %738, %739 : vector<8x256xi1>, vector<8x256xf32>
    %cst_124 = arith.constant dense<0.000000e+00> : vector<8x256xf32>
    %743 = tpu.matmul %737, %588, %cst_124 {dimension_numbers = #tpu.dot_dimension_numbers<[1], [0], [0], [1], [0, 0, 1, 1], [], []>} : vector<8x64xf32>, vector<64x256xf32>, vector<8x256xf32> -> vector<8x256xf32>
    %744 = arith.addf %742, %743 : vector<8x256xf32>
    %745 = vector.extract_strided_slice %744 {offsets = [0, 0], sizes = [8, 64], strides = [1, 1]} : vector<8x256xf32> to vector<8x64xf32>
    %746 = arith.negf %745 : vector<8x64xf32>
    %747 = math.exp %746 : vector<8x64xf32>
    %cst_125 = arith.constant 1.000000e+00 : f32
    %748 = vector.broadcast %cst_125 : f32 to vector<8x64xf32>
    %749 = arith.addf %748, %747 : vector<8x64xf32>
    %750 = arith.divf %748, %749 : vector<8x64xf32>
    %751 = vector.extract_strided_slice %744 {offsets = [0, 64], sizes = [8, 64], strides = [1, 1]} : vector<8x256xf32> to vector<8x64xf32>
    %752 = arith.negf %751 : vector<8x64xf32>
    %753 = math.exp %752 : vector<8x64xf32>
    %cst_126 = arith.constant 1.000000e+00 : f32
    %754 = vector.broadcast %cst_126 : f32 to vector<8x64xf32>
    %755 = arith.addf %754, %753 : vector<8x64xf32>
    %756 = arith.divf %754, %755 : vector<8x64xf32>
    %757 = vector.extract_strided_slice %744 {offsets = [0, 128], sizes = [8, 64], strides = [1, 1]} : vector<8x256xf32> to vector<8x64xf32>
    %758 = math.tanh %757 : vector<8x64xf32>
    %759 = vector.extract_strided_slice %744 {offsets = [0, 192], sizes = [8, 64], strides = [1, 1]} : vector<8x256xf32> to vector<8x64xf32>
    %760 = arith.negf %759 : vector<8x64xf32>
    %761 = math.exp %760 : vector<8x64xf32>
    %cst_127 = arith.constant 1.000000e+00 : f32
    %762 = vector.broadcast %cst_127 : f32 to vector<8x64xf32>
    %763 = arith.addf %762, %761 : vector<8x64xf32>
    %764 = arith.divf %762, %763 : vector<8x64xf32>
    %765 = arith.mulf %756, %735 : vector<8x64xf32>
    %766 = arith.mulf %750, %758 : vector<8x64xf32>
    %767 = arith.addf %765, %766 : vector<8x64xf32>
    %768 = math.tanh %767 : vector<8x64xf32>
    %769 = arith.mulf %764, %768 : vector<8x64xf32>
    %770 = vector.extract_strided_slice %587 {offsets = [40, 0], sizes = [8, 256], strides = [1, 1]} : vector<64x256xf32> to vector<8x256xf32>
    %771 = vector.extract_strided_slice %587 {offsets = [16, 0], sizes = [8, 256], strides = [1, 1]} : vector<64x256xf32> to vector<8x256xf32>
    %772 = vector.shape_cast %607 : vector<1x256xi1> to vector<1x256xi1>
    %773 = vector.broadcast %772 : vector<1x256xi1> to vector<8x256xi1>
    %774 = arith.select %773, %770, %771 : vector<8x256xi1>, vector<8x256xf32>
    %cst_128 = arith.constant dense<0.000000e+00> : vector<8x256xf32>
    %775 = tpu.matmul %769, %588, %cst_128 {dimension_numbers = #tpu.dot_dimension_numbers<[1], [0], [0], [1], [0, 0, 1, 1], [], []>} : vector<8x64xf32>, vector<64x256xf32>, vector<8x256xf32> -> vector<8x256xf32>
    %776 = arith.addf %774, %775 : vector<8x256xf32>
    %777 = vector.extract_strided_slice %776 {offsets = [0, 0], sizes = [8, 64], strides = [1, 1]} : vector<8x256xf32> to vector<8x64xf32>
    %778 = arith.negf %777 : vector<8x64xf32>
    %779 = math.exp %778 : vector<8x64xf32>
    %cst_129 = arith.constant 1.000000e+00 : f32
    %780 = vector.broadcast %cst_129 : f32 to vector<8x64xf32>
    %781 = arith.addf %780, %779 : vector<8x64xf32>
    %782 = arith.divf %780, %781 : vector<8x64xf32>
    %783 = vector.extract_strided_slice %776 {offsets = [0, 64], sizes = [8, 64], strides = [1, 1]} : vector<8x256xf32> to vector<8x64xf32>
    %784 = arith.negf %783 : vector<8x64xf32>
    %785 = math.exp %784 : vector<8x64xf32>
    %cst_130 = arith.constant 1.000000e+00 : f32
    %786 = vector.broadcast %cst_130 : f32 to vector<8x64xf32>
    %787 = arith.addf %786, %785 : vector<8x64xf32>
    %788 = arith.divf %786, %787 : vector<8x64xf32>
    %789 = vector.extract_strided_slice %776 {offsets = [0, 128], sizes = [8, 64], strides = [1, 1]} : vector<8x256xf32> to vector<8x64xf32>
    %790 = math.tanh %789 : vector<8x64xf32>
    %791 = vector.extract_strided_slice %776 {offsets = [0, 192], sizes = [8, 64], strides = [1, 1]} : vector<8x256xf32> to vector<8x64xf32>
    %792 = arith.negf %791 : vector<8x64xf32>
    %793 = math.exp %792 : vector<8x64xf32>
    %cst_131 = arith.constant 1.000000e+00 : f32
    %794 = vector.broadcast %cst_131 : f32 to vector<8x64xf32>
    %795 = arith.addf %794, %793 : vector<8x64xf32>
    %796 = arith.divf %794, %795 : vector<8x64xf32>
    %797 = arith.mulf %788, %767 : vector<8x64xf32>
    %798 = arith.mulf %782, %790 : vector<8x64xf32>
    %799 = arith.addf %797, %798 : vector<8x64xf32>
    %800 = math.tanh %799 : vector<8x64xf32>
    %801 = arith.mulf %796, %800 : vector<8x64xf32>
    %802 = vector.extract_strided_slice %587 {offsets = [48, 0], sizes = [8, 256], strides = [1, 1]} : vector<64x256xf32> to vector<8x256xf32>
    %803 = vector.extract_strided_slice %587 {offsets = [8, 0], sizes = [8, 256], strides = [1, 1]} : vector<64x256xf32> to vector<8x256xf32>
    %804 = vector.shape_cast %607 : vector<1x256xi1> to vector<1x256xi1>
    %805 = vector.broadcast %804 : vector<1x256xi1> to vector<8x256xi1>
    %806 = arith.select %805, %802, %803 : vector<8x256xi1>, vector<8x256xf32>
    %cst_132 = arith.constant dense<0.000000e+00> : vector<8x256xf32>
    %807 = tpu.matmul %801, %588, %cst_132 {dimension_numbers = #tpu.dot_dimension_numbers<[1], [0], [0], [1], [0, 0, 1, 1], [], []>} : vector<8x64xf32>, vector<64x256xf32>, vector<8x256xf32> -> vector<8x256xf32>
    %808 = arith.addf %806, %807 : vector<8x256xf32>
    %809 = vector.extract_strided_slice %808 {offsets = [0, 0], sizes = [8, 64], strides = [1, 1]} : vector<8x256xf32> to vector<8x64xf32>
    %810 = arith.negf %809 : vector<8x64xf32>
    %811 = math.exp %810 : vector<8x64xf32>
    %cst_133 = arith.constant 1.000000e+00 : f32
    %812 = vector.broadcast %cst_133 : f32 to vector<8x64xf32>
    %813 = arith.addf %812, %811 : vector<8x64xf32>
    %814 = arith.divf %812, %813 : vector<8x64xf32>
    %815 = vector.extract_strided_slice %808 {offsets = [0, 64], sizes = [8, 64], strides = [1, 1]} : vector<8x256xf32> to vector<8x64xf32>
    %816 = arith.negf %815 : vector<8x64xf32>
    %817 = math.exp %816 : vector<8x64xf32>
    %cst_134 = arith.constant 1.000000e+00 : f32
    %818 = vector.broadcast %cst_134 : f32 to vector<8x64xf32>
    %819 = arith.addf %818, %817 : vector<8x64xf32>
    %820 = arith.divf %818, %819 : vector<8x64xf32>
    %821 = vector.extract_strided_slice %808 {offsets = [0, 128], sizes = [8, 64], strides = [1, 1]} : vector<8x256xf32> to vector<8x64xf32>
    %822 = math.tanh %821 : vector<8x64xf32>
    %823 = vector.extract_strided_slice %808 {offsets = [0, 192], sizes = [8, 64], strides = [1, 1]} : vector<8x256xf32> to vector<8x64xf32>
    %824 = arith.negf %823 : vector<8x64xf32>
    %825 = math.exp %824 : vector<8x64xf32>
    %cst_135 = arith.constant 1.000000e+00 : f32
    %826 = vector.broadcast %cst_135 : f32 to vector<8x64xf32>
    %827 = arith.addf %826, %825 : vector<8x64xf32>
    %828 = arith.divf %826, %827 : vector<8x64xf32>
    %829 = arith.mulf %820, %799 : vector<8x64xf32>
    %830 = arith.mulf %814, %822 : vector<8x64xf32>
    %831 = arith.addf %829, %830 : vector<8x64xf32>
    %832 = math.tanh %831 : vector<8x64xf32>
    %833 = arith.mulf %828, %832 : vector<8x64xf32>
    %834 = vector.extract_strided_slice %587 {offsets = [56, 0], sizes = [8, 256], strides = [1, 1]} : vector<64x256xf32> to vector<8x256xf32>
    %835 = vector.extract_strided_slice %587 {offsets = [0, 0], sizes = [8, 256], strides = [1, 1]} : vector<64x256xf32> to vector<8x256xf32>
    %836 = vector.shape_cast %607 : vector<1x256xi1> to vector<1x256xi1>
    %837 = vector.broadcast %836 : vector<1x256xi1> to vector<8x256xi1>
    %838 = arith.select %837, %834, %835 : vector<8x256xi1>, vector<8x256xf32>
    %cst_136 = arith.constant dense<0.000000e+00> : vector<8x256xf32>
    %839 = tpu.matmul %833, %588, %cst_136 {dimension_numbers = #tpu.dot_dimension_numbers<[1], [0], [0], [1], [0, 0, 1, 1], [], []>} : vector<8x64xf32>, vector<64x256xf32>, vector<8x256xf32> -> vector<8x256xf32>
    %840 = arith.addf %838, %839 : vector<8x256xf32>
    %841 = vector.extract_strided_slice %840 {offsets = [0, 0], sizes = [8, 64], strides = [1, 1]} : vector<8x256xf32> to vector<8x64xf32>
    %842 = arith.negf %841 : vector<8x64xf32>
    %843 = math.exp %842 : vector<8x64xf32>
    %cst_137 = arith.constant 1.000000e+00 : f32
    %844 = vector.broadcast %cst_137 : f32 to vector<8x64xf32>
    %845 = arith.addf %844, %843 : vector<8x64xf32>
    %846 = arith.divf %844, %845 : vector<8x64xf32>
    %847 = vector.extract_strided_slice %840 {offsets = [0, 64], sizes = [8, 64], strides = [1, 1]} : vector<8x256xf32> to vector<8x64xf32>
    %848 = arith.negf %847 : vector<8x64xf32>
    %849 = math.exp %848 : vector<8x64xf32>
    %cst_138 = arith.constant 1.000000e+00 : f32
    %850 = vector.broadcast %cst_138 : f32 to vector<8x64xf32>
    %851 = arith.addf %850, %849 : vector<8x64xf32>
    %852 = arith.divf %850, %851 : vector<8x64xf32>
    %853 = vector.extract_strided_slice %840 {offsets = [0, 128], sizes = [8, 64], strides = [1, 1]} : vector<8x256xf32> to vector<8x64xf32>
    %854 = math.tanh %853 : vector<8x64xf32>
    %855 = vector.extract_strided_slice %840 {offsets = [0, 192], sizes = [8, 64], strides = [1, 1]} : vector<8x256xf32> to vector<8x64xf32>
    %856 = arith.negf %855 : vector<8x64xf32>
    %857 = math.exp %856 : vector<8x64xf32>
    %cst_139 = arith.constant 1.000000e+00 : f32
    %858 = vector.broadcast %cst_139 : f32 to vector<8x64xf32>
    %859 = arith.addf %858, %857 : vector<8x64xf32>
    %860 = arith.divf %858, %859 : vector<8x64xf32>
    %861 = arith.mulf %852, %831 : vector<8x64xf32>
    %862 = arith.mulf %846, %854 : vector<8x64xf32>
    %863 = arith.addf %861, %862 : vector<8x64xf32>
    %864 = math.tanh %863 : vector<8x64xf32>
    %865 = arith.mulf %860, %864 : vector<8x64xf32>
    %c0_140 = arith.constant 0 : index
    %c0_141 = arith.constant 0 : index
    %866 = vector.load %arg11[%c0_140, %c0_141] : memref<64x4xf32, #tpu.memory_space<vmem>>, vector<64x4xf32>
    %cst_142 = arith.constant dense<0.000000e+00> : vector<8x4xf32>
    %867 = tpu.matmul %865, %866, %cst_142 {dimension_numbers = #tpu.dot_dimension_numbers<[1], [0], [0], [1], [0, 0, 1, 1], [], []>} : vector<8x64xf32>, vector<64x4xf32>, vector<8x4xf32> -> vector<8x4xf32>
    %c0_143 = arith.constant 0 : index
    %c0_144 = arith.constant 0 : index
    %868 = vector.load %arg12[%c0_143, %c0_144] : memref<1x4xf32, #tpu.memory_space<vmem>>, vector<1x4xf32>
    %869 = vector.broadcast %868 : vector<1x4xf32> to vector<8x4xf32>
    %870 = arith.addf %867, %869 : vector<8x4xf32>
    %c0_145 = arith.constant 0 : index
    %c0_146 = arith.constant 0 : index
    %871 = vector.load %arg13[%c0_145, %c0_146] : memref<8x4xf32, #tpu.memory_space<vmem>>, vector<8x4xf32>
    tpu.vector_store %arg13[%c0_145, %c0_146], %870 {strides = array<i32>} : memref<8x4xf32, #tpu.memory_space<vmem>>, vector<8x4xf32>,
    return
  }
}

</mosaic_0001>

<bundles_post_ra>
// kernel: model_forward.1
= control target key start
LH: loop header
LB: loop body
LE: loop exit
PB: predicated region body
PF: predicated region fallthrough
CT: control target
= control target key end

     0   :  { %18 = vsyncpa [#allocation3], 0  ;;  %s5234_s0 = inlined_call_operand.vmem [shape: f32[4], index: 0, kind: input, shape index: {}]   ;;  %s5235_s1 = inlined_call_operand.vmem [shape: f32[64,32], index: 1, kind: input, shape index: {}]   ;;  %s5236_s2 = inlined_call_operand.vmem [shape: f32[32,128], index: 2, kind: input, shape index: {}]   ;;  %s5237_s3 = inlined_call_operand.vmem [shape: f32[32,128], index: 3, kind: input, shape index: {}]   ;;  %s5238_s4 = inlined_call_operand.vmem [shape: f32[1,128], index: 4, kind: input, shape index: {}]   ;;  %s5239_s5 = inlined_call_operand.vmem [shape: f32[32,128], index: 5, kind: input, shape index: {}]   ;;  %s5240_s6 = inlined_call_operand.vmem [shape: f32[32,128], index: 6, kind: input, shape index: {}]   ;;  %s5241_s7 = inlined_call_operand.vmem [shape: f32[1,128], index: 7, kind: input, shape index: {}]   ;;  %s5242_s8 = inlined_call_operand.vmem [shape: f32[32,256], index: 8, kind: input, shape index: {}]   ;;  %s5243_s9 = inlined_call_operand.vmem [shape: f32[64,256], index: 9, kind: input, shape index: {}]   ;;  %s5244_s10 = inlined_call_operand.vmem [shape: f32[1,256], index: 10, kind: input, shape index: {}]   ;;  %s5245_s11 = inlined_call_operand.vmem [shape: f32[64,4], index: 11, kind: input, shape index: {}]   ;;  %s5246_s12 = inlined_call_operand.vmem [shape: f32[1,4], index: 12, kind: input, shape index: {}]   ;;  %s5247_s13 = inlined_call_operand.vmem [shape: f32[8,4], index: 13, kind: output, shape index: {}]  }
   0x1   :  { %s25_s27 = sshll.u32 %s5234_s0, 4  ;;  %s26_s27 = int_to_ptr.vmem [resolvable:$true] %s25_s27 }
   0x2   :  { %s4126_s28 = scalar_lea.vmem %s26_s27, 16  ;;  %p4131_p1 = scmp.lt.s32.totalorder %s26_s27, %s26_s27 }
   0x3   :  { %p4127_p0 = scmp.ne.s32.totalorder %s26_s27, %s4126_s28  ;;  %p4132_p2 = scmp.lt.s32.totalorder %s4126_s28, %s4126_s28 }
   0x5   :  { %p4133_p3 = por %p4132_p2, %p4131_p1 }
   0x7   :  { %p4134_p4 = pnand %p4133_p3, %p4127_p0 }
   0x9   :  { %4137 = shalt.err (!%p4134_p4)
}
   0xa   :  { %s4140_s29 = smov [#allocation2]  }
   0xb   :  { %28 = dma.vmem_to_smem %s26_s27, 16, %s4140_s29, [#allocation3]  }
   0xc   :  { %4138 = dma.done.wait [#allocation3], 16  }
   0xd   :  { %4139 = vsyncadd [#allocation3], 4294967280 }
   0xe   :  { %56 = sfence }
   0xf   :  { %v65_v0 = vld [vmem:[%s5236_s2] sm:$0xff]  ;;  %v66_v1 = vld [vmem:[%s5236_s2 + $0x8] sm:$0xff]  ;;  %v67_v2 = vld [vmem:[%s5236_s2 + $0x10] sm:$0xff]  ;;  %vm76_vm0 = vcmask 261120   ;;  %v4141_v7 = vmov 0.0|0.0   ;;  %vm4142_vm1 = vmmov 0   ;;  %v210_v22 = vlaneseq }
  0x10   :  { %v3628_v3 = vpack.c.bf16 %v66_v1, %v65_v0  ;;  %v68_v4 = vld [vmem:[%s5236_s2 + $0x18] sm:$0xff]  ;;  %v57_v5 = vld [vmem:[%s5235_s1] sm:$0xff]  ;;  %3636 = vmatprep.subr.bf16.mxu1 %v4141_v7  ;;  %v207_v9 = vld [vmem:[%s5237_s3 + $0x8] sm:$0xff]  ;;  %v4143_v10 = vmov 0.0   ;;  %s4145_s2 = smov 32   ;;  %s3245_s18 = sld [smem:[#allocation2 + $0x2]] }
  0x11   :  { %v3632_v6 = vpack.c.bf16 %v68_v4, %v67_v2  ;;  %3401 = vmatprep.mubr.msk.f32.mxu0 %vm76_vm0, %v57_v5  ;;  %v206_v8 = vld [vmem:[%s5237_s3] sm:$0xff]  ;;  %3421 = vmatprep.mubr.msk.f32.mxu1 %vm4142_vm1, %v4143_v10  ;;  %v208_v12 = vld [vmem:[%s5237_s3 + $0x10] sm:$0xff]  ;;  %v209_v13 = vld [vmem:[%s5237_s3 + $0x18] sm:$0xff]  ;;  %v4304_v25 = vand.u32 127, %v210_v22  ;;  %s1961_s19 = sld [smem:[#allocation2]]  ;;  %s3246_s27 = sld [smem:[#allocation2 + $0x3]] }
  0x12   :  { %3629 = vmatprep.subr.bf16.mxu0 %v3628_v3  ;;  %v4244_v11 = vpack.c.bf16 %v207_v9, %v206_v8  ;;  %v4253_v14 = vpack.c.bf16 %v209_v13, %v208_v12  ;;  %v58_v15 = vld [vmem:[%s5235_s1 + $0x8] sm:$0xff]  ;;  %v59_v16 = vld [vmem:[%s5235_s1 + $0x10] sm:$0xff]  ;;  %v60_v17 = vld [vmem:[%s5235_s1 + $0x18] sm:$0xff]  ;;  %vm2287_vm5 = vcmask 523264   ;;  %vm3189_vm6 = vcmask 31744  }
  0x13   :  { %3631 = vmatpush3.bf16.msra.mxu0 %v3628_v3  ;;  %v61_v18 = vld [vmem:[%s5235_s1 + $0x20] sm:$0xff]  ;;  %v62_v19 = vld [vmem:[%s5235_s1 + $0x28] sm:$0xff]  ;;  %v63_v20 = vld [vmem:[%s5235_s1 + $0x30] sm:$0xff]  ;;  %v216_v31 = vand.u32 31, %v4304_v25 }
  0x14   :  { %3633 = vmatprep.subr.bf16.mxu0 %v3632_v6  ;;  %3638 = vmatpush3.bf16.msra.mxu1 %v4244_v11  ;;  %v64_v21 = vld [vmem:[%s5235_s1 + $0x38] sm:$0xff]  ;;  %v3196_v23 = vld [vmem:[%s5238_s4] ss:$0 sm:$0xff]  ;;  %s4144_s4 = smov 64  }
  0x15   :  { %3639 = vmatprep.subr.bf16.mxu1 %v4141_v7  ;;  %vm4313_vm2 = vcmp.lt.s32.totalorder %v216_v31, 16 }
  0x17   :  { %3635 = vmatpush3.bf16.msra.mxu0 %v3632_v6 }
  0x18   :  { %3648 = vmatprep.subr.bf16.mxu0 %v4141_v7  ;;  %3641 = vmatpush3.bf16.msra.mxu1 %v4253_v14 }
  0x19   :  { %3642 = vmatprep.subr.bf16.mxu1 %v4141_v7 }
  0x1a   :  { %3402 = vmatmul.mubr.msk.f32.vlgmr.msra.gmra.mrb[0].mxu0 %vm76_vm0, %v58_v15 }
  0x1b   :  { %3404 = vmatprep.mubr.msk.f32.mxu0 %vm76_vm0, %v59_v16  ;;  %3650 = vmatpush3.bf16.msra.mxu0 %v4244_v11 }
  0x1c   :  { %3422 = vmatmul.mubr.f32.vlgmr.msra.gmra.mrb[0].mxu1 %v4143_v10  ;;  %3651 = vmatprep.subr.bf16.mxu0 %v4141_v7 }
  0x1d   :  { %3644 = vmatpush3.bf16.msra.mxu1 %v4244_v11  ;;  %3432 = vmatprep.mubr.msk.f32.mxu1 %vm4142_vm1, %v4143_v10 }
  0x1e   :  { %3405 = vmatmul.mubr.msk.f32.gmra.mrb[2].mxu0 %vm76_vm0, %v60_v17  ;;  %3645 = vmatprep.subr.bf16.mxu1 %v4141_v7 }
  0x1f   :  { %3407 = vmatprep.mubr.msk.f32.mxu0 %vm76_vm0, %v61_v18  ;;  %3653 = vmatpush3.bf16.msra.mxu0 %v4253_v14 }
  0x20   :  { %3660 = vmatprep.subr.bf16.mxu0 %v4141_v7 }
  0x21   :  { %3647 = vmatpush3.bf16.msra.mxu1 %v4253_v14 }
  0x22   :  { %3408 = vmatmul.mubr.msk.f32.gmra.mrb[4].mxu0 %vm76_vm0, %v62_v19  ;;  %3654 = vmatprep.subr.bf16.mxu1 %v4141_v7 }
  0x23   :  { %3410 = vmatprep.mubr.msk.f32.mxu0 %vm76_vm0, %v63_v20 }
  0x26   :  { %3411 = vmatmul.mubr.msk.f32.gmra.mrb[6].mxu0 %vm76_vm0, %v64_v21 }
  0x27   :  { %3443 = vmatprep.mubr.msk.f32.mxu0 %vm4142_vm1, %v4143_v10 }
  0xed   :  { %v3403_v24 = vpop.f32.mrb[0].mxu0 }
  0xee   :  { %v4306_v26 = vadd.f32 %v3403_v24, %v3196_v23  ;;  %v167_v27 = vpop.f32.mrb[1].mxu0 }
  0xef   :  { %v297_v28 = vpop.f32.mrb[0].mxu1  ;;  %v4337_v45 = vadd.f32 %v3196_v23, %v167_v27 }
  0xf0   :  { %v3423_v29 = vpop.f32.mrb[1].mxu1 }
  0xf1   :  { %v3406_v30 = vpop.f32.mrb[2].mxu0 }
  0xf2   :  { %v4309_v32 = vadd.f32 %v3406_v30, %v3196_v23  ;;  %v177_v33 = vpop.f32.mrb[3].mxu0 }
  0xf3   :  { %v4311_v34 = vadd.f32 %v3196_v23, %v177_v33 }
  0xf5   :  { %v3409_v35 = vpop.f32.mrb[4].mxu0 }
  0xf6   :  { %v4317_v37 = vadd.f32 %v3409_v35, %v3196_v23  ;;  %v187_v38 = vpop.f32.mrb[5].mxu0 }
  0xf7   :  { %v4319_v39 = vadd.f32 %v3196_v23, %v187_v38 }
  0xf8   :  { %v427_v40 = vsel %vm4313_vm2, %v4311_v34, %v4317_v37  ;;  %v730_v41 = vsel %vm4313_vm2, %v4317_v37, %v4311_v34  ;;  %v1033_v34 = vld [vmem:[%s5239_s5] sm:$0xff]  ;;  %v1034_v37 = vld [vmem:[%s5239_s5 + $0x8] sm:$0xff] }
  0xf9   :  { %v3412_v42 = vpop.f32.mrb[6].mxu0  ;;  %v528_v43 = vsel %vm4313_vm2, %v4309_v32, %v4319_v39  ;;  %v629_v44 = vsel %vm4313_vm2, %v4319_v39, %v4309_v32 }
  0xfa   :  { %v4339_v46 = vadd.f32 %v3412_v42, %v3196_v23  ;;  %v197_v47 = vpop.f32.mrb[7].mxu0 }
  0xfb   :  { %v4341_v48 = vadd.f32 %v3196_v23, %v197_v47 }
  0xfc   :  { %v227_v49 = vsel %vm4313_vm2, %v4337_v45, %v4339_v46  ;;  %v932_v50 = vsel %vm4313_vm2, %v4339_v46, %v4337_v45  ;;  %v1154_v45 = vld [vmem:[%s5240_s6] sm:$0xff]  ;;  %v1155_v46 = vld [vmem:[%s5240_s6 + $0x8] sm:$0xff] }
  0xfd   :  { %v301_v51 = vadd.f32 %v297_v28, %v227_v49  ;;  %v326_v52 = vsel %vm4313_vm2, %v4306_v26, %v4341_v48  ;;  %v831_v53 = vsel %vm4313_vm2, %v4341_v48, %v4306_v26 }
  0xff   :  { %3894 = vtanh.f32 %v301_v51  ;;  %v3205_v55 = vmul.f32 -1.442695, %v301_v51 }
 0x101   :  { %3896 = vpow2.f32 %v3205_v55 }
 0x109   :  { %v3895_v54 = vpop.eup %3894 }
 0x10a   :  { %311 = vrot.lane.b32.xlu0 %v3895_v54, %s4144_s4 }
 0x10b   :  { %v3897_v56 = vpop.eup %3896 }
 0x10c   :  { %v305_v57 = vadd.f32 1.0, %v3897_v56 }
 0x10e   :  { %3898 = vrcp.f32 %v305_v57 }
 0x118   :  { %v3899_v58 = vpop.eup %3898 }
 0x119   :  { %v309_v61 = vmul.f32 0.0, %v3899_v58 }
 0x17c   :  { %v312_v59 = vpop.permute.xlu0 %311 }
 0x17d   :  { %v314_v60 = vmul.f32 %v3899_v58, %v312_v59 }
 0x17f   :  { %316 = vrot.lane.b32.xlu0 %v314_v60, %s4145_s2 }
 0x1f1   :  { %v317_v62 = vpop.permute.xlu0 %316 }
 0x1f2   :  { %v319_v63 = vadd.f32 %v317_v62, %v309_v61 }
 0x1f4   :  { %3900 = vtanh.f32 %v319_v63 }
 0x1fe   :  { %v3901_v0 = vpop.eup %3900 }
 0x1ff   :  { %322 = vrot.lane.b32.xlu1 %v3901_v0, %s4144_s4 }
 0x271   :  { %v323_v1 = vpop.permute.xlu1 %322 }
 0x272   :  { %v4362_v2 = vmul.f32 %v3899_v58, %v323_v1 }
 0x274   :  { %328 = vrot.lane.b32.xlu1 %v4362_v2, %s4145_s2 }
 0x2e6   :  { %v4366_v3 = vpop.permute.xlu1 %328 }
 0x2e7   :  { %3433 = vmatmul.mubr.msk.f32.vlgmr.msra.gmra.mrb[2].mxu1 %vm76_vm0, %v4366_v3 }
 0x2e8   :  { %3656 = vmatpush3.bf16.msra.mxu1 %v4244_v11  ;;  %3454 = vmatprep.mubr.msk.f32.mxu1 %vm4142_vm1, %v4143_v10 }
 0x2e9   :  { %3657 = vmatprep.subr.bf16.mxu1 %v4141_v7 }
 0x2ec   :  { %3659 = vmatpush3.bf16.msra.mxu1 %v4253_v14 }
 0x2ed   :  { %3666 = vmatprep.subr.bf16.mxu1 %v4141_v7 }
 0x3ba   :  { %v398_v4 = vpop.f32.mrb[2].mxu1 }
 0x3bb   :  { %v402_v5 = vadd.f32 %v398_v4, %v326_v52  ;;  %v3434_v6 = vpop.f32.mrb[3].mxu1 }
 0x3bd   :  { %3902 = vtanh.f32 %v402_v5  ;;  %v3207_v9 = vmul.f32 -1.442695, %v402_v5 }
 0x3bf   :  { %3904 = vpow2.f32 %v3207_v9 }
 0x3c7   :  { %v3903_v8 = vpop.eup %3902 }
 0x3c8   :  { %412 = vrot.lane.b32.xlu0 %v3903_v8, %s4144_s4 }
 0x3c9   :  { %v3905_v12 = vpop.eup %3904 }
 0x3ca   :  { %v406_v13 = vadd.f32 1.0, %v3905_v12 }
 0x3cc   :  { %3906 = vrcp.f32 %v406_v13 }
 0x3d6   :  { %v3907_v15 = vpop.eup %3906 }
 0x3d7   :  { %v410_v18 = vmul.f32 %v3907_v15, %v319_v63 }
 0x43a   :  { %v413_v16 = vpop.permute.xlu0 %412 }
 0x43b   :  { %v415_v17 = vmul.f32 %v3907_v15, %v413_v16 }
 0x43d   :  { %417 = vrot.lane.b32.xlu1 %v415_v17, %s4145_s2 }
 0x4af   :  { %v418_v19 = vpop.permute.xlu1 %417 }
 0x4b0   :  { %v420_v20 = vadd.f32 %v418_v19, %v410_v18 }
 0x4b2   :  { %3908 = vtanh.f32 %v420_v20 }
 0x4bc   :  { %v3909_v21 = vpop.eup %3908 }
 0x4bd   :  { %423 = vrot.lane.b32.xlu0 %v3909_v21, %s4144_s4 }
 0x52f   :  { %v424_v23 = vpop.permute.xlu0 %423 }
 0x530   :  { %v4379_v24 = vmul.f32 %v3907_v15, %v424_v23 }
 0x532   :  { %429 = vrot.lane.b32.xlu1 %v4379_v24, %s4145_s2 }
 0x5a4   :  { %v4383_v27 = vpop.permute.xlu1 %429 }
 0x5a5   :  { %3444 = vmatmul.mubr.msk.f32.vlgmr.msra.gmra.mrb[8].mxu0 %vm76_vm0, %v4383_v27 }
 0x5a6   :  { %3662 = vmatpush3.bf16.msra.mxu0 %v4244_v11  ;;  %3465 = vmatprep.mubr.msk.f32.mxu0 %vm4142_vm1, %v4143_v10 }
 0x5a7   :  { %3663 = vmatprep.subr.bf16.mxu0 %v4141_v7 }
 0x5aa   :  { %3665 = vmatpush3.bf16.msra.mxu0 %v4253_v14 }
 0x5ab   :  { %3672 = vmatprep.subr.bf16.mxu0 %v4141_v7 }
 0x678   :  { %v499_v28 = vpop.f32.mrb[8].mxu0 }
 0x679   :  { %v503_v29 = vadd.f32 %v499_v28, %v427_v40  ;;  %v3445_v30 = vpop.f32.mrb[9].mxu0 }
 0x67b   :  { %3910 = vtanh.f32 %v503_v29  ;;  %v3209_v33 = vmul.f32 -1.442695, %v503_v29 }
 0x67d   :  { %3912 = vpow2.f32 %v3209_v33 }
 0x685   :  { %v3911_v31 = vpop.eup %3910 }
 0x686   :  { %513 = vrot.lane.b32.xlu0 %v3911_v31, %s4144_s4 }
 0x687   :  { %v3913_v35 = vpop.eup %3912 }
 0x688   :  { %v507_v38 = vadd.f32 1.0, %v3913_v35 }
 0x68a   :  { %3914 = vrcp.f32 %v507_v38 }
 0x694   :  { %v3915_v42 = vpop.eup %3914 }
 0x695   :  { %v511_v51 = vmul.f32 %v3915_v42, %v420_v20 }
 0x6f8   :  { %v514_v47 = vpop.permute.xlu0 %513 }
 0x6f9   :  { %v516_v49 = vmul.f32 %v3915_v42, %v514_v47 }
 0x6fb   :  { %518 = vrot.lane.b32.xlu1 %v516_v49, %s4145_s2 }
 0x76d   :  { %v519_v52 = vpop.permute.xlu1 %518 }
 0x76e   :  { %v521_v54 = vadd.f32 %v519_v52, %v511_v51 }
 0x770   :  { %3916 = vtanh.f32 %v521_v54 }
 0x77a   :  { %v3917_v40 = vpop.eup %3916 }
 0x77b   :  { %524 = vrot.lane.b32.xlu0 %v3917_v40, %s4144_s4 }
 0x7ed   :  { %v525_v55 = vpop.permute.xlu0 %524 }
 0x7ee   :  { %v4401_v56 = vmul.f32 %v3915_v42, %v525_v55 }
 0x7f0   :  { %530 = vrot.lane.b32.xlu1 %v4401_v56, %s4145_s2 }
 0x862   :  { %v4405_v57 = vpop.permute.xlu1 %530 }
 0x863   :  { %3455 = vmatmul.mubr.msk.f32.vlgmr.msra.gmra.mrb[4].mxu1 %vm76_vm0, %v4405_v57 }
 0x864   :  { %3668 = vmatpush3.bf16.msra.mxu1 %v4244_v11  ;;  %3476 = vmatprep.mubr.msk.f32.mxu1 %vm4142_vm1, %v4143_v10 }
 0x865   :  { %3669 = vmatprep.subr.bf16.mxu1 %v4141_v7 }
 0x868   :  { %3671 = vmatpush3.bf16.msra.mxu1 %v4253_v14 }
 0x869   :  { %3678 = vmatprep.subr.bf16.mxu1 %v4141_v7 }
 0x936   :  { %v600_v58 = vpop.f32.mrb[4].mxu1 }
 0x937   :  { %v604_v59 = vadd.f32 %v600_v58, %v528_v43  ;;  %v3456_v60 = vpop.f32.mrb[5].mxu1 }
 0x939   :  { %3918 = vtanh.f32 %v604_v59  ;;  %v3211_v62 = vmul.f32 -1.442695, %v604_v59 }
 0x93b   :  { %3920 = vpow2.f32 %v3211_v62 }
 0x943   :  { %v3919_v61 = vpop.eup %3918 }
 0x944   :  { %614 = vrot.lane.b32.xlu0 %v3919_v61, %s4144_s4 }
 0x945   :  { %v3921_v63 = vpop.eup %3920 }
 0x946   :  { %v608_v0 = vadd.f32 1.0, %v3921_v63 }
 0x948   :  { %3922 = vrcp.f32 %v608_v0  ;;  %v1035_v0 = vld [vmem:[%s5239_s5 + $0x10] sm:$0xff] }
 0x952   :  { %v3923_v1 = vpop.eup %3922 }
 0x953   :  { %v612_v6 = vmul.f32 %v3923_v1, %v521_v54 }
 0x9b6   :  { %v615_v4 = vpop.permute.xlu0 %614 }
 0x9b7   :  { %v617_v5 = vmul.f32 %v3923_v1, %v615_v4 }
 0x9b9   :  { %619 = vrot.lane.b32.xlu1 %v617_v5, %s4145_s2 }
 0xa2b   :  { %v620_v8 = vpop.permute.xlu1 %619 }
 0xa2c   :  { %v622_v9 = vadd.f32 %v620_v8, %v612_v6 }
 0xa2e   :  { %3924 = vtanh.f32 %v622_v9 }
 0xa38   :  { %v3925_v43 = vpop.eup %3924 }
 0xa39   :  { %625 = vrot.lane.b32.xlu0 %v3925_v43, %s4144_s4 }
 0xaab   :  { %v626_v12 = vpop.permute.xlu0 %625 }
 0xaac   :  { %v4423_v13 = vmul.f32 %v3923_v1, %v626_v12  ;;  %v1036_v1 = vld [vmem:[%s5239_s5 + $0x18] sm:$0xff] }
 0xaad   :  { %v3688_v4 = vpack.c.bf16 %v1036_v1, %v1035_v0  ;;  %v1157_v0 = vld [vmem:[%s5240_s6 + $0x18] sm:$0xff] }
 0xaae   :  { %631 = vrot.lane.b32.xlu1 %v4423_v13, %s4145_s2 }
 0xb20   :  { %v4427_v15 = vpop.permute.xlu1 %631 }
 0xb21   :  { %3466 = vmatmul.mubr.msk.f32.vlgmr.msra.gmra.mrb[10].mxu0 %vm76_vm0, %v4427_v15 }
 0xb22   :  { %3674 = vmatpush3.bf16.msra.mxu0 %v4244_v11  ;;  %3487 = vmatprep.mubr.msk.f32.mxu0 %vm4142_vm1, %v4143_v10 }
 0xb23   :  { %3675 = vmatprep.subr.bf16.mxu0 %v4141_v7 }
 0xb26   :  { %3677 = vmatpush3.bf16.msra.mxu0 %v4253_v14 }
 0xbf4   :  { %v701_v16 = vpop.f32.mrb[10].mxu0 }
 0xbf5   :  { %v705_v17 = vadd.f32 %v701_v16, %v629_v44  ;;  %v3467_v18 = vpop.f32.mrb[11].mxu0 }
 0xbf7   :  { %3926 = vtanh.f32 %v705_v17  ;;  %v3213_v20 = vmul.f32 -1.442695, %v705_v17 }
 0xbf9   :  { %3928 = vpow2.f32 %v3213_v20 }
 0xc01   :  { %v3927_v19 = vpop.eup %3926 }
 0xc02   :  { %715 = vrot.lane.b32.xlu0 %v3927_v19, %s4144_s4 }
 0xc03   :  { %v3929_v21 = vpop.eup %3928 }
 0xc04   :  { %v709_v23 = vadd.f32 1.0, %v3929_v21 }
 0xc06   :  { %3930 = vrcp.f32 %v709_v23 }
 0xc10   :  { %v3931_v28 = vpop.eup %3930 }
 0xc11   :  { %v713_v31 = vmul.f32 %v3931_v28, %v622_v9 }
 0xc74   :  { %v716_v29 = vpop.permute.xlu0 %715 }
 0xc75   :  { %v718_v30 = vmul.f32 %v3931_v28, %v716_v29 }
 0xc77   :  { %720 = vrot.lane.b32.xlu1 %v718_v30, %s4145_s2 }
 0xce9   :  { %v721_v33 = vpop.permute.xlu1 %720 }
 0xcea   :  { %v723_v35 = vadd.f32 %v721_v33, %v713_v31 }
 0xcec   :  { %3932 = vtanh.f32 %v723_v35 }
 0xcf6   :  { %v3933_v32 = vpop.eup %3932 }
 0xcf7   :  { %726 = vrot.lane.b32.xlu0 %v3933_v32, %s4144_s4 }
 0xd69   :  { %v727_v39 = vpop.permute.xlu0 %726 }
 0xd6a   :  { %v4444_v44 = vmul.f32 %v3931_v28, %v727_v39 }
 0xd6c   :  { %732 = vrot.lane.b32.xlu1 %v4444_v44, %s4145_s2 }
 0xdde   :  { %v733_v38 = vpop.permute.xlu1 %732 }
 0xddf   :  { %3477 = vmatmul.mubr.msk.f32.vlgmr.msra.gmra.mrb[6].mxu1 %vm76_vm0, %v733_v38 }
 0xde0   :  { %3680 = vmatpush3.bf16.msra.mxu1 %v4244_v11  ;;  %3498 = vmatprep.mubr.msk.f32.mxu1 %vm4142_vm1, %v4143_v10 }
 0xde1   :  { %3681 = vmatprep.subr.bf16.mxu1 %v4141_v7 }
 0xde4   :  { %3683 = vmatpush3.bf16.msra.mxu1 %v4253_v14 }
 0xde5   :  { %3692 = vmatprep.subr.bf16.mxu1 %v4141_v7 }
 0xeb2   :  { %v802_v42 = vpop.f32.mrb[6].mxu1 }
 0xeb3   :  { %v806_v47 = vadd.f32 %v802_v42, %v730_v41  ;;  %v3478_v49 = vpop.f32.mrb[7].mxu1  ;;  %v3684_v41 = vpack.c.bf16 %v1034_v37, %v1033_v34 }
 0xeb5   :  { %3934 = vtanh.f32 %v806_v47  ;;  %v3215_v11 = vmul.f32 -1.442695, %v806_v47  ;;  %3685 = vmatprep.subr.bf16.mxu0 %v3684_v41 }
 0xeb7   :  { %3936 = vpow2.f32 %v3215_v11 }
 0xebf   :  { %v3935_v51 = vpop.eup %3934 }
 0xec0   :  { %816 = vrot.lane.b32.xlu0 %v3935_v51, %s4144_s4 }
 0xec1   :  { %v3937_v52 = vpop.eup %3936 }
 0xec2   :  { %v810_v54 = vadd.f32 1.0, %v3937_v52 }
 0xec4   :  { %3938 = vrcp.f32 %v810_v54 }
 0xece   :  { %v3939_v14 = vpop.eup %3938 }
 0xecf   :  { %v814_v58 = vmul.f32 %v3939_v14, %v723_v35 }
 0xf32   :  { %v817_v40 = vpop.permute.xlu0 %816 }
 0xf33   :  { %v819_v55 = vmul.f32 %v3939_v14, %v817_v40 }
 0xf35   :  { %821 = vrot.lane.b32.xlu1 %v819_v55, %s4145_s2 }
 0xfa7   :  { %v822_v59 = vpop.permute.xlu1 %821 }
 0xfa8   :  { %v824_v60 = vadd.f32 %v822_v59, %v814_v58 }
 0xfaa   :  { %3940 = vtanh.f32 %v824_v60 }
 0xfb4   :  { %v3941_v61 = vpop.eup %3940 }
 0xfb5   :  { %827 = vrot.lane.b32.xlu0 %v3941_v61, %s4144_s4 }
0x1027   :  { %v828_v62 = vpop.permute.xlu0 %827 }
0x1028   :  { %v4469_v63 = vmul.f32 %v3939_v14, %v828_v62  ;;  %v4560_v62 = vpack.c.bf16 %v1155_v46, %v1154_v45 }
0x102a   :  { %833 = vrot.lane.b32.xlu1 %v4469_v63, %s4145_s2 }
0x109c   :  { %v834_v5 = vpop.permute.xlu1 %833 }
0x109d   :  { %3488 = vmatmul.mubr.msk.f32.vlgmr.msra.gmra.mrb[12].mxu0 %vm76_vm0, %v834_v5 }
0x109e   :  { %3687 = vmatpush3.bf16.msra.mxu0 %v3684_v41  ;;  %3509 = vmatprep.mubr.msk.f32.mxu0 %vm76_vm0, %v4366_v3 }
0x109f   :  { %3689 = vmatprep.subr.bf16.mxu0 %v3688_v4 }
0x10a2   :  { %3691 = vmatpush3.bf16.msra.mxu0 %v3688_v4 }
0x10a3   :  { %3704 = vmatprep.subr.bf16.mxu0 %v4141_v7 }
0x10a5   :  { %3510 = vmatmul.mubr.msk.f32.vlgmr.msra.gmra.mrb[14].mxu0 %vm76_vm0, %v4383_v27 }
0x10a6   :  { %3512 = vmatprep.mubr.msk.f32.mxu0 %vm76_vm0, %v4405_v57  ;;  %3706 = vmatpush3.bf16.msra.mxu0 %v4560_v62 }
0x10a7   :  { %3707 = vmatprep.subr.bf16.mxu0 %v4141_v7 }
0x10a9   :  { %3513 = vmatmul.mubr.msk.f32.gmra.mrb[16].mxu0 %vm76_vm0, %v4427_v15  ;;  %v4504_v15 = vld [vmem:[%s5241_s7] ss:$0 sm:$0xff] }
0x10aa   :  { %3515 = vmatprep.mubr.msk.f32.mxu0 %vm76_vm0, %v733_v38 }
0x10ad   :  { %3516 = vmatmul.mubr.msk.f32.gmra.mrb[18].mxu0 %vm76_vm0, %v834_v5 }
0x1170   :  { %v903_v6 = vpop.f32.mrb[12].mxu0 }
0x1171   :  { %v907_v3 = vadd.f32 %v903_v6, %v831_v53  ;;  %v3489_v8 = vpop.f32.mrb[13].mxu0 }
0x1173   :  { %3942 = vtanh.f32 %v907_v3  ;;  %v3217_v28 = vmul.f32 -1.442695, %v907_v3 }
0x1175   :  { %3944 = vpow2.f32 %v3217_v28 }
0x1178   :  { %v4496_v27 = vpop.f32.mrb[14].mxu0 }
0x1179   :  { %v4498_v9 = vpop.f32.mrb[15].mxu0  ;;  %v4599_v28 = vadd.f32 %v4496_v27, %v4504_v15 }
0x117c   :  { %v3514_v57 = vpop.f32.mrb[16].mxu0 }
0x117d   :  { %v3943_v43 = vpop.eup %3942  ;;  %v1125_v12 = vpop.f32.mrb[17].mxu0  ;;  %v4513_v17 = vadd.f32 %v3514_v57, %v4504_v15 }
0x117e   :  { %917 = vrot.lane.b32.xlu0 %v3943_v43, %s4144_s4  ;;  %v4507_v26 = vadd.f32 %v4504_v15, %v1125_v12  ;;  %v4592_v12 = vadd.f32 %v4504_v15, %v4498_v9 }
0x117f   :  { %v3945_v29 = vpop.eup %3944 }
0x1180   :  { %v3517_v16 = vpop.f32.mrb[18].mxu0  ;;  %v911_v30 = vadd.f32 1.0, %v3945_v29 }
0x1181   :  { %v4510_v48 = vadd.f32 %v3517_v16, %v4504_v15  ;;  %v1135_v53 = vpop.f32.mrb[19].mxu0 }
0x1182   :  { %v4516_v18 = vadd.f32 %v4504_v15, %v1135_v53  ;;  %3946 = vrcp.f32 %v911_v30 }
0x1183   :  { %v1355_v19 = vsel %vm4313_vm2, %v4507_v26, %v4510_v48  ;;  %v1658_v20 = vsel %vm4313_vm2, %v4510_v48, %v4507_v26 }
0x1184   :  { %v1456_v21 = vsel %vm4313_vm2, %v4513_v17, %v4516_v18  ;;  %v1557_v23 = vsel %vm4313_vm2, %v4516_v18, %v4513_v17 }
0x118c   :  { %v3947_v31 = vpop.eup %3946 }
0x118d   :  { %v915_v32 = vmul.f32 %v3947_v31, %v824_v60 }
0x11f0   :  { %v918_v33 = vpop.permute.xlu0 %917 }
0x11f1   :  { %v920_v35 = vmul.f32 %v3947_v31, %v918_v33 }
0x11f3   :  { %922 = vrot.lane.b32.xlu1 %v920_v35, %s4145_s2 }
0x1265   :  { %v923_v39 = vpop.permute.xlu1 %922 }
0x1266   :  { %v925_v38 = vadd.f32 %v923_v39, %v915_v32 }
0x1268   :  { %3948 = vtanh.f32 %v925_v38 }
0x1272   :  { %v3949_v42 = vpop.eup %3948 }
0x1273   :  { %928 = vrot.lane.b32.xlu0 %v3949_v42, %s4144_s4 }
0x12e5   :  { %v929_v47 = vpop.permute.xlu0 %928 }
0x12e6   :  { %v4536_v49 = vmul.f32 %v3947_v31, %v929_v47 }
0x12e8   :  { %934 = vrot.lane.b32.xlu1 %v4536_v49, %s4145_s2 }
0x135a   :  { %v935_v51 = vpop.permute.xlu1 %934 }
0x135b   :  { %3499 = vmatmul.mubr.msk.f32.vlgmr.msra.gmra.mrb[8].mxu1 %vm76_vm0, %v935_v51  ;;  %3518 = vmatprep.mubr.msk.f32.mxu0 %vm76_vm0, %v935_v51 }
0x135c   :  { %3529 = vmatprep.mubr.msk.f32.mxu1 %vm4142_vm1, %v4143_v10  ;;  %3694 = vmatpush3.bf16.msra.mxu1 %v4560_v62 }
0x135d   :  { %3695 = vmatprep.subr.bf16.mxu1 %v4141_v7 }
0x142e   :  { %v1004_v11 = vpop.f32.mrb[8].mxu1 }
0x142f   :  { %v1008_v52 = vadd.f32 %v1004_v11, %v932_v50  ;;  %v3500_v54 = vpop.f32.mrb[9].mxu1  ;;  %v1156_v50 = vld [vmem:[%s5240_s6 + $0x10] sm:$0xff]  ;;  %s3244_s6 = sld [smem:[#allocation2 + $0x1]] }
0x1430   :  { %v4566_v1 = vpack.c.bf16 %v1157_v0, %v1156_v50 }
0x1431   :  { %3950 = vtanh.f32 %v1008_v52  ;;  %v3219_v40 = vmul.f32 -1.442695, %v1008_v52 }
0x1432   :  { %3697 = vmatpush3.bf16.msra.mxu1 %v4566_v1  ;;  %3709 = vmatpush3.bf16.msra.mxu0 %v4566_v1 }
0x1433   :  { %3952 = vpow2.f32 %v3219_v40  ;;  %3698 = vmatprep.subr.bf16.mxu1 %v4141_v7  ;;  %3716 = vmatprep.subr.bf16.mxu0 %v4141_v7 }
0x1435   :  { %3530 = vmatmul.mubr.f32.vlgmr.msra.gmra.mrb[10].mxu1 %v4143_v10 }
0x1436   :  { %3700 = vmatpush3.bf16.msra.mxu1 %v4560_v62  ;;  %3540 = vmatprep.mubr.msk.f32.mxu1 %vm4142_vm1, %v4143_v10 }
0x1437   :  { %3701 = vmatprep.subr.bf16.mxu1 %v4141_v7 }
0x143a   :  { %3703 = vmatpush3.bf16.msra.mxu1 %v4566_v1 }
0x143b   :  { %v3951_v14 = vpop.eup %3950  ;;  %3710 = vmatprep.subr.bf16.mxu1 %v4141_v7 }
0x143c   :  { %1018 = vrot.lane.b32.xlu0 %v3951_v14, %s4144_s4 }
0x143d   :  { %v3953_v55 = vpop.eup %3952 }
0x143e   :  { %v1012_v58 = vadd.f32 1.0, %v3953_v55 }
0x1440   :  { %3954 = vrcp.f32 %v1012_v58 }
0x144a   :  { %v3955_v59 = vpop.eup %3954 }
0x144b   :  { %v1016_v37 = vmul.f32 %v3955_v59, %v925_v38 }
0x14ae   :  { %v1019_v60 = vpop.permute.xlu0 %1018 }
0x14af   :  { %v1021_v34 = vmul.f32 %v3955_v59, %v1019_v60 }
0x14b1   :  { %1023 = vrot.lane.b32.xlu1 %v1021_v34, %s4145_s2 }
0x1508   :  { %v1225_v8 = vpop.f32.mrb[10].mxu1 }
0x1509   :  { %v3531_v57 = vpop.f32.mrb[11].mxu1 }
0x1523   :  { %v1024_v41 = vpop.permute.xlu1 %1023 }
0x1524   :  { %v1026_v61 = vadd.f32 %v1024_v41, %v1016_v37 }
0x1526   :  { %3956 = vtanh.f32 %v1026_v61 }
0x1530   :  { %v3957_v4 = vpop.eup %3956 }
0x1531   :  { %1029 = vrot.lane.b32.xlu0 %v3957_v4, %s4144_s4 }
0x15a3   :  { %v1030_v5 = vpop.permute.xlu0 %1029 }
0x15a4   :  { %v4583_v6 = vmul.f32 %v3955_v59, %v1030_v5 }
0x15a6   :  { %1045 = vrot.lane.b32.xlu1 %v4583_v6, %s4145_s2 }
0x1618   :  { %v1046_v3 = vpop.permute.xlu1 %1045 }
0x1619   :  { %3519 = vmatmul.mubr.msk.f32.gmra.mrb[20].mxu0 %vm76_vm0, %v1046_v3 }
0x161a   :  { %3551 = vmatprep.mubr.msk.f32.mxu0 %vm4142_vm1, %v4143_v10 }
0x16ec   :  { %v3520_v43 = vpop.f32.mrb[20].mxu0 }
0x16ed   :  { %v4595_v16 = vadd.f32 %v3520_v43, %v4504_v15  ;;  %v1145_v53 = vpop.f32.mrb[21].mxu0 }
0x16ee   :  { %v4602_v29 = vadd.f32 %v4504_v15, %v1145_v53 }
0x16ef   :  { %v1158_v30 = vsel %vm4313_vm2, %v4592_v12, %v4595_v16  ;;  %v1860_v9 = vsel %vm4313_vm2, %v4595_v16, %v4592_v12 }
0x16f0   :  { %v1229_v31 = vadd.f32 %v1225_v8, %v1158_v30  ;;  %v1254_v27 = vsel %vm4313_vm2, %v4599_v28, %v4602_v29  ;;  %v1759_v15 = vsel %vm4313_vm2, %v4602_v29, %v4599_v28 }
0x16f2   :  { %3958 = vtanh.f32 %v1229_v31  ;;  %v3229_v35 = vmul.f32 -1.442695, %v1229_v31 }
0x16f4   :  { %3960 = vpow2.f32 %v3229_v35 }
0x16fc   :  { %v3959_v33 = vpop.eup %3958 }
0x16fd   :  { %1239 = vrot.lane.b32.xlu0 %v3959_v33, %s4144_s4 }
0x16fe   :  { %v3961_v32 = vpop.eup %3960 }
0x16ff   :  { %v1233_v39 = vadd.f32 1.0, %v3961_v32 }
0x1701   :  { %3962 = vrcp.f32 %v1233_v39 }
0x170b   :  { %v3963_v38 = vpop.eup %3962 }
0x170c   :  { %v1237_v51 = vmul.f32 0.0, %v3963_v38 }
0x176f   :  { %v1240_v42 = vpop.permute.xlu0 %1239 }
0x1770   :  { %v1242_v47 = vmul.f32 %v3963_v38, %v1240_v42 }
0x1772   :  { %1244 = vrot.lane.b32.xlu1 %v1242_v47, %s4145_s2 }
0x17e4   :  { %v1245_v11 = vpop.permute.xlu1 %1244 }
0x17e5   :  { %v1247_v52 = vadd.f32 %v1245_v11, %v1237_v51 }
0x17e7   :  { %3964 = vtanh.f32 %v1247_v52 }
0x17f1   :  { %v3965_v54 = vpop.eup %3964 }
0x17f2   :  { %1250 = vrot.lane.b32.xlu0 %v3965_v54, %s4144_s4 }
0x1864   :  { %v1251_v14 = vpop.permute.xlu0 %1250 }
0x1865   :  { %v4623_v40 = vmul.f32 %v3963_v38, %v1251_v14 }
0x1867   :  { %1256 = vrot.lane.b32.xlu1 %v4623_v40, %s4145_s2 }
0x18d9   :  { %v1257_v55 = vpop.permute.xlu1 %1256 }
0x18da   :  { %3541 = vmatmul.mubr.msk.f32.vlgmr.msra.gmra.mrb[12].mxu1 %vm76_vm0, %v1257_v55 }
0x18db   :  { %3712 = vmatpush3.bf16.msra.mxu1 %v4560_v62  ;;  %3562 = vmatprep.mubr.msk.f32.mxu1 %vm4142_vm1, %v4143_v10 }
0x18dc   :  { %3713 = vmatprep.subr.bf16.mxu1 %v4141_v7 }
0x18df   :  { %3715 = vmatpush3.bf16.msra.mxu1 %v4566_v1 }
0x18e0   :  { %3722 = vmatprep.subr.bf16.mxu1 %v4141_v7 }
0x19ad   :  { %v1326_v58 = vpop.f32.mrb[12].mxu1 }
0x19ae   :  { %v1330_v59 = vadd.f32 %v1326_v58, %v1254_v27  ;;  %v3542_v60 = vpop.f32.mrb[13].mxu1 }
0x19b0   :  { %3966 = vtanh.f32 %v1330_v59  ;;  %v3231_v37 = vmul.f32 -1.442695, %v1330_v59 }
0x19b2   :  { %3968 = vpow2.f32 %v3231_v37 }
0x19ba   :  { %v3967_v34 = vpop.eup %3966 }
0x19bb   :  { %1340 = vrot.lane.b32.xlu0 %v3967_v34, %s4144_s4 }
0x19bc   :  { %v3969_v41 = vpop.eup %3968 }
0x19bd   :  { %v1334_v61 = vadd.f32 1.0, %v3969_v41 }
0x19bf   :  { %3970 = vrcp.f32 %v1334_v61 }
0x19c9   :  { %v3971_v45 = vpop.eup %3970 }
0x19ca   :  { %v1338_v0 = vmul.f32 %v3971_v45, %v1247_v52 }
0x1a2d   :  { %v1341_v46 = vpop.permute.xlu0 %1340 }
0x1a2e   :  { %v1343_v50 = vmul.f32 %v3971_v45, %v1341_v46 }
0x1a30   :  { %1345 = vrot.lane.b32.xlu1 %v1343_v50, %s4145_s2 }
0x1aa2   :  { %v1346_v4 = vpop.permute.xlu1 %1345 }
0x1aa3   :  { %v1348_v5 = vadd.f32 %v1346_v4, %v1338_v0 }
0x1aa5   :  { %3972 = vtanh.f32 %v1348_v5 }
0x1aaf   :  { %v3973_v3 = vpop.eup %3972 }
0x1ab0   :  { %1351 = vrot.lane.b32.xlu0 %v3973_v3, %s4144_s4 }
0x1b22   :  { %v1352_v8 = vpop.permute.xlu0 %1351 }
0x1b23   :  { %v4637_v57 = vmul.f32 %v3971_v45, %v1352_v8 }
0x1b25   :  { %1357 = vrot.lane.b32.xlu1 %v4637_v57, %s4145_s2 }
0x1b97   :  { %v1358_v43 = vpop.permute.xlu1 %1357 }
0x1b98   :  { %3552 = vmatmul.mubr.msk.f32.vlgmr.msra.gmra.mrb[22].mxu0 %vm76_vm0, %v1358_v43 }
0x1b99   :  { %3718 = vmatpush3.bf16.msra.mxu0 %v4560_v62  ;;  %3573 = vmatprep.mubr.msk.f32.mxu0 %vm4142_vm1, %v4143_v10 }
0x1b9a   :  { %3719 = vmatprep.subr.bf16.mxu0 %v4141_v7 }
0x1b9d   :  { %3721 = vmatpush3.bf16.msra.mxu0 %v4566_v1 }
0x1b9e   :  { %3728 = vmatprep.subr.bf16.mxu0 %v4141_v7 }
0x1c6b   :  { %v1427_v53 = vpop.f32.mrb[22].mxu0 }
0x1c6c   :  { %v1431_v30 = vadd.f32 %v1427_v53, %v1355_v19  ;;  %v3553_v31 = vpop.f32.mrb[23].mxu0 }
0x1c6e   :  { %3974 = vtanh.f32 %v1431_v30  ;;  %v3233_v33 = vmul.f32 -1.442695, %v1431_v30 }
0x1c70   :  { %3976 = vpow2.f32 %v3233_v33 }
0x1c78   :  { %v3975_v27 = vpop.eup %3974 }
0x1c79   :  { %1441 = vrot.lane.b32.xlu0 %v3975_v27, %s4144_s4 }
0x1c7a   :  { %v3977_v35 = vpop.eup %3976 }
0x1c7b   :  { %v1435_v32 = vadd.f32 1.0, %v3977_v35 }
0x1c7d   :  { %3978 = vrcp.f32 %v1435_v32 }
0x1c87   :  { %v3979_v39 = vpop.eup %3978 }
0x1c88   :  { %v1439_v47 = vmul.f32 %v3979_v39, %v1348_v5 }
0x1ceb   :  { %v1442_v38 = vpop.permute.xlu0 %1441 }
0x1cec   :  { %v1444_v42 = vmul.f32 %v3979_v39, %v1442_v38 }
0x1cee   :  { %1446 = vrot.lane.b32.xlu1 %v1444_v42, %s4145_s2 }
0x1d60   :  { %v1447_v51 = vpop.permute.xlu1 %1446 }
0x1d61   :  { %v1449_v11 = vadd.f32 %v1447_v51, %v1439_v47 }
0x1d63   :  { %3980 = vtanh.f32 %v1449_v11 }
0x1d6d   :  { %v3981_v19 = vpop.eup %3980 }
0x1d6e   :  { %1452 = vrot.lane.b32.xlu0 %v3981_v19, %s4144_s4 }
0x1de0   :  { %v1453_v52 = vpop.permute.xlu0 %1452 }
0x1de1   :  { %v4656_v54 = vmul.f32 %v3979_v39, %v1453_v52 }
0x1de3   :  { %1458 = vrot.lane.b32.xlu1 %v4656_v54, %s4145_s2 }
0x1e55   :  { %v1459_v14 = vpop.permute.xlu1 %1458 }
0x1e56   :  { %3563 = vmatmul.mubr.msk.f32.vlgmr.msra.gmra.mrb[14].mxu1 %vm76_vm0, %v1459_v14 }
0x1e57   :  { %3724 = vmatpush3.bf16.msra.mxu1 %v4560_v62  ;;  %3584 = vmatprep.mubr.msk.f32.mxu1 %vm4142_vm1, %v4143_v10 }
0x1e58   :  { %3725 = vmatprep.subr.bf16.mxu1 %v4141_v7 }
0x1e5b   :  { %3727 = vmatpush3.bf16.msra.mxu1 %v4566_v1 }
0x1e5c   :  { %3734 = vmatprep.subr.bf16.mxu1 %v4141_v7 }
0x1f29   :  { %v1528_v55 = vpop.f32.mrb[14].mxu1 }
0x1f2a   :  { %v1532_v58 = vadd.f32 %v1528_v55, %v1456_v21  ;;  %v3564_v59 = vpop.f32.mrb[15].mxu1 }
0x1f2c   :  { %3982 = vtanh.f32 %v1532_v58  ;;  %v3235_v34 = vmul.f32 -1.442695, %v1532_v58 }
0x1f2e   :  { %3984 = vpow2.f32 %v3235_v34 }
0x1f36   :  { %v3983_v60 = vpop.eup %3982 }
0x1f37   :  { %1542 = vrot.lane.b32.xlu0 %v3983_v60, %s4144_s4 }
0x1f38   :  { %v3985_v37 = vpop.eup %3984 }
0x1f39   :  { %v1536_v41 = vadd.f32 1.0, %v3985_v37 }
0x1f3b   :  { %3986 = vrcp.f32 %v1536_v41 }
0x1f45   :  { %v3987_v61 = vpop.eup %3986 }
0x1f46   :  { %v1540_v50 = vmul.f32 %v3987_v61, %v1449_v11 }
0x1fa9   :  { %v1543_v45 = vpop.permute.xlu0 %1542 }
0x1faa   :  { %v1545_v46 = vmul.f32 %v3987_v61, %v1543_v45 }
0x1fac   :  { %1547 = vrot.lane.b32.xlu1 %v1545_v46, %s4145_s2 }
0x201e   :  { %v1548_v0 = vpop.permute.xlu1 %1547 }
0x201f   :  { %v1550_v4 = vadd.f32 %v1548_v0, %v1540_v50 }
0x2021   :  { %3988 = vtanh.f32 %v1550_v4 }
0x202b   :  { %v3989_v21 = vpop.eup %3988 }
0x202c   :  { %1553 = vrot.lane.b32.xlu0 %v3989_v21, %s4144_s4 }
0x209e   :  { %v1554_v5 = vpop.permute.xlu0 %1553 }
0x209f   :  { %v4675_v3 = vmul.f32 %v3987_v61, %v1554_v5 }
0x20a1   :  { %1559 = vrot.lane.b32.xlu1 %v4675_v3, %s4145_s2 }
0x2113   :  { %v1560_v8 = vpop.permute.xlu1 %1559 }
0x2114   :  { %3574 = vmatmul.mubr.msk.f32.vlgmr.msra.gmra.mrb[24].mxu0 %vm76_vm0, %v1560_v8 }
0x2115   :  { %3730 = vmatpush3.bf16.msra.mxu0 %v4560_v62  ;;  %3595 = vmatprep.mubr.msk.f32.mxu0 %vm4142_vm1, %v4143_v10 }
0x2116   :  { %3731 = vmatprep.subr.bf16.mxu0 %v4141_v7 }
0x2119   :  { %3733 = vmatpush3.bf16.msra.mxu0 %v4566_v1 }
0x21e7   :  { %v1629_v43 = vpop.f32.mrb[24].mxu0 }
0x21e8   :  { %v1633_v53 = vadd.f32 %v1629_v43, %v1557_v23  ;;  %v3575_v30 = vpop.f32.mrb[25].mxu0 }
0x21ea   :  { %3990 = vtanh.f32 %v1633_v53  ;;  %v3237_v27 = vmul.f32 -1.442695, %v1633_v53 }
0x21ec   :  { %3992 = vpow2.f32 %v3237_v27 }
0x21f4   :  { %v3991_v31 = vpop.eup %3990 }
0x21f5   :  { %1643 = vrot.lane.b32.xlu0 %v3991_v31, %s4144_s4 }
0x21f6   :  { %v3993_v33 = vpop.eup %3992 }
0x21f7   :  { %v1637_v35 = vadd.f32 1.0, %v3993_v33 }
0x21f9   :  { %3994 = vrcp.f32 %v1637_v35 }
0x2203   :  { %v3995_v32 = vpop.eup %3994 }
0x2204   :  { %v1641_v42 = vmul.f32 %v3995_v32, %v1550_v4 }
0x2267   :  { %v1644_v39 = vpop.permute.xlu0 %1643 }
0x2268   :  { %v1646_v38 = vmul.f32 %v3995_v32, %v1644_v39 }
0x226a   :  { %1648 = vrot.lane.b32.xlu1 %v1646_v38, %s4145_s2 }
0x22dc   :  { %v1649_v47 = vpop.permute.xlu1 %1648 }
0x22dd   :  { %v1651_v51 = vadd.f32 %v1649_v47, %v1641_v42 }
0x22df   :  { %3996 = vtanh.f32 %v1651_v51 }
0x22e9   :  { %v3997_v17 = vpop.eup %3996 }
0x22ea   :  { %1654 = vrot.lane.b32.xlu0 %v3997_v17, %s4144_s4 }
0x235c   :  { %v1655_v18 = vpop.permute.xlu0 %1654 }
0x235d   :  { %v4693_v23 = vmul.f32 %v3995_v32, %v1655_v18 }
0x235f   :  { %1660 = vrot.lane.b32.xlu1 %v4693_v23, %s4145_s2 }
0x23d1   :  { %v1661_v11 = vpop.permute.xlu1 %1660 }
0x23d2   :  { %3585 = vmatmul.mubr.msk.f32.vlgmr.msra.gmra.mrb[16].mxu1 %vm76_vm0, %v1661_v11 }
0x23d3   :  { %3736 = vmatpush3.bf16.msra.mxu1 %v4560_v62  ;;  %3606 = vmatprep.mubr.msk.f32.mxu1 %vm4142_vm1, %v4143_v10 }
0x23d4   :  { %3737 = vmatprep.subr.bf16.mxu1 %v4141_v7 }
0x23d7   :  { %3739 = vmatpush3.bf16.msra.mxu1 %v4566_v1 }
0x24a5   :  { %v1730_v19 = vpop.f32.mrb[16].mxu1 }
0x24a6   :  { %v1734_v52 = vadd.f32 %v1730_v19, %v1658_v20  ;;  %v3586_v14 = vpop.f32.mrb[17].mxu1  ;;  %v1974_v19 = vstv %s3244_s6 }
0x24a7   :  { %v1975_v12 = vmul.f32 %v1974_v19, %v4362_v2  ;;  %v1976_v16 = vmul.f32 %v1974_v19, %v4379_v24  ;;  %v1979_v14 = vmul.f32 %v1974_v19, %v4444_v44  ;;  %v1980_v2 = vmul.f32 %v1974_v19, %v4469_v63  ;;  %v2082_v44 = vld [vmem:[%s5242_s8 + $0x8] sm:$0xff]  ;;  %v2084_v63 = vld [vmem:[%s5242_s8 + $0x18] sm:$0xff] }
0x24a8   :  { %3998 = vtanh.f32 %v1734_v52  ;;  %v3239_v62 = vmul.f32 -1.442695, %v1734_v52  ;;  %v1978_v52 = vmul.f32 %v1974_v19, %v4423_v13  ;;  %v1981_v24 = vmul.f32 %v1974_v19, %v4536_v49  ;;  %v2081_v49 = vld [vmem:[%s5242_s8] sm:$0xff] }
0x24aa   :  { %4000 = vpow2.f32 %v3239_v62  ;;  %v3740_v62 = vpack.c.bf16 %v2084_v63, %v2082_v44  ;;  %v4896_v44 = vstv %s3246_s27 }
0x24ac   :  { %3741 = vmatprep.subr.bf16.mxu0 %v3740_v62 }
0x24b2   :  { %v3999_v55 = vpop.eup %3998 }
0x24b3   :  { %1744 = vrot.lane.b32.xlu0 %v3999_v55, %s4144_s4 }
0x24b4   :  { %v4001_v58 = vpop.eup %4000 }
0x24b5   :  { %v1738_v59 = vadd.f32 1.0, %v4001_v58 }
0x24b7   :  { %4002 = vrcp.f32 %v1738_v59 }
0x24c1   :  { %v4003_v60 = vpop.eup %4002 }
0x24c2   :  { %v1742_v37 = vmul.f32 %v4003_v60, %v1651_v51 }
0x2525   :  { %v1745_v34 = vpop.permute.xlu0 %1744 }
0x2526   :  { %v1747_v1 = vmul.f32 %v4003_v60, %v1745_v34  ;;  %v2088_v34 = vld [vmem:[%s5242_s8 + $0x38] sm:$0xff] }
0x2528   :  { %1749 = vrot.lane.b32.xlu1 %v1747_v1, %s4145_s2 }
0x259a   :  { %v1750_v41 = vpop.permute.xlu1 %1749 }
0x259b   :  { %v1752_v61 = vadd.f32 %v1750_v41, %v1742_v37  ;;  %v2085_v37 = vld [vmem:[%s5242_s8 + $0x20] sm:$0xff]  ;;  %v2087_v41 = vld [vmem:[%s5242_s8 + $0x30] sm:$0xff] }
0x259d   :  { %4004 = vtanh.f32 %v1752_v61 }
0x25a7   :  { %v4005_v26 = vpop.eup %4004 }
0x25a8   :  { %1755 = vrot.lane.b32.xlu0 %v4005_v26, %s4144_s4 }
0x261a   :  { %v1756_v48 = vpop.permute.xlu0 %1755 }
0x261b   :  { %v4711_v20 = vmul.f32 %v4003_v60, %v1756_v48  ;;  %v2086_v60 = vld [vmem:[%s5242_s8 + $0x28] sm:$0xff]  ;;  %v4782_v48 = vstv %s3245_s18 }
0x261c   :  { %v3744_v1 = vpack.c.bf16 %v2088_v34, %v2086_v60 }
0x261d   :  { %1761 = vrot.lane.b32.xlu1 %v4711_v20, %s4145_s2 }
0x268f   :  { %v1762_v45 = vpop.permute.xlu1 %1761 }
0x2690   :  { %3596 = vmatmul.mubr.msk.f32.vlgmr.msra.gmra.mrb[26].mxu0 %vm76_vm0, %v1762_v45  ;;  %v2024_v45 = vmul.f32 %v4782_v48, %v4623_v40  ;;  %v2028_v40 = vmul.f32 %v4782_v48, %v4693_v23  ;;  %v2240_v23 = vld [vmem:[%s5243_s9 + $0x10] sm:$0xff] }
0x2691   :  { %2189 = vmatprep.mubr.f32.mxu0 %v4143_v10 }
0x2763   :  { %v1831_v46 = vpop.f32.mrb[26].mxu0 }
0x2764   :  { %v1835_v50 = vadd.f32 %v1831_v46, %v1759_v15  ;;  %v3597_v0 = vpop.f32.mrb[27].mxu0  ;;  %v2025_v46 = vmul.f32 %v4782_v48, %v4637_v57  ;;  %v2241_v57 = vld [vmem:[%s5243_s9 + $0x18] sm:$0xff] }
0x2765   :  { %v2027_v0 = vmul.f32 %v4782_v48, %v4675_v3 }
0x2766   :  { %4006 = vtanh.f32 %v1835_v50  ;;  %v3241_v21 = vmul.f32 -1.442695, %v1835_v50  ;;  %v2026_v50 = vmul.f32 %v4782_v48, %v4656_v54  ;;  %v2238_v54 = vld [vmem:[%s5243_s9] sm:$0xff] }
0x2768   :  { %4008 = vpow2.f32 %v3241_v21  ;;  %v2243_v21 = vld [vmem:[%s5243_s9 + $0x28] sm:$0xff] }
0x2770   :  { %v4007_v4 = vpop.eup %4006 }
0x2771   :  { %1845 = vrot.lane.b32.xlu0 %v4007_v4, %s4144_s4  ;;  %v2239_v4 = vld [vmem:[%s5243_s9 + $0x8] sm:$0xff] }
0x2772   :  { %v4009_v5 = vpop.eup %4008  ;;  %v4809_v3 = vpack.c.bf16 %v2241_v57, %v2239_v4 }
0x2773   :  { %v1839_v8 = vadd.f32 1.0, %v4009_v5  ;;  %v2245_v5 = vld [vmem:[%s5243_s9 + $0x38] sm:$0xff] }
0x2774   :  { %3749 = vmatprep.subr.bf16.mxu1 %v4809_v3 }
0x2775   :  { %4010 = vrcp.f32 %v1839_v8  ;;  %v4820_v8 = vpack.c.bf16 %v2240_v23, %v2238_v54  ;;  %v4123_v23 = vld [vmem:[%s5235_s1 + $0x28] sm:$0xff] }
0x277f   :  { %v4011_v43 = vpop.eup %4010 }
0x2780   :  { %v1843_v31 = vmul.f32 %v4011_v43, %v1752_v61  ;;  %v3746_v61 = vpack.c.bf16 %v2087_v41, %v2085_v37 }
0x27e3   :  { %v1846_v53 = vpop.permute.xlu0 %1845 }
0x27e4   :  { %v1848_v30 = vmul.f32 %v4011_v43, %v1846_v53  ;;  %v2242_v53 = vld [vmem:[%s5243_s9 + $0x20] sm:$0xff] }
0x27e6   :  { %1850 = vrot.lane.b32.xlu1 %v1848_v30, %s4145_s2  ;;  %v2244_v30 = vld [vmem:[%s5243_s9 + $0x30] sm:$0xff] }
0x2858   :  { %v1851_v27 = vpop.permute.xlu1 %1850 }
0x2859   :  { %v1853_v33 = vadd.f32 %v1851_v27, %v1843_v31  ;;  %v2247_v31 = vld [vmem:[%s5243_s9 + $0x48] sm:$0xff]  ;;  %v2029_v27 = vmul.f32 %v4782_v48, %v4711_v20  ;;  %v2246_v20 = vld [vmem:[%s5243_s9 + $0x40] sm:$0xff] }
0x285b   :  { %4012 = vtanh.f32 %v1853_v33 }
0x2865   :  { %v4013_v28 = vpop.eup %4012 }
0x2866   :  { %1856 = vrot.lane.b32.xlu0 %v4013_v28, %s4144_s4  ;;  %v4841_v28 = vpack.c.bf16 %v2244_v30, %v2242_v53 }
0x28d8   :  { %v1857_v29 = vpop.permute.xlu0 %1856 }
0x28d9   :  { %v4725_v15 = vmul.f32 %v4011_v43, %v1857_v29  ;;  %v4822_v43 = vpack.c.bf16 %v2245_v5, %v2243_v21 }
0x28db   :  { %1862 = vrot.lane.b32.xlu1 %v4725_v15, %s4145_s2 }
0x294d   :  { %v1863_v35 = vpop.permute.xlu1 %1862 }
0x294e   :  { %3607 = vmatmul.mubr.msk.f32.vlgmr.msra.gmra.mrb[18].mxu1 %vm76_vm0, %v1863_v35  ;;  %v2248_v35 = vld [vmem:[%s5243_s9 + $0x50] sm:$0xff] }
0x294f   :  { %2354 = vmatprep.mubr.f32.mxu1 %v4143_v10  ;;  %3751 = vmatpush1.bf16.msra.mxu1 %v4820_v8 }
0x2950   :  { %3753 = vmatprep.subr.bf16.mxu1 %v4822_v43 }
0x2953   :  { %3755 = vmatpush1.bf16.msra.mxu1 %v4841_v28 }
0x2a21   :  { %v1932_v32 = vpop.f32.mrb[18].mxu1 }
0x2a22   :  { %v1936_v39 = vadd.f32 %v1932_v32, %v1860_v9  ;;  %v3608_v38 = vpop.f32.mrb[19].mxu1  ;;  %v1977_v9 = vmul.f32 %v1974_v19, %v4401_v56  ;;  %v1982_v56 = vmul.f32 %v1974_v19, %v4583_v6  ;;  %v2083_v6 = vld [vmem:[%s5242_s8 + $0x10] sm:$0xff]  ;;  %v2030_v32 = vmul.f32 %v4782_v48, %v4725_v15  ;;  %v2253_v15 = vld [vmem:[%s5243_s9 + $0x78] sm:$0xff] }
0x2a23   :  { %v3742_v59 = vpack.c.bf16 %v2083_v6, %v2081_v49  ;;  %v4878_v19 = vstv %s1961_s19  ;;  %v4120_v49 = vld [vmem:[%s5235_s1 + $0x10] sm:$0xff] }
0x2a24   :  { %4014 = vtanh.f32 %v1936_v39  ;;  %v3243_v47 = vmul.f32 -1.442695, %v1936_v39  ;;  %v4856_v39 = vpack.c.bf16 %v2248_v35, %v2246_v20  ;;  %v1968_v6 = vmul.f32 %v4120_v49, %v4878_v19 }
0x2a25   :  { %3743 = vmatpush1.bf16.msra.mxu0 %v3742_v59  ;;  %v1971_v21 = vmul.f32 %v4123_v23, %v4878_v19  ;;  %v2092_v49 = vshrl.u32 %v210_v22, 7 }
0x2a26   :  { %4016 = vpow2.f32 %v3243_v47  ;;  %3745 = vmatprep.subr.bf16.mxu0 %v3744_v1  ;;  %v4121_v1 = vld [vmem:[%s5235_s1 + $0x18] sm:$0xff] }
0x2a27   :  { %v1969_v37 = vmul.f32 %v4121_v1, %v4878_v19  ;;  %v2259_v1 = vand.u32 63, %v4304_v25 }
0x2a29   :  { %3747 = vmatpush1.bf16.msra.mxu0 %v3746_v61  ;;  %vm4967_vm3 = vcmp.lt.s32.totalorder %v2259_v1, 32 }
0x2a2a   :  { %3781 = vmatprep.subr.bf16.mxu0 %v4809_v3 }
0x2a2e   :  { %v4015_v42 = vpop.eup %4014 }
0x2a2f   :  { %1946 = vrot.lane.b32.xlu0 %v4015_v42, %s4144_s4  ;;  %v2251_v42 = vld [vmem:[%s5243_s9 + $0x68] sm:$0xff] }
0x2a30   :  { %v4017_v51 = vpop.eup %4016  ;;  %v4867_v47 = vpack.c.bf16 %v2253_v15, %v2251_v42 }
0x2a31   :  { %v1940_v17 = vadd.f32 1.0, %v4017_v51  ;;  %v2250_v51 = vld [vmem:[%s5243_s9 + $0x60] sm:$0xff] }
0x2a33   :  { %4018 = vrcp.f32 %v1940_v17  ;;  %v2252_v17 = vld [vmem:[%s5243_s9 + $0x70] sm:$0xff] }
0x2a3d   :  { %v4737_v18 = vpop.eup %4018 }
0x2a3e   :  { %v1944_v13 = vmul.f32 %v4737_v18, %v1853_v33  ;;  %v2249_v33 = vld [vmem:[%s5243_s9 + $0x58] sm:$0xff] }
0x2a3f   :  { %v4845_v29 = vpack.c.bf16 %v2249_v33, %v2247_v31 }
0x2a41   :  { %3757 = vmatprep.subr.bf16.mxu1 %v4845_v29 }
0x2a42   :  { %3759 = vmatpush1.bf16.msra.mxu1 %v4856_v39 }
0x2a43   :  { %3761 = vmatprep.subr.bf16.mxu1 %v4867_v47 }
0x2aa1   :  { %v1947_v11 = vpop.permute.xlu0 %1946 }
0x2aa2   :  { %v1949_v36 = vmul.f32 %v4737_v18, %v1947_v11 }
0x2aa4   :  { %1951 = vrot.lane.b32.xlu1 %v1949_v36, %s4145_s2  ;;  %v4875_v36 = vpack.c.bf16 %v2252_v17, %v2250_v51 }
0x2aa6   :  { %3763 = vmatpush1.bf16.msra.mxu1 %v4875_v36 }
0x2aa7   :  { %3765 = vmatprep.subr.bf16.mxu1 %v4809_v3 }
0x2aa8   :  { %1991 = vrot.lane.b32.xlu1 %v1975_v12, %s4145_s2  ;;  %v4118_v12 = vld [vmem:[%s5235_s1] sm:$0xff] }
0x2aa9   :  { %2355 = vmatmul.mubr.f32.vlgmr.msra.gmra.mrb[20].mxu1 %v4143_v10 }
0x2aaa   :  { %3767 = vmatpush1.bf16.msra.mxu1 %v4820_v8  ;;  %2456 = vmatprep.mubr.f32.mxu1 %v4143_v10 }
0x2aab   :  { %3769 = vmatprep.subr.bf16.mxu1 %v4822_v43 }
0x2aac   :  { %1993 = vrot.lane.b32.xlu1 %v1976_v16, %s4145_s2  ;;  %v1966_v16 = vmul.f32 %v4118_v12, %v4878_v19  ;;  %v4125_v12 = vld [vmem:[%s5235_s1 + $0x38] sm:$0xff] }
0x2aae   :  { %3771 = vmatpush1.bf16.msra.mxu1 %v4841_v28 }
0x2aaf   :  { %3773 = vmatprep.subr.bf16.mxu1 %v4845_v29 }
0x2ab0   :  { %1995 = vrot.lane.b32.xlu1 %v1977_v9, %s4145_s2 }
0x2ab2   :  { %3775 = vmatpush1.bf16.msra.mxu1 %v4856_v39 }
0x2ab3   :  { %3777 = vmatprep.subr.bf16.mxu1 %v4867_v47 }
0x2ab4   :  { %1997 = vrot.lane.b32.xlu1 %v1978_v52, %s4145_s2 }
0x2ab6   :  { %3779 = vmatpush1.bf16.msra.mxu1 %v4875_v36 }
0x2ab7   :  { %3797 = vmatprep.subr.bf16.mxu1 %v4809_v3 }
0x2ab8   :  { %1999 = vrot.lane.b32.xlu1 %v1979_v14, %s4145_s2 }
0x2abc   :  { %2001 = vrot.lane.b32.xlu1 %v1980_v2, %s4145_s2 }
0x2ac0   :  { %2003 = vrot.lane.b32.xlu1 %v1981_v24, %s4145_s2  ;;  %v4119_v24 = vld [vmem:[%s5235_s1 + $0x8] sm:$0xff] }
0x2ac4   :  { %2005 = vrot.lane.b32.xlu1 %v1982_v56, %s4145_s2  ;;  %v1967_v56 = vmul.f32 %v4119_v24, %v4878_v19 }
0x2b16   :  { %v1952_v55 = vpop.permute.xlu1 %1951 }
0x2b17   :  { %v1954_v58 = vadd.f32 %v1952_v55, %v1944_v13 }
0x2b19   :  { %4020 = vtanh.f32 %v1954_v58 }
0x2b1a   :  { %v1992_v38 = vpop.permute.xlu1 %1991 }
0x2b1b   :  { %v2015_v2 = vadd.f32 %v1992_v38, %v1966_v16  ;;  %v1973_v16 = vmul.f32 %v4125_v12, %v4878_v19 }
0x2b1e   :  { %v1994_v11 = vpop.permute.xlu1 %1993 }
0x2b1f   :  { %v2016_v62 = vadd.f32 %v1994_v11, %v1967_v56 }
0x2b22   :  { %v1996_v9 = vpop.permute.xlu1 %1995 }
0x2b23   :  { %v4021_v26 = vpop.eup %4020  ;;  %v2017_v34 = vadd.f32 %v1996_v9, %v1968_v6 }
0x2b24   :  { %1957 = vrot.lane.b32.xlu0 %v4021_v26, %s4144_s4 }
0x2b28   :  { %2040 = vrot.lane.b32.xlu0 %v2024_v45, %s4145_s2 }
0x2b2c   :  { %2042 = vrot.lane.b32.xlu0 %v2025_v46, %s4145_s2  ;;  %v4122_v46 = vld [vmem:[%s5235_s1 + $0x20] sm:$0xff] }
0x2b30   :  { %2044 = vrot.lane.b32.xlu0 %v2026_v50, %s4145_s2  ;;  %v1970_v50 = vmul.f32 %v4122_v46, %v4878_v19 }
0x2b34   :  { %2046 = vrot.lane.b32.xlu0 %v2027_v0, %s4145_s2 }
0x2b38   :  { %2048 = vrot.lane.b32.xlu0 %v2028_v40, %s4145_s2 }
0x2b3c   :  { %2050 = vrot.lane.b32.xlu0 %v2029_v27, %s4145_s2  ;;  %v4124_v27 = vld [vmem:[%s5235_s1 + $0x30] sm:$0xff] }
0x2b3d   :  { %v1972_v33 = vmul.f32 %v4124_v27, %v4878_v19 }
0x2b40   :  { %2052 = vrot.lane.b32.xlu0 %v2030_v32, %s4145_s2 }
0x2b7c   :  { %v2356_v56 = vpop.f32.mrb[20].mxu1 }
0x2b96   :  { %v1958_v52 = vpop.permute.xlu0 %1957 }
0x2b97   :  { %v1960_v14 = vmul.f32 %v4737_v18, %v1958_v52  ;;  %v1998_v18 = vpop.permute.xlu1 %1997 }
0x2b98   :  { %v2018_v45 = vadd.f32 %v1998_v18, %v1969_v37 }
0x2b99   :  { %v2031_v13 = vmul.f32 %v4782_v48, %v1960_v14 }
0x2b9a   :  { %v2041_v63 = vpop.permute.xlu0 %2040 }
0x2b9b   :  { %v2064_v55 = vadd.f32 %v2041_v63, %v2015_v2  ;;  %2054 = vrot.lane.b32.xlu0 %v2031_v13, %s4145_s2  ;;  %v2000_v61 = vpop.permute.xlu1 %1999  ;;  %v2358_v13 = vpop.f32.mrb[21].mxu1 }
0x2b9c   :  { %v2019_v54 = vadd.f32 %v2000_v61, %v1970_v50 }
0x2b9d   :  { %v2073_v58 = vmul.f32 %v4896_v44, %v2064_v55 }
0x2b9e   :  { %v2043_v59 = vpop.permute.xlu0 %2042 }
0x2b9f   :  { %v2065_v60 = vadd.f32 %v2043_v59, %v2016_v62  ;;  %3247 = vmatmul.mubr.msk.f32.vlgmr.msra.gmra.mrb[28].mxu0 %vm76_vm0, %v2073_v58  ;;  %v2002_v57 = vpop.permute.xlu1 %2001  ;;  %v2254_v58 = vadd.s32 128, %v4304_v25  ;;  %v2093_v59 = vsub.s32 0, %v2092_v49 }
0x2ba0   :  { %2195 = vmatprep.mubr.f32.mxu0 %v4143_v10  ;;  %3783 = vmatpush1.bf16.msra.mxu0 %v4820_v8  ;;  %v2020_v31 = vadd.f32 %v2002_v57, %v1971_v21 }
0x2ba1   :  { %v2074_v41 = vmul.f32 %v4896_v44, %v2065_v60  ;;  %3785 = vmatprep.subr.bf16.mxu0 %v4822_v43  ;;  %v2097_v60 = vsub.s32 1, %v2092_v49 }
0x2ba2   :  { %v2045_v26 = vpop.permute.xlu0 %2044 }
0x2ba3   :  { %v2066_v48 = vadd.f32 %v2045_v26, %v2017_v34  ;;  %3248 = vmatmul.mubr.msk.f32.gmra.mrb[30].mxu0 %vm76_vm0, %v2074_v41  ;;  %v2004_v35 = vpop.permute.xlu1 %2003  ;;  %v2266_v41 = vand.u32 63, %v2254_v58 }
0x2ba4   :  { %2201 = vmatprep.mubr.f32.mxu0 %v4143_v10  ;;  %3787 = vmatpush1.bf16.msra.mxu0 %v4841_v28  ;;  %v2021_v42 = vadd.f32 %v2004_v35, %v1972_v33 }
0x2ba5   :  { %v2075_v0 = vmul.f32 %v4896_v44, %v2066_v48  ;;  %3789 = vmatprep.subr.bf16.mxu0 %v4845_v29  ;;  %vm4975_vm4 = vcmp.lt.s32.totalorder %v2266_v41, 32 }
0x2ba6   :  { %v2047_v40 = vpop.permute.xlu0 %2046 }
0x2ba7   :  { %v2067_v4 = vadd.f32 %v2047_v40, %v2018_v45  ;;  %3249 = vmatmul.mubr.msk.f32.gmra.mrb[32].mxu0 %vm76_vm0, %v2075_v0  ;;  %v2006_v9 = vpop.permute.xlu1 %2005  ;;  %v3100_v0 = vld [vmem:[%s5245_s11 + $0x8] sm:$0xff] }
0x2ba8   :  { %2207 = vmatprep.mubr.f32.mxu0 %v4143_v10  ;;  %3791 = vmatpush1.bf16.msra.mxu0 %v4856_v39  ;;  %v2022_v52 = vadd.f32 %v2006_v9, %v1973_v16 }
0x2ba9   :  { %v2076_v5 = vmul.f32 %v4896_v44, %v2067_v4  ;;  %3793 = vmatprep.subr.bf16.mxu0 %v4867_v47 }
0x2baa   :  { %v2049_v53 = vpop.permute.xlu0 %2048 }
0x2bab   :  { %v2068_v30 = vadd.f32 %v2049_v53, %v2019_v54  ;;  %3250 = vmatmul.mubr.msk.f32.gmra.mrb[34].mxu0 %vm76_vm0, %v2076_v5 }
0x2bac   :  { %2213 = vmatprep.mubr.f32.mxu0 %v4143_v10  ;;  %3795 = vmatpush1.bf16.msra.mxu0 %v4875_v36 }
0x2bad   :  { %v2077_v20 = vmul.f32 %v4896_v44, %v2068_v30  ;;  %3813 = vmatprep.subr.bf16.mxu0 %v4809_v3 }
0x2bae   :  { %v2051_v32 = vpop.permute.xlu0 %2050 }
0x2baf   :  { %v2069_v38 = vadd.f32 %v2051_v32, %v2020_v31  ;;  %3251 = vmatmul.mubr.msk.f32.gmra.mrb[36].mxu0 %vm76_vm0, %v2077_v20 }
0x2bb0   :  { %2219 = vmatprep.mubr.f32.mxu0 %v4143_v10 }
0x2bb1   :  { %v2078_v15 = vmul.f32 %v4896_v44, %v2069_v38 }
0x2bb2   :  { %v2053_v51 = vpop.permute.xlu0 %2052 }
0x2bb3   :  { %v2070_v17 = vadd.f32 %v2053_v51, %v2021_v42  ;;  %3252 = vmatmul.mubr.msk.f32.gmra.mrb[38].mxu0 %vm76_vm0, %v2078_v15 }
0x2bb4   :  { %2225 = vmatprep.mubr.f32.mxu0 %v4143_v10 }
0x2bb5   :  { %v2079_v11 = vmul.f32 %v4896_v44, %v2070_v17 }
0x2bb7   :  { %3253 = vmatmul.mubr.msk.f32.gmra.mrb[40].mxu0 %vm76_vm0, %v2079_v11 }
0x2bb8   :  { %2231 = vmatprep.mubr.f32.mxu0 %v4143_v10 }
0x2c0d   :  { %v2055_v14 = vpop.permute.xlu0 %2054 }
0x2c0e   :  { %v2071_v2 = vadd.f32 %v2055_v14, %v2022_v52 }
0x2c10   :  { %v2080_v24 = vmul.f32 %v4896_v44, %v2071_v2  ;;  %v2089_v44 = vld [vmem:[%s5244_s10] sm:$0x3] }
0x2c11   :  { %v2094_v61 = vrot.slane %v2089_v44, %v2093_v59  ;;  %v2098_v26 = vrot.slane %v2089_v44, %v2097_v60 }
0x2c12   :  { %3254 = vmatmul.mubr.msk.f32.gmra.mrb[42].mxu0 %vm76_vm0, %v2080_v24 }
0x2c13   :  { %2558 = vmatprep.mubr.f32.mxu0 %v4143_v10 }
0x2c72   :  { %v2191_v63 = vpop.f32.mrb[28].mxu0 }
0x2c73   :  { %v2193_v55 = vpop.f32.mrb[29].mxu0  ;;  %v5047_v2 = vadd.f32 %v2191_v63, %v2094_v61 }
0x2c76   :  { %v2197_v18 = vpop.f32.mrb[30].mxu0 }
0x2c77   :  { %v2199_v62 = vpop.f32.mrb[31].mxu0  ;;  %v5023_v42 = vadd.f32 %v2197_v18, %v2094_v61 }
0x2c78   :  { %v5027_v17 = vadd.f32 %v2199_v62, %v2098_v26  ;;  %v5051_v62 = vadd.f32 %v2193_v55, %v2098_v26 }
0x2c7a   :  { %v2203_v6 = vpop.f32.mrb[32].mxu0 }
0x2c7b   :  { %v2205_v19 = vpop.f32.mrb[33].mxu0  ;;  %v4999_v5 = vadd.f32 %v2203_v6, %v2094_v61 }
0x2c7c   :  { %v5003_v31 = vadd.f32 %v2205_v19, %v2098_v26 }
0x2c7e   :  { %v2209_v34 = vpop.f32.mrb[34].mxu0 }
0x2c7f   :  { %v2211_v37 = vpop.f32.mrb[35].mxu0  ;;  %v4971_v45 = vadd.f32 %v2209_v34, %v2094_v61 }
0x2c80   :  { %v4979_v40 = vadd.f32 %v2211_v37, %v2098_v26 }
0x2c82   :  { %v2215_v48 = vpop.f32.mrb[36].mxu0 }
0x2c83   :  { %v4973_v46 = vadd.f32 %v2215_v48, %v2094_v61  ;;  %v2217_v50 = vpop.f32.mrb[37].mxu0 }
0x2c84   :  { %v4981_v25 = vadd.f32 %v2217_v50, %v2098_v26 }
0x2c85   :  { %v2589_v4 = vsel %vm4967_vm3, %v4971_v45, %v4973_v46  ;;  %v2691_v57 = vsel %vm4967_vm3, %v4973_v46, %v4971_v45 }
0x2c86   :  { %v2221_v54 = vpop.f32.mrb[38].mxu0  ;;  %v2590_v23 = vsel %vm4975_vm4, %v4979_v40, %v4981_v25  ;;  %v2692_v21 = vsel %vm4975_vm4, %v4981_v25, %v4979_v40 }
0x2c87   :  { %v5001_v53 = vadd.f32 %v2221_v54, %v2094_v61  ;;  %v2223_v30 = vpop.f32.mrb[39].mxu0 }
0x2c88   :  { %v5005_v27 = vadd.f32 %v2223_v30, %v2098_v26 }
0x2c89   :  { %v2487_v33 = vsel %vm4967_vm3, %v4999_v5, %v5001_v53  ;;  %v2793_v20 = vsel %vm4967_vm3, %v5001_v53, %v4999_v5 }
0x2c8a   :  { %v2227_v35 = vpop.f32.mrb[40].mxu0  ;;  %v2488_v32 = vsel %vm4975_vm4, %v5003_v31, %v5005_v27  ;;  %v2794_v38 = vsel %vm4975_vm4, %v5005_v27, %v5003_v31 }
0x2c8b   :  { %v5025_v15 = vadd.f32 %v2227_v35, %v2094_v61  ;;  %v2229_v51 = vpop.f32.mrb[41].mxu0 }
0x2c8c   :  { %v5029_v11 = vadd.f32 %v2229_v51, %v2098_v26 }
0x2c8d   :  { %v2385_v12 = vsel %vm4967_vm3, %v5023_v42, %v5025_v15  ;;  %v2895_v16 = vsel %vm4967_vm3, %v5025_v15, %v5023_v42 }
0x2c8e   :  { %v2386_v9 = vsel %vm4975_vm4, %v5027_v17, %v5029_v11  ;;  %v2896_v52 = vsel %vm4975_vm4, %v5029_v11, %v5027_v17 }
0x2ce5   :  { %v2233_v14 = vpop.f32.mrb[42].mxu0 }
0x2ce6   :  { %v5049_v24 = vadd.f32 %v2233_v14, %v2094_v61  ;;  %v2235_v18 = vpop.f32.mrb[43].mxu0 }
0x2ce7   :  { %v5053_v49 = vadd.f32 %v2235_v18, %v2098_v26 }
0x2ce8   :  { %v2285_v6 = vsel %vm4967_vm3, %v5047_v2, %v5049_v24  ;;  %v2997_v19 = vsel %vm4967_vm3, %v5049_v24, %v5047_v2  ;;  %v3099_v2 = vld [vmem:[%s5245_s11] sm:$0xff]  ;;  %v3101_v24 = vld [vmem:[%s5245_s11 + $0x10] sm:$0xff] }
0x2ce9   :  { %v2361_v58 = vadd.f32 %v2356_v56, %v2285_v6  ;;  %v2286_v63 = vsel %vm4975_vm4, %v5051_v62, %v5053_v49  ;;  %v2998_v55 = vsel %vm4975_vm4, %v5053_v49, %v5051_v62  ;;  %v3877_v62 = vpack.c.bf16 %v3100_v0, %v3099_v2  ;;  %v3102_v49 = vld [vmem:[%s5245_s11 + $0x18] sm:$0xff] }
0x2cea   :  { %v2362_v59 = vadd.f32 %v2358_v13, %v2286_v63 }
0x2ceb   :  { %v3255_v44 = vmul.f32 -1.442695, %v2361_v58 }
0x2cec   :  { %v3256_v41 = vmul.f32 -1.442695, %v2362_v59 }
0x2ced   :  { %4022 = vpow2.f32 %v3255_v44 }
0x2cee   :  { %4024 = vtanh.f32 %v2362_v59 }
0x2cf7   :  { %v4023_v60 = vpop.eup %4022 }
0x2cf8   :  { %v2366_v34 = vadd.f32 1.0, %v4023_v60  ;;  %v4025_v1 = vpop.eup %4024 }
0x2cfa   :  { %4026 = vrcp.f32 %v2366_v34 }
0x2cfb   :  { %4028 = vpow2.f32 %v3256_v41 }
0x2d04   :  { %v4027_v37 = vpop.eup %4026 }
0x2d05   :  { %v2377_v56 = vmul.f32 %v4027_v37, %v4025_v1  ;;  %v4029_v61 = vpop.eup %4028  ;;  %v2376_v48 = vmul.f32 0.0, %v4027_v37 }
0x2d06   :  { %v2373_v26 = vadd.f32 1.0, %v4029_v61 }
0x2d07   :  { %2379 = vrot.lane.b32.xlu1 %v2377_v56, %s4144_s4 }
0x2d08   :  { %4030 = vrcp.f32 %v2373_v26 }
0x2d12   :  { %v4031_v13 = vpop.eup %4030 }
0x2d79   :  { %v2380_v50 = vpop.permute.xlu1 %2379 }
0x2d7a   :  { %v2382_v54 = vadd.f32 %v2380_v50, %v2376_v48 }
0x2d7c   :  { %4032 = vtanh.f32 %v2382_v54 }
0x2d86   :  { %v4033_v30 = vpop.eup %4032 }
0x2d87   :  { %v2384_v35 = vmul.f32 %v4033_v30, %v4031_v13 }
0x2d89   :  { %2388 = vrot.lane.b32.xlu0 %v2384_v35, %s4144_s4 }
0x2dfb   :  { %v2389_v51 = vpop.permute.xlu0 %2388 }
0x2dfc   :  { %3257 = vmatmul.mubr.msk.f32.vlgmr.msra.gmra.mrb[22].mxu1 %vm2287_vm5, %v2389_v51 }
0x2dfd   :  { %3799 = vmatpush1.bf16.msra.mxu1 %v4820_v8  ;;  %2660 = vmatprep.mubr.f32.mxu1 %v4143_v10 }
0x2dfe   :  { %3801 = vmatprep.subr.bf16.mxu1 %v4822_v43 }
0x2e01   :  { %3803 = vmatpush1.bf16.msra.mxu1 %v4841_v28 }
0x2e02   :  { %3805 = vmatprep.subr.bf16.mxu1 %v4845_v29 }
0x2e05   :  { %3807 = vmatpush1.bf16.msra.mxu1 %v4856_v39 }
0x2e06   :  { %3809 = vmatprep.subr.bf16.mxu1 %v4867_v47 }
0x2e09   :  { %3811 = vmatpush1.bf16.msra.mxu1 %v4875_v36 }
0x2e0a   :  { %3829 = vmatprep.subr.bf16.mxu1 %v4809_v3 }
0x2ecf   :  { %v2458_v14 = vpop.f32.mrb[22].mxu1 }
0x2ed0   :  { %v2463_v18 = vadd.f32 %v2458_v14, %v2385_v12  ;;  %v2460_v6 = vpop.f32.mrb[23].mxu1 }
0x2ed1   :  { %v2464_v58 = vadd.f32 %v2460_v6, %v2386_v9 }
0x2ed2   :  { %v3258_v63 = vmul.f32 -1.442695, %v2463_v18 }
0x2ed3   :  { %v3259_v37 = vmul.f32 -1.442695, %v2464_v58 }
0x2ed4   :  { %4034 = vpow2.f32 %v3258_v63 }
0x2ed5   :  { %4036 = vtanh.f32 %v2464_v58 }
0x2ede   :  { %v4035_v59 = vpop.eup %4034 }
0x2edf   :  { %v2468_v44 = vadd.f32 1.0, %v4035_v59  ;;  %v4037_v60 = vpop.eup %4036 }
0x2ee1   :  { %4038 = vrcp.f32 %v2468_v44 }
0x2ee2   :  { %4040 = vpow2.f32 %v3259_v37 }
0x2eeb   :  { %v4039_v34 = vpop.eup %4038 }
0x2eec   :  { %v2479_v1 = vmul.f32 %v4039_v34, %v4037_v60  ;;  %v4041_v56 = vpop.eup %4040  ;;  %v2478_v61 = vmul.f32 %v4039_v34, %v2382_v54 }
0x2eed   :  { %v2475_v41 = vadd.f32 1.0, %v4041_v56 }
0x2eee   :  { %2481 = vrot.lane.b32.xlu1 %v2479_v1, %s4144_s4 }
0x2eef   :  { %4042 = vrcp.f32 %v2475_v41 }
0x2ef9   :  { %v4043_v9 = vpop.eup %4042 }
0x2f60   :  { %v2482_v26 = vpop.permute.xlu1 %2481 }
0x2f61   :  { %v2484_v12 = vadd.f32 %v2482_v26, %v2478_v61 }
0x2f63   :  { %4044 = vtanh.f32 %v2484_v12 }
0x2f6d   :  { %v4045_v48 = vpop.eup %4044 }
0x2f6e   :  { %v2486_v50 = vmul.f32 %v4045_v48, %v4043_v9 }
0x2f70   :  { %2490 = vrot.lane.b32.xlu0 %v2486_v50, %s4144_s4 }
0x2fe2   :  { %v2491_v13 = vpop.permute.xlu0 %2490 }
0x2fe3   :  { %3260 = vmatmul.mubr.msk.f32.vlgmr.msra.gmra.mrb[44].mxu0 %vm2287_vm5, %v2491_v13 }
0x2fe4   :  { %3815 = vmatpush1.bf16.msra.mxu0 %v4820_v8  ;;  %2762 = vmatprep.mubr.f32.mxu0 %v4143_v10 }
0x2fe5   :  { %3817 = vmatprep.subr.bf16.mxu0 %v4822_v43 }
0x2fe8   :  { %3819 = vmatpush1.bf16.msra.mxu0 %v4841_v28 }
0x2fe9   :  { %3821 = vmatprep.subr.bf16.mxu0 %v4845_v29 }
0x2fec   :  { %3823 = vmatpush1.bf16.msra.mxu0 %v4856_v39 }
0x2fed   :  { %3825 = vmatprep.subr.bf16.mxu0 %v4867_v47 }
0x2ff0   :  { %3827 = vmatpush1.bf16.msra.mxu0 %v4875_v36 }
0x2ff1   :  { %3845 = vmatprep.subr.bf16.mxu0 %v4809_v3 }
0x30b6   :  { %v2560_v54 = vpop.f32.mrb[44].mxu0 }
0x30b7   :  { %v2565_v30 = vadd.f32 %v2560_v54, %v2487_v33  ;;  %v2562_v35 = vpop.f32.mrb[45].mxu0 }
0x30b8   :  { %v2566_v51 = vadd.f32 %v2562_v35, %v2488_v32 }
0x30b9   :  { %v3261_v14 = vmul.f32 -1.442695, %v2565_v30 }
0x30ba   :  { %v3262_v44 = vmul.f32 -1.442695, %v2566_v51 }
0x30bb   :  { %4046 = vpow2.f32 %v3261_v14 }
0x30bc   :  { %4048 = vtanh.f32 %v2566_v51 }
0x30c5   :  { %v4047_v18 = vpop.eup %4046 }
0x30c6   :  { %v2570_v6 = vadd.f32 1.0, %v4047_v18  ;;  %v4049_v58 = vpop.eup %4048 }
0x30c8   :  { %4050 = vrcp.f32 %v2570_v6 }
0x30c9   :  { %4052 = vpow2.f32 %v3262_v44 }
0x30d2   :  { %v4051_v63 = vpop.eup %4050 }
0x30d3   :  { %v2581_v59 = vmul.f32 %v4051_v63, %v4049_v58  ;;  %v4053_v33 = vpop.eup %4052  ;;  %v2580_v34 = vmul.f32 %v4051_v63, %v2484_v12 }
0x30d4   :  { %v2577_v60 = vadd.f32 1.0, %v4053_v33 }
0x30d5   :  { %2583 = vrot.lane.b32.xlu1 %v2581_v59, %s4144_s4 }
0x30d6   :  { %4054 = vrcp.f32 %v2577_v60 }
0x30e0   :  { %v4055_v32 = vpop.eup %4054 }
0x3147   :  { %v2584_v1 = vpop.permute.xlu1 %2583 }
0x3148   :  { %v2586_v37 = vadd.f32 %v2584_v1, %v2580_v34 }
0x314a   :  { %4056 = vtanh.f32 %v2586_v37 }
0x3154   :  { %v4057_v56 = vpop.eup %4056 }
0x3155   :  { %v2588_v41 = vmul.f32 %v4057_v56, %v4055_v32 }
0x3157   :  { %2592 = vrot.lane.b32.xlu0 %v2588_v41, %s4144_s4 }
0x31c9   :  { %v2593_v61 = vpop.permute.xlu0 %2592 }
0x31ca   :  { %3263 = vmatmul.mubr.msk.f32.vlgmr.msra.gmra.mrb[24].mxu1 %vm2287_vm5, %v2593_v61 }
0x31cb   :  { %3831 = vmatpush1.bf16.msra.mxu1 %v4820_v8  ;;  %2864 = vmatprep.mubr.f32.mxu1 %v4143_v10 }
0x31cc   :  { %3833 = vmatprep.subr.bf16.mxu1 %v4822_v43 }
0x31cf   :  { %3835 = vmatpush1.bf16.msra.mxu1 %v4841_v28 }
0x31d0   :  { %3837 = vmatprep.subr.bf16.mxu1 %v4845_v29 }
0x31d3   :  { %3839 = vmatpush1.bf16.msra.mxu1 %v4856_v39 }
0x31d4   :  { %3841 = vmatprep.subr.bf16.mxu1 %v4867_v47 }
0x31d7   :  { %3843 = vmatpush1.bf16.msra.mxu1 %v4875_v36 }
0x31d8   :  { %3861 = vmatprep.subr.bf16.mxu1 %v4809_v3 }
0x329d   :  { %v2662_v26 = vpop.f32.mrb[24].mxu1 }
0x329e   :  { %v2667_v12 = vadd.f32 %v2662_v26, %v2589_v4  ;;  %v2664_v9 = vpop.f32.mrb[25].mxu1 }
0x329f   :  { %v2668_v48 = vadd.f32 %v2664_v9, %v2590_v23 }
0x32a0   :  { %v3264_v50 = vmul.f32 -1.442695, %v2667_v12 }
0x32a1   :  { %v3265_v51 = vmul.f32 -1.442695, %v2668_v48 }
0x32a2   :  { %4058 = vpow2.f32 %v3264_v50 }
0x32a3   :  { %4060 = vtanh.f32 %v2668_v48 }
0x32ac   :  { %v4059_v13 = vpop.eup %4058 }
0x32ad   :  { %v2672_v54 = vadd.f32 1.0, %v4059_v13  ;;  %v4061_v3 = vpop.eup %4060 }
0x32af   :  { %4062 = vrcp.f32 %v2672_v54 }
0x32b0   :  { %4064 = vpow2.f32 %v3265_v51 }
0x32b9   :  { %v4063_v30 = vpop.eup %4062 }
0x32ba   :  { %v2683_v35 = vmul.f32 %v4063_v30, %v4061_v3  ;;  %v4065_v4 = vpop.eup %4064  ;;  %v2682_v18 = vmul.f32 %v4063_v30, %v2586_v37 }
0x32bb   :  { %v2679_v14 = vadd.f32 1.0, %v4065_v4 }
0x32bc   :  { %2685 = vrot.lane.b32.xlu1 %v2683_v35, %s4144_s4 }
0x32bd   :  { %4066 = vrcp.f32 %v2679_v14 }
0x32c7   :  { %v4067_v23 = vpop.eup %4066 }
0x332e   :  { %v2686_v6 = vpop.permute.xlu1 %2685 }
0x332f   :  { %v2688_v58 = vadd.f32 %v2686_v6, %v2682_v18 }
0x3331   :  { %4068 = vtanh.f32 %v2688_v58 }
0x333b   :  { %v4069_v63 = vpop.eup %4068 }
0x333c   :  { %v2690_v59 = vmul.f32 %v4069_v63, %v4067_v23 }
0x333e   :  { %2694 = vrot.lane.b32.xlu0 %v2690_v59, %s4144_s4 }
0x33b0   :  { %v2695_v44 = vpop.permute.xlu0 %2694 }
0x33b1   :  { %3266 = vmatmul.mubr.msk.f32.vlgmr.msra.gmra.mrb[46].mxu0 %vm2287_vm5, %v2695_v44 }
0x33b2   :  { %3847 = vmatpush1.bf16.msra.mxu0 %v4820_v8  ;;  %2966 = vmatprep.mubr.f32.mxu0 %v4143_v10 }
0x33b3   :  { %3849 = vmatprep.subr.bf16.mxu0 %v4822_v43 }
0x33b6   :  { %3851 = vmatpush1.bf16.msra.mxu0 %v4841_v28 }
0x33b7   :  { %3853 = vmatprep.subr.bf16.mxu0 %v4845_v29 }
0x33ba   :  { %3855 = vmatpush1.bf16.msra.mxu0 %v4856_v39 }
0x33bb   :  { %3857 = vmatprep.subr.bf16.mxu0 %v4867_v47 }
0x33be   :  { %3859 = vmatpush1.bf16.msra.mxu0 %v4875_v36 }
0x33bf   :  { %3876 = vmatprep.subr.bf16.mxu0 %v4141_v7 }
0x3484   :  { %v2764_v33 = vpop.f32.mrb[46].mxu0 }
0x3485   :  { %v2769_v60 = vadd.f32 %v2764_v33, %v2691_v57  ;;  %v2766_v34 = vpop.f32.mrb[47].mxu0 }
0x3486   :  { %v2770_v1 = vadd.f32 %v2766_v34, %v2692_v21 }
0x3487   :  { %v3267_v37 = vmul.f32 -1.442695, %v2769_v60 }
0x3488   :  { %v3268_v45 = vmul.f32 -1.442695, %v2770_v1 }
0x3489   :  { %4070 = vpow2.f32 %v3267_v37 }
0x348a   :  { %4072 = vtanh.f32 %v2770_v1 }
0x3493   :  { %v4071_v32 = vpop.eup %4070 }
0x3494   :  { %v2774_v56 = vadd.f32 1.0, %v4071_v32  ;;  %v4073_v41 = vpop.eup %4072 }
0x3496   :  { %4074 = vrcp.f32 %v2774_v56 }
0x3497   :  { %4076 = vpow2.f32 %v3268_v45 }
0x34a0   :  { %v4075_v61 = vpop.eup %4074 }
0x34a1   :  { %v2785_v26 = vmul.f32 %v4075_v61, %v4073_v41  ;;  %v4077_v46 = vpop.eup %4076  ;;  %v2784_v12 = vmul.f32 %v4075_v61, %v2688_v58 }
0x34a2   :  { %v2781_v57 = vadd.f32 1.0, %v4077_v46 }
0x34a3   :  { %2787 = vrot.lane.b32.xlu1 %v2785_v26, %s4144_s4 }
0x34a4   :  { %4078 = vrcp.f32 %v2781_v57 }
0x34ae   :  { %v4079_v40 = vpop.eup %4078 }
0x3515   :  { %v2788_v9 = vpop.permute.xlu1 %2787 }
0x3516   :  { %v2790_v48 = vadd.f32 %v2788_v9, %v2784_v12  ;;  %v3104_v9 = vld [vmem:[%s5245_s11 + $0x28] sm:$0xff] }
0x3518   :  { %4080 = vtanh.f32 %v2790_v48 }
0x3522   :  { %v4081_v25 = vpop.eup %4080 }
0x3523   :  { %v2792_v21 = vmul.f32 %v4081_v25, %v4079_v40  ;;  %v3105_v40 = vld [vmem:[%s5245_s11 + $0x30] sm:$0xff]  ;;  %v3106_v25 = vld [vmem:[%s5245_s11 + $0x38] sm:$0xff] }
0x3525   :  { %2796 = vrot.lane.b32.xlu0 %v2792_v21, %s4144_s4  ;;  %v3886_v21 = vpack.c.bf16 %v3106_v25, %v3105_v40 }
0x3597   :  { %v2797_v50 = vpop.permute.xlu0 %2796 }
0x3598   :  { %3269 = vmatmul.mubr.msk.f32.vlgmr.msra.gmra.mrb[26].mxu1 %vm2287_vm5, %v2797_v50 }
0x3599   :  { %3863 = vmatpush1.bf16.msra.mxu1 %v4820_v8  ;;  %3068 = vmatprep.mubr.f32.mxu1 %v4143_v10 }
0x359a   :  { %3865 = vmatprep.subr.bf16.mxu1 %v4822_v43 }
0x359d   :  { %3867 = vmatpush1.bf16.msra.mxu1 %v4841_v28 }
0x359e   :  { %3869 = vmatprep.subr.bf16.mxu1 %v4845_v29 }
0x35a1   :  { %3871 = vmatpush1.bf16.msra.mxu1 %v4856_v39 }
0x35a2   :  { %3873 = vmatprep.subr.bf16.mxu1 %v4867_v47 }
0x35a5   :  { %3875 = vmatpush1.bf16.msra.mxu1 %v4875_v36 }
0x366b   :  { %v2866_v13 = vpop.f32.mrb[26].mxu1 }
0x366c   :  { %v2871_v8 = vadd.f32 %v2866_v13, %v2793_v20  ;;  %v2868_v54 = vpop.f32.mrb[27].mxu1 }
0x366d   :  { %v2872_v43 = vadd.f32 %v2868_v54, %v2794_v38 }
0x366e   :  { %v3270_v28 = vmul.f32 -1.442695, %v2871_v8 }
0x366f   :  { %v3271_v5 = vmul.f32 -1.442695, %v2872_v43 }
0x3670   :  { %4082 = vpow2.f32 %v3270_v28 }
0x3671   :  { %4084 = vtanh.f32 %v2872_v43 }
0x367a   :  { %v4083_v29 = vpop.eup %4082 }
0x367b   :  { %v2876_v39 = vadd.f32 1.0, %v4083_v29  ;;  %v4085_v47 = vpop.eup %4084 }
0x367d   :  { %4086 = vrcp.f32 %v2876_v39 }
0x367e   :  { %4088 = vpow2.f32 %v3271_v5 }
0x3687   :  { %v4087_v36 = vpop.eup %4086 }
0x3688   :  { %v2887_v3 = vmul.f32 %v4087_v36, %v4085_v47  ;;  %v4089_v53 = vpop.eup %4088  ;;  %v2886_v30 = vmul.f32 %v4087_v36, %v2790_v48 }
0x3689   :  { %v2883_v20 = vadd.f32 1.0, %v4089_v53 }
0x368a   :  { %2889 = vrot.lane.b32.xlu1 %v2887_v3, %s4144_s4 }
0x368b   :  { %4090 = vrcp.f32 %v2883_v20 }
0x3695   :  { %v4091_v31 = vpop.eup %4090 }
0x36fc   :  { %v2890_v35 = vpop.permute.xlu1 %2889 }
0x36fd   :  { %v2892_v51 = vadd.f32 %v2890_v35, %v2886_v30 }
0x36ff   :  { %4092 = vtanh.f32 %v2892_v51 }
0x3709   :  { %v4093_v27 = vpop.eup %4092 }
0x370a   :  { %v2894_v38 = vmul.f32 %v4093_v27, %v4091_v31 }
0x370c   :  { %2898 = vrot.lane.b32.xlu0 %v2894_v38, %s4144_s4 }
0x377e   :  { %v2899_v4 = vpop.permute.xlu0 %2898 }
0x377f   :  { %3272 = vmatmul.mubr.msk.f32.vlgmr.msra.gmra.mrb[48].mxu0 %vm2287_vm5, %v2899_v4 }
0x3780   :  { %3625 = vmatprep.mubr.msk.f32.mxu0 %vm4142_vm1, %v4143_v10  ;;  %3878 = vmatpush3.bf16.msra.mxu0 %v3877_v62 }
0x3781   :  { %3879 = vmatprep.subr.bf16.mxu0 %v4141_v7 }
0x3852   :  { %v2968_v14 = vpop.f32.mrb[48].mxu0 }
0x3853   :  { %v2973_v18 = vadd.f32 %v2968_v14, %v2895_v16  ;;  %v2970_v6 = vpop.f32.mrb[49].mxu0 }
0x3854   :  { %v2974_v58 = vadd.f32 %v2970_v6, %v2896_v52 }
0x3855   :  { %v3273_v23 = vmul.f32 -1.442695, %v2973_v18 }
0x3856   :  { %v3274_v42 = vmul.f32 -1.442695, %v2974_v58 }
0x3857   :  { %4094 = vpow2.f32 %v3273_v23 }
0x3858   :  { %4096 = vtanh.f32 %v2974_v58 }
0x3861   :  { %v4095_v63 = vpop.eup %4094 }
0x3862   :  { %v2978_v59 = vadd.f32 1.0, %v4095_v63  ;;  %v4097_v10 = vpop.eup %4096 }
0x3864   :  { %4098 = vrcp.f32 %v2978_v59 }
0x3865   :  { %4100 = vpow2.f32 %v3274_v42 }
0x386e   :  { %v4099_v44 = vpop.eup %4098 }
0x386f   :  { %v2989_v33 = vmul.f32 %v4099_v44, %v4097_v10  ;;  %v4101_v15 = vpop.eup %4100  ;;  %v2988_v60 = vmul.f32 %v4099_v44, %v2892_v51 }
0x3870   :  { %v2985_v16 = vadd.f32 1.0, %v4101_v15 }
0x3871   :  { %2991 = vrot.lane.b32.xlu1 %v2989_v33, %s4144_s4 }
0x3872   :  { %4102 = vrcp.f32 %v2985_v16 }
0x387c   :  { %v4103_v17 = vpop.eup %4102 }
0x38e3   :  { %v2992_v34 = vpop.permute.xlu1 %2991 }
0x38e4   :  { %v2994_v1 = vadd.f32 %v2992_v34, %v2988_v60 }
0x38e6   :  { %4104 = vtanh.f32 %v2994_v1 }
0x38f0   :  { %v4105_v11 = vpop.eup %4104 }
0x38f1   :  { %v2996_v52 = vmul.f32 %v4105_v11, %v4103_v17 }
0x38f3   :  { %3000 = vrot.lane.b32.xlu0 %v2996_v52, %s4144_s4 }
0x3965   :  { %v3001_v37 = vpop.permute.xlu0 %3000 }
0x3966   :  { %3275 = vmatmul.mubr.msk.f32.vlgmr.msra.gmra.mrb[28].mxu1 %vm2287_vm5, %v3001_v37 }
0x3a39   :  { %v3070_v32 = vpop.f32.mrb[28].mxu1 }
0x3a3a   :  { %v3075_v56 = vadd.f32 %v3070_v32, %v2997_v19  ;;  %v3072_v41 = vpop.f32.mrb[29].mxu1  ;;  %v3880_v19 = vpack.c.bf16 %v3102_v49, %v3101_v24 }
0x3a3b   :  { %v3076_v61 = vadd.f32 %v3072_v41, %v2998_v55  ;;  %v3103_v55 = vld [vmem:[%s5245_s11 + $0x20] sm:$0xff] }
0x3a3c   :  { %v3276_v26 = vmul.f32 -1.442695, %v3075_v56  ;;  %3881 = vmatpush3.bf16.msra.mxu0 %v3880_v19  ;;  %v3883_v48 = vpack.c.bf16 %v3104_v9, %v3103_v55 }
0x3a3d   :  { %3882 = vmatprep.subr.bf16.mxu0 %v4141_v7  ;;  %v3277_v50 = vmul.f32 -1.442695, %v3076_v61 }
0x3a3e   :  { %4106 = vpow2.f32 %v3276_v26 }
0x3a3f   :  { %4108 = vtanh.f32 %v3076_v61 }
0x3a40   :  { %3884 = vmatpush3.bf16.msra.mxu0 %v3883_v48 }
0x3a41   :  { %3885 = vmatprep.subr.bf16.mxu0 %v4141_v7  ;;  %v3278_v7 = vld [vmem:[%s5246_s12] ss:$0 sm:$0xff] }
0x3a44   :  { %3887 = vmatpush3.bf16.msra.mxu0 %v3886_v21 }
0x3a48   :  { %v4107_v45 = vpop.eup %4106 }
0x3a49   :  { %v3080_v46 = vadd.f32 1.0, %v4107_v45  ;;  %v4109_v57 = vpop.eup %4108 }
0x3a4b   :  { %4110 = vrcp.f32 %v3080_v46 }
0x3a4c   :  { %4112 = vpow2.f32 %v3277_v50 }
0x3a55   :  { %v4111_v12 = vpop.eup %4110 }
0x3a56   :  { %v3091_v22 = vmul.f32 %v4111_v12, %v4109_v57  ;;  %v4113_v13 = vpop.eup %4112  ;;  %v3090_v54 = vmul.f32 %v4111_v12, %v2994_v1 }
0x3a57   :  { %v3087_v8 = vadd.f32 1.0, %v4113_v13 }
0x3a58   :  { %3093 = vrot.lane.b32.xlu1 %v3091_v22, %s4144_s4 }
0x3a59   :  { %4114 = vrcp.f32 %v3087_v8 }
0x3a63   :  { %v4115_v29 = vpop.eup %4114 }
0x3aca   :  { %v3094_v43 = vpop.permute.xlu1 %3093 }
0x3acb   :  { %v3096_v28 = vadd.f32 %v3094_v43, %v3090_v54 }
0x3acd   :  { %4116 = vtanh.f32 %v3096_v28 }
0x3ad7   :  { %v4117_v39 = vpop.eup %4116 }
0x3ad8   :  { %v3098_v47 = vmul.f32 %v4117_v39, %v4115_v29 }
0x3ada   :  { %3115 = vrot.lane.b32.xlu0 %v3098_v47, %s4144_s4 }
0x3b4c   :  { %v3116_v36 = vpop.permute.xlu0 %3115 }
0x3b4d   :  { %3626 = vmatmul.mubr.msk.f32.vlgmr.msra.gmra.mrb[50].mxu0 %vm2287_vm5, %v3116_v36 }
0x3c20   :  { %v3185_v3 = vpop.f32.mrb[50].mxu0 }
0x3c21   :  { %v3186_v5 = vadd.f32 %v3278_v7, %v3185_v3  ;;  %v3627_v53 = vpop.f32.mrb[51].mxu0 }
0x3c23   :  { %3190 = vst.msk [vmem:[%s5247_s13] sm:$0xff] %vm3189_vm6, %v3186_v5 }
0x3c24   :  { %3195 = vsyncpa [#allocation3], 1 }

</bundles_post_ra>
